<compile_context>
chip_gen: v7x
topology: tpu7x:2x2x1
jax: 0.10.0
libtpu: 0.0.40
codegen_flags: <defaults>
</compile_context>

<pallas_src>
import jax
import jax.numpy as jnp
from jax.experimental import pallas as pl
from jax.experimental.pallas import tpu as pltpu


# ---------------------------------------------------------------------------
# In-kernel helpers (compile-time-static shapes).
# ---------------------------------------------------------------------------
def _bmm(a, b):
    # (TB, M, K) x (TB, K, N) -> (TB, M, N), f32 accumulation on the MXU.
    return jnp.einsum("bmk,bkn->bmn", a, b, preferred_element_type=jnp.float32)


def _conv1d_relu(x, sh_ref, w_ref, b_ref):
    # x: (TB, l, Cin); sh_ref: (2, TB, l, l) = [S_prev, S_next];
    # w_ref: (TB, Cin, 3*Cout) tap-stacked; b_ref: (1, 1, Cout).
    # out[l] = w0 . x[l-1] + w1 . x[l] + w2 . x[l+1] + b  (zero padded edges)
    cout = w_ref.shape[2] // 3
    y = _bmm(x, w_ref[...])                                   # (TB, l, 3*Cout)
    out = (_bmm(sh_ref[0], y[..., :cout])                     # y0[l-1]
           + y[..., cout:2 * cout]                            # y1[l]
           + _bmm(sh_ref[1], y[..., 2 * cout:])               # y2[l+1]
           + b_ref[...])
    return jnp.maximum(out, 0.0)


def _maxpool_k3_s2(x, pm_ref):
    # MaxPool1d(kernel=3, stride=2). pm_ref: (3, TB, l_out, l),
    # pm[k][b, i, j] = (j == 2*i + k), so (pm[k] @ x)[i] = x[2*i + k].
    w0 = _bmm(pm_ref[0], x)
    w1 = _bmm(pm_ref[1], x)
    w2 = _bmm(pm_ref[2], x)
    return jnp.maximum(jnp.maximum(w0, w1), w2)


# ---------------------------------------------------------------------------
# Pallas kernel: one TB-sample batch tile per grid step.
# ---------------------------------------------------------------------------
def cnn_lstm_kernel(x_ref, sh1_ref, pm1_ref, sh2_ref, pm2_ref, sh3_ref,
                    c1w_ref, c1b_ref, c2w_ref, c2b_ref, c3w_ref, c3b_ref,
                    lw_ref, lb_ref, f1w_ref, f1b_ref, f2w_ref, f2b_ref,
                    out_ref):
    x = x_ref[...]                                            # (TB, L, E)

    h = _conv1d_relu(x, sh1_ref, c1w_ref, c1b_ref)            # (TB, L,  32)
    h = _maxpool_k3_s2(h, pm1_ref)                            # (TB, L1, 32)
    h = _conv1d_relu(h, sh2_ref, c2w_ref, c2b_ref)            # (TB, L1, 64)
    h = _maxpool_k3_s2(h, pm2_ref)                            # (TB, L2, 64)
    h = _conv1d_relu(h, sh3_ref, c3w_ref, c3b_ref)            # (TB, L2, 128)
    g = jnp.max(h, axis=1)                                    # (TB, 128) global max pool

    # Single-time-step LSTM with h0 = c0 = 0 (W_hh and the forget gate drop
    # out).  Gates fused into one (TB,128)x(128,3H) matmul, order [i, g, o].
    hdim = lb_ref.shape[-1] // 3
    gates = jnp.dot(g, lw_ref[...], preferred_element_type=jnp.float32) + lb_ref[...]
    i_g = jax.nn.sigmoid(gates[:, :hdim])
    g_g = jnp.tanh(gates[:, hdim:2 * hdim])
    o_g = jax.nn.sigmoid(gates[:, 2 * hdim:])
    hh = o_g * jnp.tanh(i_g * g_g)                            # (TB, H)

    z = jnp.maximum(
        jnp.dot(hh, f1w_ref[...], preferred_element_type=jnp.float32) + f1b_ref[...],
        0.0)                                                  # (TB, 256)
    # TODO(synk): dropout(p=0.5) implemented as inference-mode identity.
    out_ref[...] = (jnp.dot(z, f2w_ref[...], preferred_element_type=jnp.float32)
                    + f2b_ref[...])                           # (TB, 128) lane-dense store


# ---------------------------------------------------------------------------
# Wrapper: embedding gather (glue), constant-matrix / weight prep, pallas_call.
# ---------------------------------------------------------------------------
def _bcast_tb(a, tb):
    return jnp.broadcast_to(a[None], (tb,) + a.shape)


def _shift_mats(l, tb):
    # [S_prev, S_next]: (S_prev @ y)[i] = y[i-1] (row 0 -> 0),
    #                   (S_next @ y)[i] = y[i+1] (last row -> 0).
    r = jnp.arange(l)[:, None]
    c = jnp.arange(l)[None, :]
    s_prev = (c == r - 1).astype(jnp.float32)
    s_next = (c == r + 1).astype(jnp.float32)
    return jnp.stack([_bcast_tb(s_prev, tb), _bcast_tb(s_next, tb)])   # (2, TB, l, l)


def _pool_mats(l_out, l, tb):
    # pm[k][i, j] = (j == 2*i + k)  -> picks row 2*i+k of a length-l sequence.
    r = jnp.arange(l_out)[:, None]
    c = jnp.arange(l)[None, :]
    return jnp.stack([_bcast_tb((c == 2 * r + k).astype(jnp.float32), tb)
                      for k in range(3)])                              # (3, TB, l_out, l)


def cnn_lstm_forward(tokens, params, tile_b=8):
    emb = params["embedding"][tokens].astype(jnp.float32)     # (B, L, E) gather (glue)
    B, L, E = emb.shape
    NC = params["fc2_w"].shape[-1]

    # Pad batch to a multiple of the batch tile.
    b_pad = pl.cdiv(B, tile_b) * tile_b
    if b_pad != B:
        emb = jnp.pad(emb, ((0, b_pad - B), (0, 0), (0, 0)))

    L1 = (L - 3) // 2 + 1
    L2 = (L1 - 3) // 2 + 1
    assert L2 >= 1, "sequence too short for two k=3, s=2 max pools"

    # Tap-stacked conv weights: (3, Cin, Cout) -> (TB, Cin, 3*Cout).
    fold = lambda w: _bcast_tb(jnp.concatenate([w[0], w[1], w[2]], axis=-1), tile_b)
    # Fused LSTM gates (keep i, g, o; the f gate multiplies c0 = 0).
    lw, lb = params["lstm_w"], params["lstm_b"]
    lstm_w = jnp.concatenate([lw[0], lw[2], lw[3]], axis=-1)  # (128, 3H)
    lstm_b = jnp.concatenate([lb[0], lb[2], lb[3]], axis=-1)  # (1, 3H)
    # Lane-dense output: pad fc2 columns up to a multiple of 128.
    ncp = pl.cdiv(NC, 128) * 128
    f2w = jnp.pad(params["fc2_w"], ((0, 0), (0, ncp - NC)))
    f2b = jnp.pad(params["fc2_b"], ((0, 0), (0, ncp - NC)))

    weights = (
        _shift_mats(L, tile_b), _pool_mats(L1, L, tile_b),
        _shift_mats(L1, tile_b), _pool_mats(L2, L1, tile_b),
        _shift_mats(L2, tile_b),
        fold(params["conv1_w"]), params["conv1_b"][None],     # (1,1,32)
        fold(params["conv2_w"]), params["conv2_b"][None],     # (1,1,64)
        fold(params["conv3_w"]), params["conv3_b"][None],     # (1,1,128)
        lstm_w, lstm_b,
        params["fc1_w"], params["fc1_b"], f2w, f2b,
    )

    def full_spec(a):
        # Whole array resident in VMEM, constant block index (fetched once).
        return pl.BlockSpec(a.shape, lambda i, _nd=a.ndim: (0,) * _nd)

    out = pl.pallas_call(
        cnn_lstm_kernel,
        out_shape=jax.ShapeDtypeStruct((b_pad, ncp), jnp.float32),
        grid=(b_pad // tile_b,),
        in_specs=[pl.BlockSpec((tile_b, L, E), lambda i: (i, 0, 0))]
                 + [full_spec(a) for a in weights],
        out_specs=pl.BlockSpec((tile_b, ncp), lambda i: (i, 0)),
        compiler_params=pltpu.CompilerParams(dimension_semantics=("parallel",)),
    )(emb, *weights)
    return out[:B, :NC]


# ---------------------------------------------------------------------------
# Deterministic synthetic parameters (shapes follow the PyTorch __init__).
# ---------------------------------------------------------------------------
def init_params(key, vocab_size, embed_dim, lstm_hidden_dim, num_classes):
    keys = jax.random.split(key, 12)
    scale = 0.1
    nrm = lambda k, shape: (scale * jax.random.normal(k, shape)).astype(jnp.float32)
    H = lstm_hidden_dim
    return {
        "embedding": nrm(keys[0], (vocab_size, embed_dim)),
        # Conv weights stored tap-major: (kernel=3, C_in, C_out)
        # (= PyTorch (C_out, C_in, k) transposed to (k, C_in, C_out)).
        "conv1_w": nrm(keys[1], (3, embed_dim, 32)),
        "conv1_b": nrm(keys[2], (1, 32)),
        "conv2_w": nrm(keys[3], (3, 32, 64)),
        "conv2_b": nrm(keys[4], (1, 64)),
        "conv3_w": nrm(keys[5], (3, 64, 128)),
        "conv3_b": nrm(keys[6], (1, 128)),
        # LSTM: gate-major (i, f, g, o); W_ih reshaped to (4, 128, H);
        # bias = b_ih + b_hh reshaped to (4, 1, H).  W_hh unused since h0 = 0.
        "lstm_w": nrm(keys[7], (4, 128, H)),
        "lstm_b": nrm(keys[8], (4, 1, H)),
        "fc1_w": nrm(keys[9], (H, 256)),
        "fc1_b": nrm(keys[10], (1, 256)),
        "fc2_w": nrm(keys[11], (256, num_classes)),
        "fc2_b": jnp.zeros((1, num_classes), jnp.float32),
    }


# ---------------------------------------------------------------------------
# Pure-JAX reference (same math) for a sanity check.
# ---------------------------------------------------------------------------
def reference_forward(tokens, params):
    emb = params["embedding"][tokens].astype(jnp.float32)     # (B, L, E)

    def conv_relu(x, w, b):                                   # x (B, L, Cin)
        xp = jnp.pad(x, ((0, 0), (1, 1), (0, 0)))
        out = (jnp.einsum("blc,cd->bld", xp[:, :-2], w[0])
               + jnp.einsum("blc,cd->bld", xp[:, 1:-1], w[1])
               + jnp.einsum("blc,cd->bld", xp[:, 2:], w[2])) + b
        return jnp.maximum(out, 0.0)

    def pool(x):
        L = x.shape[1]
        Lo = (L - 3) // 2 + 1
        cols = [x[:, 2 * i:2 * i + 3].max(axis=1) for i in range(Lo)]
        return jnp.stack(cols, axis=1)

    h = pool(conv_relu(emb, params["conv1_w"], params["conv1_b"]))
    h = pool(conv_relu(h, params["conv2_w"], params["conv2_b"]))
    h = conv_relu(h, params["conv3_w"], params["conv3_b"])
    g = h.max(axis=1)                                         # (B, 128)
    gates = jnp.einsum("bc,kcd->bkd", g, params["lstm_w"]) + params["lstm_b"][:, 0]
    i_g = jax.nn.sigmoid(gates[:, 0])
    g_g = jnp.tanh(gates[:, 2])
    o_g = jax.nn.sigmoid(gates[:, 3])
    hh = o_g * jnp.tanh(i_g * g_g)
    z = jnp.maximum(hh @ params["fc1_w"] + params["fc1_b"], 0.0)
    return z @ params["fc2_w"] + params["fc2_b"]


if __name__ == "__main__":
    vocab_size, embed_dim, lstm_hidden_dim, num_classes = 64, 16, 32, 8
    B, L = 16, 16

    key = jax.random.PRNGKey(0)
    pkey, tkey = jax.random.split(key)
    params = init_params(pkey, vocab_size, embed_dim, lstm_hidden_dim, num_classes)
    tokens = jax.random.randint(tkey, (B, L), 0, vocab_size, dtype=jnp.int32)

    out = cnn_lstm_forward(tokens, params, tile_b=8)
    out = jax.block_until_ready(out)
    assert out.shape == (B, num_classes)

    ref = reference_forward(tokens, params)
    assert jnp.allclose(out, ref, atol=1e-2, rtol=1e-2)

    print("KERNEL_OK")
</pallas_src>

<mosaic_0001>
module attributes {stable_mosaic.version = 11 : i64} {
  func.func @cnn_lstm_kernel(%arg0: i32, %arg1: memref<8x16x16xf32, #tpu.memory_space<vmem>>, %arg2: memref<2x8x16x16xf32, #tpu.memory_space<vmem>>, %arg3: memref<3x8x7x16xf32, #tpu.memory_space<vmem>>, %arg4: memref<2x8x7x7xf32, #tpu.memory_space<vmem>>, %arg5: memref<3x8x3x7xf32, #tpu.memory_space<vmem>>, %arg6: memref<2x8x3x3xf32, #tpu.memory_space<vmem>>, %arg7: memref<8x16x96xf32, #tpu.memory_space<vmem>>, %arg8: memref<1x1x32xf32, #tpu.memory_space<vmem>>, %arg9: memref<8x32x192xf32, #tpu.memory_space<vmem>>, %arg10: memref<1x1x64xf32, #tpu.memory_space<vmem>>, %arg11: memref<8x64x384xf32, #tpu.memory_space<vmem>>, %arg12: memref<1x1x128xf32, #tpu.memory_space<vmem>>, %arg13: memref<128x96xf32, #tpu.memory_space<vmem>>, %arg14: memref<1x96xf32, #tpu.memory_space<vmem>>, %arg15: memref<32x256xf32, #tpu.memory_space<vmem>>, %arg16: memref<1x256xf32, #tpu.memory_space<vmem>>, %arg17: memref<256x128xf32, #tpu.memory_space<vmem>>, %arg18: memref<1x128xf32, #tpu.memory_space<vmem>>, %arg19: memref<8x128xf32, #tpu.memory_space<vmem>>) attributes {dimension_semantics = [#tpu.dimension_semantics<parallel>], iteration_bounds = array<i64: 2>, scalar_prefetch = 0 : i64, scratch_operands = 0 : i64, tpu.core_type = #tpu.core_type<tc>, window_params = [{transform_indices = @transform_0, window_bounds = array<i64: 8, 16, 16>}, {pipeline_mode = #tpu.pipeline_mode<synchronous>, transform_indices = @transform_1, window_bounds = array<i64: 2, 8, 16, 16>}, {pipeline_mode = #tpu.pipeline_mode<synchronous>, transform_indices = @transform_2, window_bounds = array<i64: 3, 8, 7, 16>}, {pipeline_mode = #tpu.pipeline_mode<synchronous>, transform_indices = @transform_3, window_bounds = array<i64: 2, 8, 7, 7>}, {pipeline_mode = #tpu.pipeline_mode<synchronous>, transform_indices = @transform_4, window_bounds = array<i64: 3, 8, 3, 7>}, {pipeline_mode = #tpu.pipeline_mode<synchronous>, transform_indices = @transform_5, window_bounds = array<i64: 2, 8, 3, 3>}, {pipeline_mode = #tpu.pipeline_mode<synchronous>, transform_indices = @transform_6, window_bounds = array<i64: 8, 16, 96>}, {pipeline_mode = #tpu.pipeline_mode<synchronous>, transform_indices = @transform_7, window_bounds = array<i64: 1, 1, 32>}, {pipeline_mode = #tpu.pipeline_mode<synchronous>, transform_indices = @transform_8, window_bounds = array<i64: 8, 32, 192>}, {pipeline_mode = #tpu.pipeline_mode<synchronous>, transform_indices = @transform_9, window_bounds = array<i64: 1, 1, 64>}, {pipeline_mode = #tpu.pipeline_mode<synchronous>, transform_indices = @transform_10, window_bounds = array<i64: 8, 64, 384>}, {pipeline_mode = #tpu.pipeline_mode<synchronous>, transform_indices = @transform_11, window_bounds = array<i64: 1, 1, 128>}, {pipeline_mode = #tpu.pipeline_mode<synchronous>, transform_indices = @transform_12, window_bounds = array<i64: 128, 96>}, {pipeline_mode = #tpu.pipeline_mode<synchronous>, transform_indices = @transform_13, window_bounds = array<i64: 1, 96>}, {pipeline_mode = #tpu.pipeline_mode<synchronous>, transform_indices = @transform_14, window_bounds = array<i64: 32, 256>}, {pipeline_mode = #tpu.pipeline_mode<synchronous>, transform_indices = @transform_15, window_bounds = array<i64: 1, 256>}, {pipeline_mode = #tpu.pipeline_mode<synchronous>, transform_indices = @transform_16, window_bounds = array<i64: 256, 128>}, {pipeline_mode = #tpu.pipeline_mode<synchronous>, transform_indices = @transform_17, window_bounds = array<i64: 1, 128>}, {transform_indices = @transform_18, window_bounds = array<i64: 8, 128>}]} {
    %c0 = arith.constant 0 : index
    %c0_0 = arith.constant 0 : index
    %c0_1 = arith.constant 0 : index
    %0 = vector.load %arg1[%c0, %c0_0, %c0_1] : memref<8x16x16xf32, #tpu.memory_space<vmem>>, vector<8x16x16xf32>
    %c0_2 = arith.constant 0 : index
    %c0_3 = arith.constant 0 : index
    %c0_4 = arith.constant 0 : index
    %1 = vector.load %arg7[%c0_2, %c0_3, %c0_4] : memref<8x16x96xf32, #tpu.memory_space<vmem>>, vector<8x16x96xf32>
    "tpu.trace_start"() <{level = 10 : i32, message = "bmk,bkn->bmn"}> : () -> ()
    %cst = arith.constant dense<0.000000e+00> : vector<8x16x96xf32>
    %2 = tpu.matmul %0, %1, %cst {dimension_numbers = #tpu.dot_dimension_numbers<[2], [1], [1], [2], [0, 0, 0, 1, 1, 2], [0], [0]>} : vector<8x16x16xf32>, vector<8x16x96xf32>, vector<8x16x96xf32> -> vector<8x16x96xf32>
    "tpu.trace_stop"() : () -> ()
    %c0_5 = arith.constant 0 : index
    %c0_6 = arith.constant 0 : index
    %c0_7 = arith.constant 0 : index
    %c0_8 = arith.constant 0 : index
    %3 = vector.load %arg2[%c0_5, %c0_6, %c0_7, %c0_8] : memref<2x8x16x16xf32, #tpu.memory_space<vmem>>, vector<1x8x16x16xf32>
    %4 = vector.shape_cast %3 : vector<1x8x16x16xf32> to vector<8x16x16xf32>
    %5 = vector.extract_strided_slice %2 {offsets = [0, 0, 0], sizes = [8, 16, 32], strides = [1, 1, 1]} : vector<8x16x96xf32> to vector<8x16x32xf32>
    "tpu.trace_start"() <{level = 10 : i32, message = "bmk,bkn->bmn"}> : () -> ()
    %cst_9 = arith.constant dense<0.000000e+00> : vector<8x16x32xf32>
    %6 = tpu.matmul %4, %5, %cst_9 {dimension_numbers = #tpu.dot_dimension_numbers<[2], [1], [1], [2], [0, 0, 0, 1, 1, 2], [0], [0]>} : vector<8x16x16xf32>, vector<8x16x32xf32>, vector<8x16x32xf32> -> vector<8x16x32xf32>
    "tpu.trace_stop"() : () -> ()
    %7 = vector.extract_strided_slice %2 {offsets = [0, 0, 32], sizes = [8, 16, 32], strides = [1, 1, 1]} : vector<8x16x96xf32> to vector<8x16x32xf32>
    %8 = arith.addf %6, %7 : vector<8x16x32xf32>
    %c1 = arith.constant 1 : index
    %c0_10 = arith.constant 0 : index
    %c0_11 = arith.constant 0 : index
    %c0_12 = arith.constant 0 : index
    %9 = vector.load %arg2[%c1, %c0_10, %c0_11, %c0_12] : memref<2x8x16x16xf32, #tpu.memory_space<vmem>>, vector<1x8x16x16xf32>
    %10 = vector.shape_cast %9 : vector<1x8x16x16xf32> to vector<8x16x16xf32>
    %11 = vector.extract_strided_slice %2 {offsets = [0, 0, 64], sizes = [8, 16, 32], strides = [1, 1, 1]} : vector<8x16x96xf32> to vector<8x16x32xf32>
    "tpu.trace_start"() <{level = 10 : i32, message = "bmk,bkn->bmn"}> : () -> ()
    %cst_13 = arith.constant dense<0.000000e+00> : vector<8x16x32xf32>
    %12 = tpu.matmul %10, %11, %cst_13 {dimension_numbers = #tpu.dot_dimension_numbers<[2], [1], [1], [2], [0, 0, 0, 1, 1, 2], [0], [0]>} : vector<8x16x16xf32>, vector<8x16x32xf32>, vector<8x16x32xf32> -> vector<8x16x32xf32>
    "tpu.trace_stop"() : () -> ()
    %13 = arith.addf %8, %12 : vector<8x16x32xf32>
    %c0_14 = arith.constant 0 : index
    %c0_15 = arith.constant 0 : index
    %c0_16 = arith.constant 0 : index
    %14 = vector.load %arg8[%c0_14, %c0_15, %c0_16] : memref<1x1x32xf32, #tpu.memory_space<vmem>>, vector<1x1x32xf32>
    %15 = vector.broadcast %14 : vector<1x1x32xf32> to vector<8x16x32xf32>
    %16 = arith.addf %13, %15 : vector<8x16x32xf32>
    %cst_17 = arith.constant 0.000000e+00 : f32
    %17 = vector.broadcast %cst_17 : f32 to vector<8x16x32xf32>
    %18 = arith.maximumf %16, %17 : vector<8x16x32xf32>
    %c0_18 = arith.constant 0 : index
    %c0_19 = arith.constant 0 : index
    %c0_20 = arith.constant 0 : index
    %c0_21 = arith.constant 0 : index
    %19 = vector.load %arg3[%c0_18, %c0_19, %c0_20, %c0_21] : memref<3x8x7x16xf32, #tpu.memory_space<vmem>>, vector<1x8x7x16xf32>
    %20 = vector.shape_cast %19 : vector<1x8x7x16xf32> to vector<8x7x16xf32>
    "tpu.trace_start"() <{level = 10 : i32, message = "bmk,bkn->bmn"}> : () -> ()
    %cst_22 = arith.constant dense<0.000000e+00> : vector<8x7x32xf32>
    %21 = tpu.matmul %20, %18, %cst_22 {dimension_numbers = #tpu.dot_dimension_numbers<[2], [1], [1], [2], [0, 0, 0, 1, 1, 2], [0], [0]>} : vector<8x7x16xf32>, vector<8x16x32xf32>, vector<8x7x32xf32> -> vector<8x7x32xf32>
    "tpu.trace_stop"() : () -> ()
    %c1_23 = arith.constant 1 : index
    %c0_24 = arith.constant 0 : index
    %c0_25 = arith.constant 0 : index
    %c0_26 = arith.constant 0 : index
    %22 = vector.load %arg3[%c1_23, %c0_24, %c0_25, %c0_26] : memref<3x8x7x16xf32, #tpu.memory_space<vmem>>, vector<1x8x7x16xf32>
    %23 = vector.shape_cast %22 : vector<1x8x7x16xf32> to vector<8x7x16xf32>
    "tpu.trace_start"() <{level = 10 : i32, message = "bmk,bkn->bmn"}> : () -> ()
    %cst_27 = arith.constant dense<0.000000e+00> : vector<8x7x32xf32>
    %24 = tpu.matmul %23, %18, %cst_27 {dimension_numbers = #tpu.dot_dimension_numbers<[2], [1], [1], [2], [0, 0, 0, 1, 1, 2], [0], [0]>} : vector<8x7x16xf32>, vector<8x16x32xf32>, vector<8x7x32xf32> -> vector<8x7x32xf32>
    "tpu.trace_stop"() : () -> ()
    %c2 = arith.constant 2 : index
    %c0_28 = arith.constant 0 : index
    %c0_29 = arith.constant 0 : index
    %c0_30 = arith.constant 0 : index
    %25 = vector.load %arg3[%c2, %c0_28, %c0_29, %c0_30] : memref<3x8x7x16xf32, #tpu.memory_space<vmem>>, vector<1x8x7x16xf32>
    %26 = vector.shape_cast %25 : vector<1x8x7x16xf32> to vector<8x7x16xf32>
    "tpu.trace_start"() <{level = 10 : i32, message = "bmk,bkn->bmn"}> : () -> ()
    %cst_31 = arith.constant dense<0.000000e+00> : vector<8x7x32xf32>
    %27 = tpu.matmul %26, %18, %cst_31 {dimension_numbers = #tpu.dot_dimension_numbers<[2], [1], [1], [2], [0, 0, 0, 1, 1, 2], [0], [0]>} : vector<8x7x16xf32>, vector<8x16x32xf32>, vector<8x7x32xf32> -> vector<8x7x32xf32>
    "tpu.trace_stop"() : () -> ()
    %28 = arith.maximumf %21, %24 : vector<8x7x32xf32>
    %29 = arith.maximumf %28, %27 : vector<8x7x32xf32>
    %c0_32 = arith.constant 0 : index
    %c0_33 = arith.constant 0 : index
    %c0_34 = arith.constant 0 : index
    %30 = vector.load %arg9[%c0_32, %c0_33, %c0_34] : memref<8x32x192xf32, #tpu.memory_space<vmem>>, vector<8x32x192xf32>
    "tpu.trace_start"() <{level = 10 : i32, message = "bmk,bkn->bmn"}> : () -> ()
    %cst_35 = arith.constant dense<0.000000e+00> : vector<8x7x192xf32>
    %31 = tpu.matmul %29, %30, %cst_35 {dimension_numbers = #tpu.dot_dimension_numbers<[2], [1], [1], [2], [0, 0, 0, 1, 1, 2], [0], [0]>} : vector<8x7x32xf32>, vector<8x32x192xf32>, vector<8x7x192xf32> -> vector<8x7x192xf32>
    "tpu.trace_stop"() : () -> ()
    %c0_36 = arith.constant 0 : index
    %c0_37 = arith.constant 0 : index
    %c0_38 = arith.constant 0 : index
    %c0_39 = arith.constant 0 : index
    %32 = vector.load %arg4[%c0_36, %c0_37, %c0_38, %c0_39] : memref<2x8x7x7xf32, #tpu.memory_space<vmem>>, vector<1x8x7x7xf32>
    %33 = vector.shape_cast %32 : vector<1x8x7x7xf32> to vector<8x7x7xf32>
    %34 = vector.extract_strided_slice %31 {offsets = [0, 0, 0], sizes = [8, 7, 64], strides = [1, 1, 1]} : vector<8x7x192xf32> to vector<8x7x64xf32>
    "tpu.trace_start"() <{level = 10 : i32, message = "bmk,bkn->bmn"}> : () -> ()
    %cst_40 = arith.constant dense<0.000000e+00> : vector<8x7x64xf32>
    %35 = tpu.matmul %33, %34, %cst_40 {dimension_numbers = #tpu.dot_dimension_numbers<[2], [1], [1], [2], [0, 0, 0, 1, 1, 2], [0], [0]>} : vector<8x7x7xf32>, vector<8x7x64xf32>, vector<8x7x64xf32> -> vector<8x7x64xf32>
    "tpu.trace_stop"() : () -> ()
    %36 = vector.extract_strided_slice %31 {offsets = [0, 0, 64], sizes = [8, 7, 64], strides = [1, 1, 1]} : vector<8x7x192xf32> to vector<8x7x64xf32>
    %37 = arith.addf %35, %36 : vector<8x7x64xf32>
    %c1_41 = arith.constant 1 : index
    %c0_42 = arith.constant 0 : index
    %c0_43 = arith.constant 0 : index
    %c0_44 = arith.constant 0 : index
    %38 = vector.load %arg4[%c1_41, %c0_42, %c0_43, %c0_44] : memref<2x8x7x7xf32, #tpu.memory_space<vmem>>, vector<1x8x7x7xf32>
    %39 = vector.shape_cast %38 : vector<1x8x7x7xf32> to vector<8x7x7xf32>
    %40 = vector.extract_strided_slice %31 {offsets = [0, 0, 128], sizes = [8, 7, 64], strides = [1, 1, 1]} : vector<8x7x192xf32> to vector<8x7x64xf32>
    "tpu.trace_start"() <{level = 10 : i32, message = "bmk,bkn->bmn"}> : () -> ()
    %cst_45 = arith.constant dense<0.000000e+00> : vector<8x7x64xf32>
    %41 = tpu.matmul %39, %40, %cst_45 {dimension_numbers = #tpu.dot_dimension_numbers<[2], [1], [1], [2], [0, 0, 0, 1, 1, 2], [0], [0]>} : vector<8x7x7xf32>, vector<8x7x64xf32>, vector<8x7x64xf32> -> vector<8x7x64xf32>
    "tpu.trace_stop"() : () -> ()
    %42 = arith.addf %37, %41 : vector<8x7x64xf32>
    %c0_46 = arith.constant 0 : index
    %c0_47 = arith.constant 0 : index
    %c0_48 = arith.constant 0 : index
    %43 = vector.load %arg10[%c0_46, %c0_47, %c0_48] : memref<1x1x64xf32, #tpu.memory_space<vmem>>, vector<1x1x64xf32>
    %44 = vector.broadcast %43 : vector<1x1x64xf32> to vector<8x7x64xf32>
    %45 = arith.addf %42, %44 : vector<8x7x64xf32>
    %cst_49 = arith.constant 0.000000e+00 : f32
    %46 = vector.broadcast %cst_49 : f32 to vector<8x7x64xf32>
    %47 = arith.maximumf %45, %46 : vector<8x7x64xf32>
    %c0_50 = arith.constant 0 : index
    %c0_51 = arith.constant 0 : index
    %c0_52 = arith.constant 0 : index
    %c0_53 = arith.constant 0 : index
    %48 = vector.load %arg5[%c0_50, %c0_51, %c0_52, %c0_53] : memref<3x8x3x7xf32, #tpu.memory_space<vmem>>, vector<1x8x3x7xf32>
    %49 = vector.shape_cast %48 : vector<1x8x3x7xf32> to vector<8x3x7xf32>
    "tpu.trace_start"() <{level = 10 : i32, message = "bmk,bkn->bmn"}> : () -> ()
    %cst_54 = arith.constant dense<0.000000e+00> : vector<8x3x64xf32>
    %50 = tpu.matmul %49, %47, %cst_54 {dimension_numbers = #tpu.dot_dimension_numbers<[2], [1], [1], [2], [0, 0, 0, 1, 1, 2], [0], [0]>} : vector<8x3x7xf32>, vector<8x7x64xf32>, vector<8x3x64xf32> -> vector<8x3x64xf32>
    "tpu.trace_stop"() : () -> ()
    %c1_55 = arith.constant 1 : index
    %c0_56 = arith.constant 0 : index
    %c0_57 = arith.constant 0 : index
    %c0_58 = arith.constant 0 : index
    %51 = vector.load %arg5[%c1_55, %c0_56, %c0_57, %c0_58] : memref<3x8x3x7xf32, #tpu.memory_space<vmem>>, vector<1x8x3x7xf32>
    %52 = vector.shape_cast %51 : vector<1x8x3x7xf32> to vector<8x3x7xf32>
    "tpu.trace_start"() <{level = 10 : i32, message = "bmk,bkn->bmn"}> : () -> ()
    %cst_59 = arith.constant dense<0.000000e+00> : vector<8x3x64xf32>
    %53 = tpu.matmul %52, %47, %cst_59 {dimension_numbers = #tpu.dot_dimension_numbers<[2], [1], [1], [2], [0, 0, 0, 1, 1, 2], [0], [0]>} : vector<8x3x7xf32>, vector<8x7x64xf32>, vector<8x3x64xf32> -> vector<8x3x64xf32>
    "tpu.trace_stop"() : () -> ()
    %c2_60 = arith.constant 2 : index
    %c0_61 = arith.constant 0 : index
    %c0_62 = arith.constant 0 : index
    %c0_63 = arith.constant 0 : index
    %54 = vector.load %arg5[%c2_60, %c0_61, %c0_62, %c0_63] : memref<3x8x3x7xf32, #tpu.memory_space<vmem>>, vector<1x8x3x7xf32>
    %55 = vector.shape_cast %54 : vector<1x8x3x7xf32> to vector<8x3x7xf32>
    "tpu.trace_start"() <{level = 10 : i32, message = "bmk,bkn->bmn"}> : () -> ()
    %cst_64 = arith.constant dense<0.000000e+00> : vector<8x3x64xf32>
    %56 = tpu.matmul %55, %47, %cst_64 {dimension_numbers = #tpu.dot_dimension_numbers<[2], [1], [1], [2], [0, 0, 0, 1, 1, 2], [0], [0]>} : vector<8x3x7xf32>, vector<8x7x64xf32>, vector<8x3x64xf32> -> vector<8x3x64xf32>
    "tpu.trace_stop"() : () -> ()
    %57 = arith.maximumf %50, %53 : vector<8x3x64xf32>
    %58 = arith.maximumf %57, %56 : vector<8x3x64xf32>
    %c0_65 = arith.constant 0 : index
    %c0_66 = arith.constant 0 : index
    %c0_67 = arith.constant 0 : index
    %59 = vector.load %arg11[%c0_65, %c0_66, %c0_67] : memref<8x64x384xf32, #tpu.memory_space<vmem>>, vector<8x64x384xf32>
    "tpu.trace_start"() <{level = 10 : i32, message = "bmk,bkn->bmn"}> : () -> ()
    %cst_68 = arith.constant dense<0.000000e+00> : vector<8x3x384xf32>
    %60 = tpu.matmul %58, %59, %cst_68 {dimension_numbers = #tpu.dot_dimension_numbers<[2], [1], [1], [2], [0, 0, 0, 1, 1, 2], [0], [0]>} : vector<8x3x64xf32>, vector<8x64x384xf32>, vector<8x3x384xf32> -> vector<8x3x384xf32>
    "tpu.trace_stop"() : () -> ()
    %c0_69 = arith.constant 0 : index
    %c0_70 = arith.constant 0 : index
    %c0_71 = arith.constant 0 : index
    %c0_72 = arith.constant 0 : index
    %61 = vector.load %arg6[%c0_69, %c0_70, %c0_71, %c0_72] : memref<2x8x3x3xf32, #tpu.memory_space<vmem>>, vector<1x8x3x3xf32>
    %62 = vector.shape_cast %61 : vector<1x8x3x3xf32> to vector<8x3x3xf32>
    %63 = vector.extract_strided_slice %60 {offsets = [0, 0, 0], sizes = [8, 3, 128], strides = [1, 1, 1]} : vector<8x3x384xf32> to vector<8x3x128xf32>
    "tpu.trace_start"() <{level = 10 : i32, message = "bmk,bkn->bmn"}> : () -> ()
    %cst_73 = arith.constant dense<0.000000e+00> : vector<8x3x128xf32>
    %64 = tpu.matmul %62, %63, %cst_73 {dimension_numbers = #tpu.dot_dimension_numbers<[2], [1], [1], [2], [0, 0, 0, 1, 1, 2], [0], [0]>} : vector<8x3x3xf32>, vector<8x3x128xf32>, vector<8x3x128xf32> -> vector<8x3x128xf32>
    "tpu.trace_stop"() : () -> ()
    %65 = vector.extract_strided_slice %60 {offsets = [0, 0, 128], sizes = [8, 3, 128], strides = [1, 1, 1]} : vector<8x3x384xf32> to vector<8x3x128xf32>
    %66 = arith.addf %64, %65 : vector<8x3x128xf32>
    %c1_74 = arith.constant 1 : index
    %c0_75 = arith.constant 0 : index
    %c0_76 = arith.constant 0 : index
    %c0_77 = arith.constant 0 : index
    %67 = vector.load %arg6[%c1_74, %c0_75, %c0_76, %c0_77] : memref<2x8x3x3xf32, #tpu.memory_space<vmem>>, vector<1x8x3x3xf32>
    %68 = vector.shape_cast %67 : vector<1x8x3x3xf32> to vector<8x3x3xf32>
    %69 = vector.extract_strided_slice %60 {offsets = [0, 0, 256], sizes = [8, 3, 128], strides = [1, 1, 1]} : vector<8x3x384xf32> to vector<8x3x128xf32>
    "tpu.trace_start"() <{level = 10 : i32, message = "bmk,bkn->bmn"}> : () -> ()
    %cst_78 = arith.constant dense<0.000000e+00> : vector<8x3x128xf32>
    %70 = tpu.matmul %68, %69, %cst_78 {dimension_numbers = #tpu.dot_dimension_numbers<[2], [1], [1], [2], [0, 0, 0, 1, 1, 2], [0], [0]>} : vector<8x3x3xf32>, vector<8x3x128xf32>, vector<8x3x128xf32> -> vector<8x3x128xf32>
    "tpu.trace_stop"() : () -> ()
    %71 = arith.addf %66, %70 : vector<8x3x128xf32>
    %c0_79 = arith.constant 0 : index
    %c0_80 = arith.constant 0 : index
    %c0_81 = arith.constant 0 : index
    %72 = vector.load %arg12[%c0_79, %c0_80, %c0_81] : memref<1x1x128xf32, #tpu.memory_space<vmem>>, vector<1x1x128xf32>
    %73 = vector.broadcast %72 : vector<1x1x128xf32> to vector<8x3x128xf32>
    %74 = arith.addf %71, %73 : vector<8x3x128xf32>
    %cst_82 = arith.constant 0.000000e+00 : f32
    %75 = vector.broadcast %cst_82 : f32 to vector<8x3x128xf32>
    %76 = arith.maximumf %74, %75 : vector<8x3x128xf32>
    %cst_83 = arith.constant dense<0xFF800000> : vector<8x128xf32>
    %77 = vector.multi_reduction <maximumf>, %76, %cst_83 [1] : vector<8x3x128xf32> to vector<8x128xf32>
    %c0_84 = arith.constant 0 : index
    %c0_85 = arith.constant 0 : index
    %78 = vector.load %arg13[%c0_84, %c0_85] : memref<128x96xf32, #tpu.memory_space<vmem>>, vector<128x96xf32>
    %cst_86 = arith.constant dense<0.000000e+00> : vector<8x96xf32>
    %79 = tpu.matmul %77, %78, %cst_86 {dimension_numbers = #tpu.dot_dimension_numbers<[1], [0], [0], [1], [0, 0, 1, 1], [], []>} : vector<8x128xf32>, vector<128x96xf32>, vector<8x96xf32> -> vector<8x96xf32>
    %c0_87 = arith.constant 0 : index
    %c0_88 = arith.constant 0 : index
    %80 = vector.load %arg14[%c0_87, %c0_88] : memref<1x96xf32, #tpu.memory_space<vmem>>, vector<1x96xf32>
    %81 = vector.broadcast %80 : vector<1x96xf32> to vector<8x96xf32>
    %82 = arith.addf %79, %81 : vector<8x96xf32>
    %83 = vector.extract_strided_slice %82 {offsets = [0, 0], sizes = [8, 32], strides = [1, 1]} : vector<8x96xf32> to vector<8x32xf32>
    %84 = arith.negf %83 : vector<8x32xf32>
    %85 = math.exp %84 : vector<8x32xf32>
    %cst_89 = arith.constant 1.000000e+00 : f32
    %86 = vector.broadcast %cst_89 : f32 to vector<8x32xf32>
    %87 = arith.addf %86, %85 : vector<8x32xf32>
    %88 = arith.divf %86, %87 : vector<8x32xf32>
    %89 = vector.extract_strided_slice %82 {offsets = [0, 32], sizes = [8, 32], strides = [1, 1]} : vector<8x96xf32> to vector<8x32xf32>
    %90 = math.tanh %89 : vector<8x32xf32>
    %91 = vector.extract_strided_slice %82 {offsets = [0, 64], sizes = [8, 32], strides = [1, 1]} : vector<8x96xf32> to vector<8x32xf32>
    %92 = arith.negf %91 : vector<8x32xf32>
    %93 = math.exp %92 : vector<8x32xf32>
    %cst_90 = arith.constant 1.000000e+00 : f32
    %94 = vector.broadcast %cst_90 : f32 to vector<8x32xf32>
    %95 = arith.addf %94, %93 : vector<8x32xf32>
    %96 = arith.divf %94, %95 : vector<8x32xf32>
    %97 = arith.mulf %88, %90 : vector<8x32xf32>
    %98 = math.tanh %97 : vector<8x32xf32>
    %99 = arith.mulf %96, %98 : vector<8x32xf32>
    %c0_91 = arith.constant 0 : index
    %c0_92 = arith.constant 0 : index
    %100 = vector.load %arg15[%c0_91, %c0_92] : memref<32x256xf32, #tpu.memory_space<vmem>>, vector<32x256xf32>
    %cst_93 = arith.constant dense<0.000000e+00> : vector<8x256xf32>
    %101 = tpu.matmul %99, %100, %cst_93 {dimension_numbers = #tpu.dot_dimension_numbers<[1], [0], [0], [1], [0, 0, 1, 1], [], []>} : vector<8x32xf32>, vector<32x256xf32>, vector<8x256xf32> -> vector<8x256xf32>
    %c0_94 = arith.constant 0 : index
    %c0_95 = arith.constant 0 : index
    %102 = vector.load %arg16[%c0_94, %c0_95] : memref<1x256xf32, #tpu.memory_space<vmem>>, vector<1x256xf32>
    %103 = vector.broadcast %102 : vector<1x256xf32> to vector<8x256xf32>
    %104 = arith.addf %101, %103 : vector<8x256xf32>
    %cst_96 = arith.constant 0.000000e+00 : f32
    %105 = vector.broadcast %cst_96 : f32 to vector<8x256xf32>
    %106 = arith.maximumf %104, %105 : vector<8x256xf32>
    %c0_97 = arith.constant 0 : index
    %c0_98 = arith.constant 0 : index
    %107 = vector.load %arg17[%c0_97, %c0_98] : memref<256x128xf32, #tpu.memory_space<vmem>>, vector<256x128xf32>
    %cst_99 = arith.constant dense<0.000000e+00> : vector<8x128xf32>
    %108 = tpu.matmul %106, %107, %cst_99 {dimension_numbers = #tpu.dot_dimension_numbers<[1], [0], [0], [1], [0, 0, 1, 1], [], []>} : vector<8x256xf32>, vector<256x128xf32>, vector<8x128xf32> -> vector<8x128xf32>
    %c0_100 = arith.constant 0 : index
    %c0_101 = arith.constant 0 : index
    %109 = vector.load %arg18[%c0_100, %c0_101] : memref<1x128xf32, #tpu.memory_space<vmem>>, vector<1x128xf32>
    %110 = vector.broadcast %109 : vector<1x128xf32> to vector<8x128xf32>
    %111 = arith.addf %108, %110 : vector<8x128xf32>
    %c0_102 = arith.constant 0 : index
    %c0_103 = arith.constant 0 : index
    %112 = vector.load %arg19[%c0_102, %c0_103] : memref<8x128xf32, #tpu.memory_space<vmem>>, vector<8x128xf32>
    tpu.vector_store %arg19[%c0_102, %c0_103], %111 {strides = array<i32>} : memref<8x128xf32, #tpu.memory_space<vmem>>, vector<8x128xf32>,
    return
  }
  func.func @transform_0(%arg0: i32) -> (i32, i32, i32) {
    %c0_i32 = arith.constant 0 : i32
    %c0_i32_0 = arith.constant 0 : i32
    %c0_i32_1 = arith.constant 0 : i32
    return %arg0, %c0_i32, %c0_i32_0 : i32, i32, i32
  }
  func.func @transform_1(%arg0: i32) -> (i32, i32, i32, i32) {
    %c0_i32 = arith.constant 0 : i32
    %c0_i32_0 = arith.constant 0 : i32
    %c0_i32_1 = arith.constant 0 : i32
    %c0_i32_2 = arith.constant 0 : i32
    %c0_i32_3 = arith.constant 0 : i32
    return %c0_i32, %c0_i32_0, %c0_i32_1, %c0_i32_2 : i32, i32, i32, i32
  }
  func.func @transform_2(%arg0: i32) -> (i32, i32, i32, i32) {
    %c0_i32 = arith.constant 0 : i32
    %c0_i32_0 = arith.constant 0 : i32
    %c0_i32_1 = arith.constant 0 : i32
    %c0_i32_2 = arith.constant 0 : i32
    %c0_i32_3 = arith.constant 0 : i32
    return %c0_i32, %c0_i32_0, %c0_i32_1, %c0_i32_2 : i32, i32, i32, i32
  }
  func.func @transform_3(%arg0: i32) -> (i32, i32, i32, i32) {
    %c0_i32 = arith.constant 0 : i32
    %c0_i32_0 = arith.constant 0 : i32
    %c0_i32_1 = arith.constant 0 : i32
    %c0_i32_2 = arith.constant 0 : i32
    %c0_i32_3 = arith.constant 0 : i32
    return %c0_i32, %c0_i32_0, %c0_i32_1, %c0_i32_2 : i32, i32, i32, i32
  }
  func.func @transform_4(%arg0: i32) -> (i32, i32, i32, i32) {
    %c0_i32 = arith.constant 0 : i32
    %c0_i32_0 = arith.constant 0 : i32
    %c0_i32_1 = arith.constant 0 : i32
    %c0_i32_2 = arith.constant 0 : i32
    %c0_i32_3 = arith.constant 0 : i32
    return %c0_i32, %c0_i32_0, %c0_i32_1, %c0_i32_2 : i32, i32, i32, i32
  }
  func.func @transform_5(%arg0: i32) -> (i32, i32, i32, i32) {
    %c0_i32 = arith.constant 0 : i32
    %c0_i32_0 = arith.constant 0 : i32
    %c0_i32_1 = arith.constant 0 : i32
    %c0_i32_2 = arith.constant 0 : i32
    %c0_i32_3 = arith.constant 0 : i32
    return %c0_i32, %c0_i32_0, %c0_i32_1, %c0_i32_2 : i32, i32, i32, i32
  }
  func.func @transform_6(%arg0: i32) -> (i32, i32, i32) {
    %c0_i32 = arith.constant 0 : i32
    %c0_i32_0 = arith.constant 0 : i32
    %c0_i32_1 = arith.constant 0 : i32
    %c0_i32_2 = arith.constant 0 : i32
    return %c0_i32, %c0_i32_0, %c0_i32_1 : i32, i32, i32
  }
  func.func @transform_7(%arg0: i32) -> (i32, i32, i32) {
    %c0_i32 = arith.constant 0 : i32
    %c0_i32_0 = arith.constant 0 : i32
    %c0_i32_1 = arith.constant 0 : i32
    %c0_i32_2 = arith.constant 0 : i32
    return %c0_i32, %c0_i32_0, %c0_i32_1 : i32, i32, i32
  }
  func.func @transform_8(%arg0: i32) -> (i32, i32, i32) {
    %c0_i32 = arith.constant 0 : i32
    %c0_i32_0 = arith.constant 0 : i32
    %c0_i32_1 = arith.constant 0 : i32
    %c0_i32_2 = arith.constant 0 : i32
    return %c0_i32, %c0_i32_0, %c0_i32_1 : i32, i32, i32
  }
  func.func @transform_9(%arg0: i32) -> (i32, i32, i32) {
    %c0_i32 = arith.constant 0 : i32
    %c0_i32_0 = arith.constant 0 : i32
    %c0_i32_1 = arith.constant 0 : i32
    %c0_i32_2 = arith.constant 0 : i32
    return %c0_i32, %c0_i32_0, %c0_i32_1 : i32, i32, i32
  }
  func.func @transform_10(%arg0: i32) -> (i32, i32, i32) {
    %c0_i32 = arith.constant 0 : i32
    %c0_i32_0 = arith.constant 0 : i32
    %c0_i32_1 = arith.constant 0 : i32
    %c0_i32_2 = arith.constant 0 : i32
    return %c0_i32, %c0_i32_0, %c0_i32_1 : i32, i32, i32
  }
  func.func @transform_11(%arg0: i32) -> (i32, i32, i32) {
    %c0_i32 = arith.constant 0 : i32
    %c0_i32_0 = arith.constant 0 : i32
    %c0_i32_1 = arith.constant 0 : i32
    %c0_i32_2 = arith.constant 0 : i32
    return %c0_i32, %c0_i32_0, %c0_i32_1 : i32, i32, i32
  }
  func.func @transform_12(%arg0: i32) -> (i32, i32) {
    %c0_i32 = arith.constant 0 : i32
    %c0_i32_0 = arith.constant 0 : i32
    %c0_i32_1 = arith.constant 0 : i32
    return %c0_i32, %c0_i32_0 : i32, i32
  }
  func.func @transform_13(%arg0: i32) -> (i32, i32) {
    %c0_i32 = arith.constant 0 : i32
    %c0_i32_0 = arith.constant 0 : i32
    %c0_i32_1 = arith.constant 0 : i32
    return %c0_i32, %c0_i32_0 : i32, i32
  }
  func.func @transform_14(%arg0: i32) -> (i32, i32) {
    %c0_i32 = arith.constant 0 : i32
    %c0_i32_0 = arith.constant 0 : i32
    %c0_i32_1 = arith.constant 0 : i32
    return %c0_i32, %c0_i32_0 : i32, i32
  }
  func.func @transform_15(%arg0: i32) -> (i32, i32) {
    %c0_i32 = arith.constant 0 : i32
    %c0_i32_0 = arith.constant 0 : i32
    %c0_i32_1 = arith.constant 0 : i32
    return %c0_i32, %c0_i32_0 : i32, i32
  }
  func.func @transform_16(%arg0: i32) -> (i32, i32) {
    %c0_i32 = arith.constant 0 : i32
    %c0_i32_0 = arith.constant 0 : i32
    %c0_i32_1 = arith.constant 0 : i32
    return %c0_i32, %c0_i32_0 : i32, i32
  }
  func.func @transform_17(%arg0: i32) -> (i32, i32) {
    %c0_i32 = arith.constant 0 : i32
    %c0_i32_0 = arith.constant 0 : i32
    %c0_i32_1 = arith.constant 0 : i32
    return %c0_i32, %c0_i32_0 : i32, i32
  }
  func.func @transform_18(%arg0: i32) -> (i32, i32) {
    %c0_i32 = arith.constant 0 : i32
    %c0_i32_0 = arith.constant 0 : i32
    return %arg0, %c0_i32 : i32, i32
  }
}

</mosaic_0001>

<bundles_post_ra>
// kernel: tpu_custom_call.1
= control target key start
LH: loop header
LB: loop body
LE: loop exit
PB: predicated region body
PF: predicated region fallthrough
CT: control target
= control target key end

     0   :  { %s15635_s0 = inlined_call_operand.vmem [shape: f32[16,16,16], index: 0, kind: input, shape index: {}]   ;;  %s15636_s1 = inlined_call_operand.vmem [shape: f32[2,8,16,16], index: 1, kind: input, shape index: {}]   ;;  %s15637_s2 = inlined_call_operand.vmem [shape: f32[3,8,7,16], index: 2, kind: input, shape index: {}]   ;;  %s15638_s3 = inlined_call_operand.vmem [shape: f32[2,8,7,7], index: 3, kind: input, shape index: {}]   ;;  %s15639_s4 = inlined_call_operand.vmem [shape: f32[3,8,3,7], index: 4, kind: input, shape index: {}]   ;;  %s15640_s5 = inlined_call_operand.vmem [shape: f32[2,8,3,3], index: 5, kind: input, shape index: {}]   ;;  %s15641_s6 = inlined_call_operand.hbm [shape: f32[8,16,96], index: 6, kind: input, shape index: {}]   ;;  %s15642_s7 = inlined_call_operand.vmem [shape: f32[1,1,32], index: 7, kind: input, shape index: {}]   ;;  %s15643_s8 = inlined_call_operand.vmem [shape: f32[8,32,192], index: 8, kind: input, shape index: {}]   ;;  %s15644_s9 = inlined_call_operand.vmem [shape: f32[1,1,64], index: 9, kind: input, shape index: {}]   ;;  %s15645_s10 = inlined_call_operand.hbm [shape: f32[8,64,384], index: 10, kind: input, shape index: {}]   ;;  %s15646_s11 = inlined_call_operand.vmem [shape: f32[1,1,128], index: 11, kind: input, shape index: {}]   ;;  %s15647_s12 = inlined_call_operand.vmem [shape: f32[128,96], index: 12, kind: input, shape index: {}]   ;;  %s15648_s13 = inlined_call_operand.vmem [shape: f32[1,96], index: 13, kind: input, shape index: {}]   ;;  %s15649_s14 = inlined_call_operand.vmem [shape: f32[32,256], index: 14, kind: input, shape index: {}]   ;;  %s15650_s15 = inlined_call_operand.vmem [shape: f32[1,256], index: 15, kind: input, shape index: {}]   ;;  %s15651_s16 = inlined_call_operand.hbm [shape: f32[256,128], index: 16, kind: input, shape index: {}]   ;;  %s15652_s17 = inlined_call_operand.vmem [shape: f32[1,128], index: 17, kind: input, shape index: {}]   ;;  %s15653_s18 = inlined_call_operand.hbm [shape: f32[16,128], index: 18, kind: output, shape index: {}]  }
   0x1   :  { %15668 = sst [smem:[#allocation19_spill]] %s15635_s0 }
   0x2   :  { %15669 = sst [smem:[#allocation20_spill]] %s15636_s1 }
   0x3   :  { %15670 = sst [smem:[#allocation21_spill]] %s15637_s2 }
   0x4   :  { %15671 = sst [smem:[#allocation22_spill]] %s15645_s10 }
   0x5   :  { %15672 = sst [smem:[#allocation23_spill]] %s15650_s15 }
   0x6   :  { %15673 = sst [smem:[#allocation24_spill]] %s15652_s17 }
   0x7   :  { %15674 = sst [smem:[#allocation25_spill]] %s15653_s18 }
   0x8   :  { %23 = vsyncpa [#allocation3], 0 }
   0x9   :  { %24 = vsyncpa [#allocation6], 0 }
   0xa   :  { %25 = vsyncpa [#allocation4], 0 }
   0xb   :  { %27 = vsyncpa [#allocation4 + $0x1], 0  ;;  %s13920_s27 = smov 0   ;;  %s13922_s28 = smov 0  }
   0xc   :  { %s13924_s29 = smov 0   ;;  %s13926_s30 = smov 0  }
   0xd LB: > { %15675 = sst [smem:[#allocation12_spill]] %s13798_s27  ;;  %s13941_s0 = sadd.s32 4294967295, %s13810_s30   ;;  %s13810_s30 = sphi %s13926_s30, %s15706_s30   ;;  %s13806_s29 = sphi %s13924_s29, %s15708_s29   ;;  %s13802_s28 = sphi %s13922_s28, %s15710_s28   ;;  %s13798_s27 = sphi %s13920_s27, %s15709_s27  }
   0xe   : > { %15676 = sst [smem:[#allocation13_spill]] %s13806_s29  ;;  %s11472_s19 = sadd.s32 4294967294, %s13810_s30  }
   0xf   : > { %15677 = sst [smem:[#allocation14_spill]] %s13810_s30  ;;  %s13945_s1 = sadd.s32 1, %s13810_s30  }
  0x10   : > { %15678 = sst [smem:[#allocation15_spill]] %s13945_s1  ;;  %s423_s20 = sadd.s32 1, %s13806_s29 }
  0x11   : > { %s420_s21 = ssub.s32 %s13810_s30, %s13945_s1  ;;  %p433_p0 = scmp.ne.s32.totalorder %s13806_s29, %s13802_s28 }
  0x12   : > { %p421_p1 = scmp.eq.s32.totalorder %s420_s21, 0  ;;  %p434_p2 = scmp.eq.s32.totalorder %s13941_s0, 1 }
  0x13   : > { %p439_p3 = scmp.ne.s32.totalorder %s13802_s28, %s13798_s27  ;;  %p440_p4 = scmp.eq.s32.totalorder %s11472_s19, 1 }
  0x14   : > { %s13956_s22 = scalar_select %p421_p1, %s13806_s29, %s423_s20  }
  0x15   : > { %p13958_p5 = por %p434_p2, %p433_p0  ;;  %p13962_p6 = por %p440_p4, %p439_p3 }
  0x16   : > { %15679 = sst [smem:[#allocation16_spill]] %s13956_s22  ;;  %p11473_p7 = scmp.ge.s32.totalorder %s13810_s30, 1 }
  0x17   : > { %s15680_s2 = scalar_select %p13958_p5, 1, 0 }
  0x18   : > { %s15682_s23 = scalar_select %p13962_p6, 1, 0 }
  0x19   : > { %15681 = sst [smem:[#allocation17_spill]] %s15680_s2  ;;  %p447_p8 = scmp.lt.s32.totalorder %s13810_s30, 3 }
  0x1a   : > { %15683 = sst [smem:[#allocation18_spill]] %s15682_s23  ;;  %p15662_p9 = scmp.eq.s32.totalorder %s13941_s0, 0 }
  0x1b   : > { %p13969_p10 = pnand %p11473_p7, %p447_p8  ;;  %s13812_s25 = smov [#allocation5]  }
  0x1c   : > { %s496_s26 = sshll.u32 %s13812_s25, 4  ;;  %s13813_s20 = smov [#allocation2]   ;;  %s497_s26 = int_to_ptr.vmem [resolvable:$true] %s496_s26 }
  0x1d   : > { %s15684_s24 = scalar_select %p13969_p10, 1, 0 }
  0x1e   : > { %p13543_p11 = pneg %p13969_p10  ;;  %s474_s21 = sshll.u32 %s13813_s20, 4  ;;  %s13981_s21 = int_to_ptr.vmem [resolvable:$true] %s474_s21 }
  0x1f   : > { %s15686_s10 = sld [smem:[#allocation22_spill]] }
  0x20   : > { %p13977_p12 = pnand %p15662_p9, %p13543_p11 }
  0x22   : > { %p13991_p0 = pneg %p13977_p12 }
  0x25   : > { %s13656_s1 = scalar_lea.hbm %s15686_s10, 24576 }
  0x26   : > { %p13657_p13 = scmp.ne.s32.totalorder %s15686_s10, %s13656_s1  ;;  %p13663_p3 = scmp.lt.u32.totalorder %s13656_s1, %s15686_s10 }
  0x28   : > { %p13659_p1 = pnand %p13991_p0, %p13657_p13 }
  0x2a   : > { %p13660_p2 = pneg %p13659_p1 }
  0x2c   : > { %p13665_p4 = pnand %p13663_p3, %p13660_p2 }
  0x2e   : > { %13668 = shalt.err (!%p13665_p4)
}
  0x2f   : > { %s13669_s29 = scalar_lea.vmem %s497_s26, 24576  ;;  %p13677_p9 = scmp.lt.s32.totalorder %s497_s26, %s497_s26 }
  0x30   : > { %p13670_p7 = scmp.ne.s32.totalorder %s497_s26, %s13669_s29  ;;  %p13678_p6 = scmp.lt.s32.totalorder %s13669_s29, %s13669_s29 }
  0x32   : > { %p13672_p8 = pnand %p13670_p7, %p13991_p0  ;;  %p13679_p5 = por %p13678_p6, %p13677_p9 }
  0x34   : > { %p13673_p11 = pneg %p13672_p8 }
  0x36   : > { %p13680_p10 = pnand %p13679_p5, %p13673_p11 }
  0x38   : > { %13683 = shalt.err (!%p13680_p10)
}
  0x39   : > { %s13814_s27 = smov 384   ;;  %s13815_s22 = smov 24  }
  0x3a   : > { %13549 = dma.hbm_to_vmem [thread:$0]  (!%p13977_p12), %s15686_s10, 24576, %s497_s26, [#allocation6], %s13814_s27, %s13814_s27, %s13815_s22  }
  0x3b   : > { %s13684_s18 = scalar_lea.hbm %s15641_s6, 2048 }
  0x3c   : > { %p13685_p13 = scmp.ne.s32.totalorder %s15641_s6, %s13684_s18  ;;  %p13691_p9 = scmp.lt.u32.totalorder %s13684_s18, %s15641_s6 }
  0x3e   : > { %p13687_p5 = pnand %p13685_p13, %p13991_p0 }
  0x40   : > { %p13688_p6 = pneg %p13687_p5 }
  0x42   : > { %p13693_p10 = pnand %p13691_p9, %p13688_p6 }
  0x44   : > { %13696 = shalt.err (!%p13693_p10)
}
  0x45   : > { %s13697_s26 = scalar_lea.vmem %s13981_s21, 2048  ;;  %p13705_p4 = scmp.lt.s32.totalorder %s13981_s21, %s13981_s21 }
  0x46   : > { %p13698_p1 = scmp.ne.s32.totalorder %s13981_s21, %s13697_s26  ;;  %p13706_p7 = scmp.lt.s32.totalorder %s13697_s26, %s13697_s26 }
  0x48   : > { %p13700_p2 = pnand %p13698_p1, %p13991_p0  ;;  %p13707_p8 = por %p13706_p7, %p13705_p4 }
  0x4a   : > { %p13701_p3 = pneg %p13700_p2 }
  0x4c   : > { %p13708_p11 = pnand %p13707_p8, %p13701_p3 }
  0x4e   : > { %13711 = shalt.err (!%p13708_p11)
}
  0x4f   : > { %s13816_s17 = smov 128   ;;  %s13817_s15 = smov 8  }
  0x50   : > { %13546 = dma.hbm_to_vmem [thread:$0]  (!%p13977_p12), %s15641_s6, 2048, %s13981_s21, [#allocation3], %s13816_s17, %s13816_s17, %s13817_s15  }
  0x51   : > { %s13818_s27 = smov [#allocation7]   ;;  %s13712_s23 = scalar_lea.hbm %s15651_s16, 4096 }
  0x52   : > { %s524_s22 = sshll.u32 %s13818_s27, 4  ;;  %p13713_p13 = scmp.ne.s32.totalorder %s15651_s16, %s13712_s23  ;;  %s525_s22 = int_to_ptr.vmem [resolvable:$true] %s524_s22 }
  0x53   : > { %p13719_p9 = scmp.lt.u32.totalorder %s13712_s23, %s15651_s16 }
  0x54   : > { %p13715_p5 = pnand %p13713_p13, %p13991_p0 }
  0x56   : > { %p13716_p6 = pneg %p13715_p5 }
  0x58   : > { %p13721_p10 = pnand %p13719_p9, %p13716_p6 }
  0x5a   : > { %13724 = shalt.err (!%p13721_p10)
}
  0x5b   : > { %s13725_s21 = scalar_lea.vmem %s525_s22, 4096  ;;  %p13733_p4 = scmp.lt.s32.totalorder %s525_s22, %s525_s22 }
  0x5c   : > { %p13726_p1 = scmp.ne.s32.totalorder %s525_s22, %s13725_s21  ;;  %p13734_p7 = scmp.lt.s32.totalorder %s13725_s21, %s13725_s21 }
  0x5e   : > { %p13728_p2 = pnand %p13726_p1, %p13991_p0  ;;  %p13735_p8 = por %p13734_p7, %p13733_p4 }
  0x60   : > { %p13729_p3 = pneg %p13728_p2 }
  0x62   : > { %p13736_p11 = pnand %p13735_p8, %p13729_p3 }
  0x64   : > { %13739 = shalt.err (!%p13736_p11)
}
  0x65   : > { %13552 = dma.hbm_to_vmem [thread:$0]  (!%p13977_p12), %s15651_s16, 4096, %s525_s22, [#allocation6], %s13816_s17, %s13816_s17, %s13817_s15  }
  0x66   : > { %p15688_p13 = scmp.ne.s32.totalorder %s15684_s24, 0 }
  0x67   : > { %p15689_p5 = scmp.eq.s32.totalorder (!%p15688_p13), %s13941_s0, 0 }
  0x68   : > { %553 = sbr.rel (%p15688_p13) target bundleno = 3252 (0xcb4), region = 92 }
  0x6f   : > { %13785 = dma.done.wait (%p15689_p5), [#allocation3], 2048   ;;  %p15690_p0 = pmov %p15689_p5 }
  0x71   : > { %13787 = vsyncadd (%p15690_p0), [#allocation3], 4294965248  ;;  %p15691_p6 = pmov %p15690_p0 }
  0x72   : > { %p15692_p9 = pmov %p15690_p0 }
  0x73   : > { %13789 = dma.done.wait (%p15691_p6), [#allocation6], 28672  }
  0x74   : > { %13791 = vsyncadd (%p15692_p9), [#allocation6], 4294938624  ;;  %s11483_s10 = sshll.u32 %s13941_s0, 3  ;;  %vm655_vm0 = vcmask 130048   ;;  %s15693_s17 = sld [smem:[#allocation19_spill]]  ;;  %v639_v0 = vld [vmem:[#allocation2] sm:$0xff] }
  0x75   : > { %p617_p10 = scmp.lt.s32.totalorder %s11483_s10, 15  ;;  %v640_v1 = vld [vmem:[#allocation2 + $0x8] sm:$0xff]  ;;  %v641_v4 = vld [vmem:[#allocation2 + $0x10] sm:$0xff]  ;;  %v642_v5 = vld [vmem:[#allocation2 + $0x18] sm:$0xff]  ;;  %s15694_s30 = sld [smem:[#allocation20_spill]]  ;;  %vm13822_vm1 = vmmov 0  }
  0x76   : > { %v12977_v3 = vpack.c.bf16 %v640_v1, %v639_v0  ;;  %v12981_v6 = vpack.c.bf16 %v642_v5, %v641_v4  ;;  %v643_v7 = vld [vmem:[#allocation2 + $0x20] sm:$0xff]  ;;  %v644_v8 = vld [vmem:[#allocation2 + $0x28] sm:$0xff]  ;;  %v645_v10 = vld [vmem:[#allocation2 + $0x30] sm:$0xff]  ;;  %s13819_s29 = smov 64   ;;  %s15696_s25 = sld [smem:[#allocation21_spill]]  ;;  %vm4658_vm2 = vcmask 261120  }
  0x77   : > { %s15712_s10 = smov (!%p617_p10, %s11483_s10), 15  ;;  %v646_v11 = vld [vmem:[#allocation2 + $0x38] sm:$0xff]  ;;  %v12985_v13 = vpack.c.bf16 %v644_v8, %v643_v7  ;;  %v647_v16 = vld [vmem:[#allocation2 + $0x40] sm:$0xff]  ;;  %v648_v17 = vld [vmem:[#allocation2 + $0x48] sm:$0xff]  ;;  %vm5267_vm3 = vcmask 1046528   ;;  %vm5263_vm4 = vcmask 56320  }
  0x78   : > { %s11769_s19 = sshll.u32 %s15712_s10, 4  ;;  %12978 = vmatprep.subr.bf16.mxu0 %v12977_v3  ;;  %v12989_v14 = vpack.c.bf16 %v646_v11, %v645_v10  ;;  %v649_v18 = vld [vmem:[#allocation2 + $0x50] sm:$0xff]  ;;  %v650_v19 = vld [vmem:[#allocation2 + $0x58] sm:$0xff]  ;;  %v12993_v23 = vpack.c.bf16 %v648_v17, %v647_v16  ;;  %v651_v27 = vld [vmem:[#allocation2 + $0x60] sm:$0xff]  ;;  %vm8551_vm5 = vcmask 523264   ;;  %vm9716_vm6 = vcmask 1042432  }
  0x79   : > { %12980 = vmatpush3.bf16.msra.mxu0 %v12977_v3  ;;  %v12997_v21 = vpack.c.bf16 %v650_v19, %v649_v18  ;;  %v653_v24 = vld [vmem:[#allocation2 + $0x70] sm:$0xff]  ;;  %v654_v25 = vld [vmem:[#allocation2 + $0x78] sm:$0xff]  ;;  %v652_v28 = vld [vmem:[#allocation2 + $0x68] sm:$0xff]  ;;  %vm9712_vm7 = vcmask 23552   ;;  %vm11057_vm8 = vcmask 1041409   ;;  %vm11059_vm9 = vcmask 1042434  }
  0x7a   : > { %s14062_s15 = scalar_lea.vmem %s15693_s17, %s11769_s19  ;;  %12982 = vmatprep.subr.bf16.mxu0 %v12981_v6  ;;  %12990 = vmatprep.subr.bf16.mxu1 %v12989_v14  ;;  %v13005_v30 = vpack.c.bf16 %v654_v25, %v653_v24  ;;  %v13001_v33 = vpack.c.bf16 %v652_v28, %v651_v27  ;;  %vm11061_vm10 = vcmask 1043459   ;;  %vm11063_vm11 = vcmask 1044484   ;;  %s15697_s22 = sld [smem:[#allocation23_spill]] }
  0x7b   : > { %v623_v2 = vld [vmem:[%s14062_s15] sm:$0xff]  ;;  %v624_v9 = vld [vmem:[%s14062_s15 + $0x8] sm:$0xff]  ;;  %v625_v12 = vld [vmem:[%s14062_s15 + $0x10] sm:$0xff]  ;;  %12992 = vmatpush3.bf16.msra.mxu1 %v12989_v14  ;;  %s15695_s1 = smov %s15694_s30  ;;  %vm11065_vm12 = vcmask 1045509   ;;  %vm11067_vm13 = vcmask 1046534   ;;  %vm11069_vm14 = vcmask 1047559  }
  0x7c   : > { %12178 = vmatprep.mubr.msk.f32.mxu0 %vm655_vm0, %v623_v2  ;;  %v629_v15 = vld [vmem:[%s14062_s15 + $0x30] sm:$0xff]  ;;  %v626_v20 = vld [vmem:[%s14062_s15 + $0x18] sm:$0xff]  ;;  %v627_v22 = vld [vmem:[%s14062_s15 + $0x20] sm:$0xff]  ;;  %12998 = vmatprep.subr.bf16.mxu1 %v12997_v21  ;;  %s15698_s23 = sld [smem:[#allocation17_spill]]  ;;  %s15699_s21 = sld [smem:[#allocation24_spill]] }
  0x7d   : > { %12199 = vmatprep.mubr.msk.f32.mxu1 %vm655_vm0, %v629_v15  ;;  %12179 = vmatmul.mubr.msk.f32.vlgmr.msra.gmra.mrb[0].mxu0 %vm655_vm0, %v624_v9  ;;  %v630_v26 = vld [vmem:[%s14062_s15 + $0x38] sm:$0xff]  ;;  %v633_v29 = vld [vmem:[%s14062_s15 + $0x50] sm:$0xff]  ;;  %v628_v31 = vld [vmem:[%s14062_s15 + $0x28] sm:$0xff]  ;;  %s11766_s18 = sshll.u32 %s13941_s0, 7  ;;  %s15700_s17 = sld [smem:[#allocation25_spill]] }
  0x7e   : > { %12984 = vmatpush3.bf16.msra.mxu0 %v12981_v6  ;;  %12185 = vmatprep.mubr.msk.f32.mxu0 %vm655_vm0, %v625_v12  ;;  %v631_v32 = vld [vmem:[%s14062_s15 + $0x40] sm:$0xff]  ;;  %v634_v34 = vld [vmem:[%s14062_s15 + $0x58] sm:$0xff]  ;;  %v637_v35 = vld [vmem:[%s14062_s15 + $0x70] sm:$0xff]  ;;  %s13824_s0 = smov [#allocation8]  }
  0x7f   : > { %12986 = vmatprep.subr.bf16.mxu0 %v12985_v13  ;;  %12200 = vmatmul.mubr.msk.f32.vlgmr.msra.gmra.mrb[0].mxu1 %vm655_vm0, %v630_v26  ;;  %v632_v36 = vld [vmem:[%s14062_s15 + $0x48] sm:$0xff]  ;;  %v635_v37 = vld [vmem:[%s14062_s15 + $0x60] sm:$0xff]  ;;  %v638_v38 = vld [vmem:[%s14062_s15 + $0x78] sm:$0xff] }
  0x80   : > { %13000 = vmatpush3.bf16.msra.mxu1 %v12997_v21  ;;  %12213 = vmatprep.mubr.msk.f32.mxu1 %vm655_vm0, %v633_v29  ;;  %v636_v39 = vld [vmem:[%s14062_s15 + $0x68] sm:$0xff]  ;;  %v1304_v40 = vld [vmem:[%s15694_s30] sm:$0xff]  ;;  %v1306_v41 = vld [vmem:[%s15695_s1 + $0x10] sm:$0xff]  ;;  %s13820_s15 = smov 96   ;;  %s613_s30 = sand.u32 1, %s13802_s28  }
  0x81   : > { %12186 = vmatmul.mubr.msk.f32.vlgmr.msra.gmra.mrb[2].mxu0 %vm655_vm0, %v626_v20  ;;  %13006 = vmatprep.subr.bf16.mxu1 %v13005_v30  ;;  %v1305_v48 = vld [vmem:[%s15695_s1 + $0x8] sm:$0xff]  ;;  %v1308_v52 = vld [vmem:[%s15695_s1 + $0x20] sm:$0xff]  ;;  %v1307_v61 = vld [vmem:[%s15695_s1 + $0x18] sm:$0xff]  ;;  %s11369_s27 = scalar_lea.sflag [#allocation4], %s613_s30 }
  0x82   : > { %12988 = vmatpush3.bf16.msra.mxu0 %v12985_v13  ;;  %12192 = vmatprep.mubr.msk.f32.mxu0 %vm655_vm0, %v627_v22  ;;  %v1310_v63 = vld [vmem:[%s15695_s1 + $0x30] sm:$0xff]  ;;  %v1309_v6 = vld [vmem:[%s15695_s1 + $0x28] sm:$0xff]  ;;  %v1312_v8 = vld [vmem:[%s15695_s1 + $0x40] sm:$0xff]  ;;  %p15701_p1 = scmp.ne.s32.totalorder %s15698_s23, 0 }
  0x83   : > { %12994 = vmatprep.subr.bf16.mxu0 %v12993_v23  ;;  %12214 = vmatmul.mubr.msk.f32.vlgmr.msra.gmra.mrb[2].mxu1 %vm655_vm0, %v634_v34  ;;  %v1311_v13 = vld [vmem:[%s15695_s1 + $0x38] sm:$0xff]  ;;  %v1313_v17 = vld [vmem:[%s15695_s1 + $0x48] sm:$0xff]  ;;  %v1314_v18 = vld [vmem:[%s15695_s1 + $0x50] sm:$0xff] }
  0x84   : > { %13008 = vmatpush3.bf16.msra.mxu1 %v13005_v30  ;;  %12227 = vmatprep.mubr.msk.f32.mxu1 %vm655_vm0, %v637_v35  ;;  %v1315_v19 = vld [vmem:[%s15695_s1 + $0x58] sm:$0xff]  ;;  %v1316_v20 = vld [vmem:[%s15695_s1 + $0x60] sm:$0xff]  ;;  %v1317_v21 = vld [vmem:[%s15695_s1 + $0x68] sm:$0xff] }
  0x85   : > { %12193 = vmatmul.mubr.msk.f32.vlgmr.msra.gmra.mrb[4].mxu0 %vm655_vm0, %v628_v31  ;;  %v11518_v22 = vld [vmem:[%s15695_s1 + $0x80] sm:$0xff]  ;;  %v1319_v24 = vld [vmem:[%s15695_s1 + $0x78] sm:$0xff]  ;;  %v11520_v25 = vld [vmem:[%s15695_s1 + $0x90] sm:$0xff] }
  0x86   : > { %12996 = vmatpush3.bf16.msra.mxu0 %v12993_v23  ;;  %12206 = vmatprep.mubr.msk.f32.mxu0 %vm655_vm0, %v631_v32  ;;  %v1318_v23 = vld [vmem:[%s15695_s1 + $0x70] sm:$0xff]  ;;  %v11519_v30 = vld [vmem:[%s15695_s1 + $0x88] sm:$0xff]  ;;  %v11522_v31 = vld [vmem:[%s15695_s1 + $0xa0] sm:$0xff] }
  0x87   : > { %13002 = vmatprep.subr.bf16.mxu0 %v13001_v33  ;;  %12228 = vmatmul.mubr.msk.f32.vlgmr.msra.gmra.mrb[4].mxu1 %vm655_vm0, %v638_v38 }
  0x88   : > { %12241 = vmatprep.mubr.msk.f32.mxu1 %vm655_vm0, %v1306_v41 }
  0x89   : > { %12207 = vmatmul.mubr.msk.f32.vlgmr.msra.gmra.mrb[6].mxu0 %vm655_vm0, %v632_v36 }
  0x8a   : > { %13004 = vmatpush3.bf16.msra.mxu0 %v13001_v33  ;;  %12220 = vmatprep.mubr.msk.f32.mxu0 %vm655_vm0, %v635_v37 }
  0x8d   : > { %12221 = vmatmul.mubr.msk.f32.vlgmr.msra.gmra.mrb[8].mxu0 %vm655_vm0, %v636_v39 }
  0x8e   : > { %12234 = vmatprep.mubr.msk.f32.mxu0 %vm655_vm0, %v1304_v40 }
 0x150   : > { %v14104_v42 = vpop.f32.mrb[0].mxu0 }
 0x151   : > { %v14106_v43 = vpop.f32.mrb[1].mxu0 }
 0x152   : > { %v13009_v44 = vpack.c.bf16 %v14104_v42, %v14106_v43  ;;  %v13608_v45 = vpack.i.bf16 %v14104_v42, %v14106_v43  ;;  %v14124_v51 = vpop.f32.mrb[0].mxu1 }
 0x153   : > { %v14129_v53 = vpop.f32.mrb[1].mxu1 }
 0x154   : > { %13609 = vrot.lane.b32.xlu0 %v13608_v45, %s13819_s29  ;;  %v14113_v46 = vpop.f32.mrb[2].mxu0  ;;  %13010 = vmatprep.subr.bf16.mxu0 %v13009_v44  ;;  %v13633_v55 = vpack.i.bf16 %v14124_v51, %v14129_v53  ;;  %v13021_v56 = vpack.c.bf16 %v14124_v51, %v14129_v53 }
 0x155   : > { %v14115_v47 = vpop.f32.mrb[3].mxu0  ;;  %13012 = vmatpush3.bf16.msra.mxu0 %v13009_v44 }
 0x156   : > { %v13628_v49 = vpack.i.bf16 %v14113_v46, %v14115_v47  ;;  %v13013_v50 = vpack.c.bf16 %v14113_v46, %v14115_v47  ;;  %v14145_v60 = vpop.f32.mrb[2].mxu1 }
 0x157   : > { %v14150_v62 = vpop.f32.mrb[3].mxu1 }
 0x158   : > { %v14131_v54 = vpop.f32.mrb[4].mxu0  ;;  %13014 = vmatprep.subr.bf16.mxu1 %v13013_v50  ;;  %12235 = vmatmul.mubr.msk.f32.vlgmr.msra.gmra.mrb[10].mxu0 %vm655_vm0, %v1305_v48  ;;  %v13638_v1 = vpack.i.bf16 %v14145_v60, %v14150_v62  ;;  %v13029_v2 = vpack.c.bf16 %v14145_v60, %v14150_v62 }
 0x159   : > { %v14138_v57 = vpop.f32.mrb[5].mxu0  ;;  %13016 = vmatpush3.bf16.msra.mxu1 %v13013_v50  ;;  %12248 = vmatprep.mubr.msk.f32.mxu0 %vm655_vm0, %v1308_v52  ;;  %v11521_v50 = vld [vmem:[%s15695_s1 + $0x98] sm:$0xff] }
 0x15a   : > { %v13613_v58 = vpack.i.bf16 %v14131_v54, %v14138_v57  ;;  %v13017_v59 = vpack.c.bf16 %v14131_v54, %v14138_v57  ;;  %13022 = vmatprep.subr.bf16.mxu1 %v13021_v56  ;;  %v12229_v7 = vpop.f32.mrb[4].mxu1 }
 0x15b   : > { %v1295_v9 = vpop.f32.mrb[5].mxu1 }
 0x15c   : > { %13614 = vrot.lane.b32.xlu0 %v13613_v58, %s13819_s29  ;;  %v14156_v0 = vpop.f32.mrb[6].mxu0  ;;  %13018 = vmatprep.subr.bf16.mxu0 %v13017_v59  ;;  %v13643_v11 = vpack.i.bf16 %v12229_v7, %v1295_v9  ;;  %v13037_v12 = vpack.c.bf16 %v12229_v7, %v1295_v9 }
 0x15d   : > { %v1052_v3 = vpop.f32.mrb[7].mxu0  ;;  %13020 = vmatpush3.bf16.msra.mxu0 %v13017_v59  ;;  %12242 = vmatmul.mubr.msk.f32.vlgmr.msra.gmra.mrb[6].mxu1 %vm655_vm0, %v1307_v61 }
 0x15e   : > { %v13025_v4 = vpack.c.bf16 %v14156_v0, %v1052_v3  ;;  %v13618_v5 = vpack.i.bf16 %v14156_v0, %v1052_v3  ;;  %13024 = vmatpush3.bf16.msra.mxu1 %v13021_v56  ;;  %12255 = vmatprep.mubr.msk.f32.mxu1 %vm655_vm0, %v1310_v63 }
 0x15f   : > { %13030 = vmatprep.subr.bf16.mxu1 %v13029_v2 }
 0x160   : > { %13629 = vrot.lane.b32.xlu0 %v13628_v49, %s13819_s29  ;;  %13619 = vrot.lane.b32.xlu1 %v13618_v5, %s13819_s29  ;;  %v12222_v10 = vpop.f32.mrb[8].mxu0  ;;  %v11529_v5 = vld [vmem:[%s15695_s1 + $0xd8] sm:$0xff] }
 0x161   : > { %13026 = vmatprep.subr.bf16.mxu0 %v13025_v4  ;;  %v1214_v14 = vpop.f32.mrb[9].mxu0  ;;  %12249 = vmatmul.mubr.msk.f32.vlgmr.msra.gmra.mrb[12].mxu0 %vm655_vm0, %v1309_v6  ;;  %v11532_v6 = vld [vmem:[%s15695_s1 + $0xf0] sm:$0xff] }
 0x162   : > { %v13623_v15 = vpack.i.bf16 %v12222_v10, %v1214_v14  ;;  %v13033_v16 = vpack.c.bf16 %v12222_v10, %v1214_v14  ;;  %13028 = vmatpush3.bf16.msra.mxu0 %v13025_v4  ;;  %12262 = vmatprep.mubr.msk.f32.mxu0 %vm655_vm0, %v1312_v8  ;;  %v11528_v4 = vld [vmem:[%s15695_s1 + $0xd0] sm:$0xff]  ;;  %v13821_v8 = vmov 0.0|0.0  }
 0x163   : > { %12256 = vmatmul.mubr.msk.f32.vlgmr.msra.gmra.mrb[8].mxu1 %vm655_vm0, %v1311_v13 }
 0x164   : > { %13639 = vrot.lane.b32.xlu0 %v13638_v1, %s13819_s29  ;;  %13624 = vrot.lane.b32.xlu1 %v13623_v15, %s13819_s29 }
 0x165   : > { %13034 = vmatprep.subr.bf16.mxu0 %v13033_v16  ;;  %12263 = vmatmul.mubr.msk.f32.vlgmr.msra.gmra.mrb[14].mxu0 %vm655_vm0, %v1313_v17  ;;  %v14312_v17 = vld [vmem:[%s15642_s7] ss:$0 sm:$0xff] }
 0x166   : > { %13036 = vmatpush3.bf16.msra.mxu0 %v13033_v16  ;;  %13032 = vmatpush3.bf16.msra.mxu1 %v13029_v2  ;;  %v11525_v2 = vld [vmem:[%s15695_s1 + $0xb8] sm:$0xff] }
 0x167   : > { %12269 = vmatprep.mubr.msk.f32.mxu1 %vm655_vm0, %v1314_v18  ;;  %13038 = vmatprep.subr.bf16.mxu1 %v13037_v12 }
 0x168   : > { %1322 = vrot.lane.b32.xlu0 %v14106_v43, %s13820_s15  ;;  %13634 = vrot.lane.b32.xlu1 %v13633_v55, %s13819_s29  ;;  %v11524_v55 = vld [vmem:[%s15695_s1 + $0xb0] sm:$0xff] }
 0x169   : > { %12270 = vmatmul.mubr.msk.f32.vlgmr.msra.gmra.mrb[10].mxu1 %vm655_vm0, %v1315_v19  ;;  %12276 = vmatprep.mubr.msk.f32.mxu0 %vm655_vm0, %v1316_v20 }
 0x16a   : > { %13040 = vmatpush3.bf16.msra.mxu1 %v13037_v12  ;;  %12277 = vmatmul.mubr.msk.f32.vlgmr.msra.gmra.mrb[16].mxu0 %vm655_vm0, %v1317_v21 }
 0x16b   : > { %12290 = vmatprep.mubr.msk.f32.mxu0 %vm655_vm0, %v11518_v22  ;;  %12283 = vmatprep.mubr.msk.f32.mxu1 %vm655_vm0, %v1318_v23 }
 0x16c   : > { %1500 = vrot.lane.b32.xlu0 %v14138_v57, %s13820_s15  ;;  %13644 = vrot.lane.b32.xlu1 %v13643_v11, %s13819_s29  ;;  %v11530_v57 = vld [vmem:[%s15695_s1 + $0xe0] sm:$0xff] }
 0x16d   : > { %12284 = vmatmul.mubr.msk.f32.vlgmr.msra.gmra.mrb[12].mxu1 %vm655_vm0, %v1319_v24 }
 0x16e   : > { %12297 = vmatprep.mubr.msk.f32.mxu1 %vm655_vm0, %v11520_v25 }
 0x170   : > { %1678 = vrot.lane.b32.xlu0 %v1052_v3, %s13820_s15  ;;  %1324 = vrot.lane.b32.xlu1 %v14104_v42, %s13820_s15  ;;  %v11523_v42 = vld [vmem:[%s15695_s1 + $0xa8] sm:$0xff] }
 0x174   : > { %1856 = vrot.lane.b32.xlu0 %v1214_v14, %s13820_s15  ;;  %1502 = vrot.lane.b32.xlu1 %v14131_v54, %s13820_s15  ;;  %v11527_v54 = vld [vmem:[%s15695_s1 + $0xc8] sm:$0xff] }
 0x178   : > { %1411 = vrot.lane.b32.xlu0 %v14115_v47, %s13820_s15  ;;  %1680 = vrot.lane.b32.xlu1 %v14156_v0, %s13820_s15 }
 0x17c   : > { %1589 = vrot.lane.b32.xlu0 %v14129_v53, %s13820_s15  ;;  %1858 = vrot.lane.b32.xlu1 %v12222_v10, %s13820_s15 }
 0x180   : > { %1767 = vrot.lane.b32.xlu0 %v14150_v62, %s13820_s15  ;;  %1413 = vrot.lane.b32.xlu1 %v14113_v46, %s13820_s15  ;;  %v11526_v46 = vld [vmem:[%s15695_s1 + $0xc0] sm:$0xff]  ;;  %v11531_v62 = vld [vmem:[%s15695_s1 + $0xe8] sm:$0xff] }
 0x184   : > { %1945 = vrot.lane.b32.xlu0 %v1295_v9, %s13820_s15  ;;  %1591 = vrot.lane.b32.xlu1 %v14124_v51, %s13820_s15  ;;  %v13823_v9 = vmov 0.0  }
 0x188   : > { %1769 = vrot.lane.b32.xlu1 %v14145_v60, %s13820_s15 }
 0x18c   : > { %1947 = vrot.lane.b32.xlu1 %v12229_v7, %s13820_s15  ;;  %v11533_v7 = vld [vmem:[%s15695_s1 + $0xf8] sm:$0xff] }
 0x1c6   : > { %v13610_v26 = vpop.permute.xlu0 %13609 }
 0x1c7   : > { %v13612_v27 = vunpack.i.h.bf16 %v13610_v26  ;;  %v13611_v28 = vunpack.i.l.bf16 %v13610_v26 }
 0x1c9   : > { %v13041_v29 = vpack.c.bf16 %v13612_v27, %v13611_v28 }
 0x1cb   : > { %13042 = vmatprep.subr.bf16.mxu0 %v13041_v29 }
 0x1cc   : > { %13044 = vmatpush3.bf16.msra.mxu0 %v13041_v29 }
 0x1ce   : > { %v13615_v32 = vpop.permute.xlu0 %13614 }
 0x1cf   : > { %v13617_v33 = vunpack.i.h.bf16 %v13615_v32  ;;  %v13616_v34 = vunpack.i.l.bf16 %v13615_v32  ;;  %12291 = vmatmul.mubr.msk.f32.vlgmr.msra.gmra.mrb[10].mxu0 %vm655_vm0, %v11519_v30 }
 0x1d0   : > { %12304 = vmatprep.mubr.msk.f32.mxu0 %vm655_vm0, %v11522_v31 }
 0x1d1   : > { %v13049_v35 = vpack.c.bf16 %v13617_v33, %v13616_v34  ;;  %v2800_v33 = vld [vmem:[%s15696_s25] sm:$0x7f] }
 0x1d2   : > { %v13630_v36 = vpop.permute.xlu0 %13629  ;;  %v13620_v37 = vpop.permute.xlu1 %13619 }
 0x1d3   : > { %v13632_v38 = vunpack.i.h.bf16 %v13630_v36  ;;  %v13631_v39 = vunpack.i.l.bf16 %v13630_v36  ;;  %v13622_v40 = vunpack.i.h.bf16 %v13620_v37  ;;  %v13621_v41 = vunpack.i.l.bf16 %v13620_v37  ;;  %13050 = vmatprep.subr.bf16.mxu0 %v13049_v35 }
 0x1d4   : > { %13052 = vmatpush3.bf16.msra.mxu0 %v13049_v35 }
 0x1d5   : > { %v13045_v43 = vpack.c.bf16 %v13632_v38, %v13631_v39  ;;  %v13057_v44 = vpack.c.bf16 %v13622_v40, %v13621_v41 }
 0x1d6   : > { %v13625_v45 = vpop.permute.xlu1 %13624  ;;  %v13640_v49 = vpop.permute.xlu0 %13639 }
 0x1d7   : > { %v13627_v47 = vunpack.i.h.bf16 %v13625_v45  ;;  %v13626_v48 = vunpack.i.l.bf16 %v13625_v45  ;;  %13046 = vmatprep.subr.bf16.mxu1 %v13045_v43  ;;  %12305 = vmatmul.mubr.msk.f32.vlgmr.msra.gmra.mrb[12].mxu0 %vm655_vm0, %v11523_v42  ;;  %v13642_v51 = vunpack.i.h.bf16 %v13640_v49  ;;  %v13641_v52 = vunpack.i.l.bf16 %v13640_v49 }
 0x1d8   : > { %13058 = vmatprep.subr.bf16.mxu0 %v13057_v44  ;;  %13048 = vmatpush3.bf16.msra.mxu1 %v13045_v43 }
 0x1d9   : > { %v13065_v53 = vpack.c.bf16 %v13627_v47, %v13626_v48  ;;  %13060 = vmatpush3.bf16.msra.mxu0 %v13057_v44  ;;  %12318 = vmatprep.mubr.msk.f32.mxu0 %vm655_vm0, %v11526_v46  ;;  %v13061_v60 = vpack.c.bf16 %v13642_v51, %v13641_v52 }
 0x1da   : > { %v13635_v56 = vpop.permute.xlu1 %13634  ;;  %v1323_v11 = vpop.permute.xlu0 %1322 }
 0x1db   : > { %v13637_v58 = vunpack.i.h.bf16 %v13635_v56  ;;  %v13636_v59 = vunpack.i.l.bf16 %v13635_v56  ;;  %12298 = vmatmul.mubr.msk.f32.vlgmr.msra.gmra.mrb[6].mxu1 %vm655_vm0, %v11521_v50  ;;  %13066 = vmatprep.subr.bf16.mxu0 %v13065_v53 }
 0x1dc   : > { %12319 = vmatmul.mubr.msk.f32.vlgmr.msra.gmra.mrb[14].mxu0 %vm655_vm0, %v11527_v54  ;;  %12311 = vmatprep.mubr.msk.f32.mxu1 %vm655_vm0, %v11524_v55 }
 0x1dd   : > { %v13053_v61 = vpack.c.bf16 %v13637_v58, %v13636_v59  ;;  %13068 = vmatpush3.bf16.msra.mxu0 %v13065_v53  ;;  %12332 = vmatprep.mubr.msk.f32.mxu0 %vm655_vm0, %v11530_v57 }
 0x1de   : > { %v13645_v63 = vpop.permute.xlu1 %13644  ;;  %13073 = vmatprep.subr.bf16.mxu0 %v13821_v8  ;;  %v1501_v13 = vpop.permute.xlu0 %1500 }
 0x1df   : > { %v13647_v0 = vunpack.i.h.bf16 %v13645_v63  ;;  %v13646_v1 = vunpack.i.l.bf16 %v13645_v63  ;;  %13054 = vmatprep.subr.bf16.mxu1 %v13053_v61 }
 0x1e0   : > { %12333 = vmatmul.mubr.msk.f32.vlgmr.msra.gmra.mrb[16].mxu0 %vm655_vm0, %v11531_v62  ;;  %13056 = vmatpush3.bf16.msra.mxu1 %v13053_v61 }
 0x1e1   : > { %v13069_v3 = vpack.c.bf16 %v13647_v0, %v13646_v1  ;;  %13062 = vmatprep.subr.bf16.mxu1 %v13061_v60  ;;  %12346 = vmatprep.mubr.msk.f32.mxu0 %vm13822_vm1, %v13823_v9 }
 0x1e2   : > { %v1325_v10 = vpop.permute.xlu1 %1324  ;;  %v1679_v15 = vpop.permute.xlu0 %1678 }
 0x1e3   : > { %12312 = vmatmul.mubr.msk.f32.vlgmr.msra.gmra.mrb[8].mxu1 %vm655_vm0, %v11525_v2 }
 0x1e4   : > { %13064 = vmatpush3.bf16.msra.mxu1 %v13061_v60  ;;  %12325 = vmatprep.mubr.msk.f32.mxu1 %vm655_vm0, %v11528_v4  ;;  %v2802_v60 = vld [vmem:[%s15696_s25 + $0x10] sm:$0x7f] }
 0x1e5   : > { %13070 = vmatprep.subr.bf16.mxu1 %v13069_v3 }
 0x1e6   : > { %v1503_v12 = vpop.permute.xlu1 %1502  ;;  %v1857_v24 = vpop.permute.xlu0 %1856 }
 0x1e7   : > { %12326 = vmatmul.mubr.msk.f32.vlgmr.msra.gmra.mrb[10].mxu1 %vm655_vm0, %v11529_v5 }
 0x1e8   : > { %13072 = vmatpush3.bf16.msra.mxu1 %v13069_v3  ;;  %12339 = vmatprep.mubr.msk.f32.mxu1 %vm655_vm0, %v11532_v6 }
 0x1e9   : > { %13076 = vmatprep.subr.bf16.mxu1 %v13821_v8 }
 0x1ea   : > { %v1681_v14 = vpop.permute.xlu1 %1680  ;;  %v1412_v34 = vpop.permute.xlu0 %1411 }
 0x1eb   : > { %12340 = vmatmul.mubr.msk.f32.vlgmr.msra.gmra.mrb[12].mxu1 %vm655_vm0, %v11533_v7 }
 0x1ec   : > { %12353 = vmatprep.mubr.msk.f32.mxu1 %vm13822_vm1, %v13823_v9 }
 0x1ee   : > { %v1859_v22 = vpop.permute.xlu1 %1858  ;;  %v1590_v52 = vpop.permute.xlu0 %1589 }
 0x1f2   : > { %v1414_v31 = vpop.permute.xlu1 %1413 }
 0x1f6   : > { %v1592_v48 = vpop.permute.xlu1 %1591 }
 0x1fa   : > { %v1770_v6 = vpop.permute.xlu1 %1769 }
 0x2a2   : > { %v12292_v16 = vpop.f32.mrb[10].mxu0 }
 0x2a3   : > { %v13497_v18 = vadd.f32 %v12292_v16, %v1325_v10  ;;  %v2127_v19 = vpop.f32.mrb[11].mxu0 }
 0x2a4   : > { %v13498_v20 = vadd.f32 %v2127_v19, %v1323_v11  ;;  %v2801_v11 = vld [vmem:[%s15696_s25 + $0x8] sm:$0x7f] }
 0x2a5   : > { %v2769_v21 = vadd.f32 %v13497_v18, %v14312_v17 }
 0x2a6   : > { %v2768_v23 = vadd.f32 %v13498_v20, %v14312_v17 }
 0x2a7   : > { %v2785_v25 = vmax.f32 %v2769_v21, 0.0 }
 0x2a8   : > { %v2784_v26 = vmax.f32 %v2768_v23, 0.0 }
 0x2aa   : > { %v14316_v27 = vpack.c.bf16 %v2785_v25, %v2784_v26  ;;  %v12306_v28 = vpop.f32.mrb[12].mxu0  ;;  %v2806_v26 = vld [vmem:[%s15696_s25 + $0x30] sm:$0x7f] }
 0x2ab   : > { %v13501_v29 = vadd.f32 %v12306_v28, %v1503_v12  ;;  %v2301_v30 = vpop.f32.mrb[13].mxu0  ;;  %v1768_v12 = vpop.permute.xlu0 %1767 }
 0x2ac   : > { %v13502_v32 = vadd.f32 %v2301_v30, %v1501_v13  ;;  %13075 = vmatpush3.bf16.msra.mxu0 %v14316_v27  ;;  %v1948_v28 = vpop.permute.xlu1 %1947 }
 0x2ad   : > { %v2773_v35 = vadd.f32 %v13501_v29, %v14312_v17  ;;  %13079 = vmatprep.subr.bf16.mxu0 %v13821_v8 }
 0x2ae   : > { %v2772_v36 = vadd.f32 %v13502_v32, %v14312_v17  ;;  %v12299_v37 = vpop.f32.mrb[6].mxu1 }
 0x2af   : > { %v2789_v38 = vmax.f32 %v2773_v35, 0.0  ;;  %v13499_v39 = vadd.f32 %v12299_v37, %v1414_v31  ;;  %v12320_v40 = vpop.f32.mrb[14].mxu0  ;;  %v2214_v41 = vpop.f32.mrb[7].mxu1  ;;  %12347 = vmatmul.mubr.msk.f32.vlgmr.msra.gmra.mrb[18].mxu0 %vm655_vm0, %v2800_v33 }
 0x2b0   : > { %v2788_v42 = vmax.f32 %v2772_v36, 0.0  ;;  %v13505_v43 = vadd.f32 %v12320_v40, %v1681_v14  ;;  %v13500_v44 = vadd.f32 %v2214_v41, %v1412_v34  ;;  %v2475_v45 = vpop.f32.mrb[15].mxu0  ;;  %12360 = vmatprep.mubr.msk.f32.mxu0 %vm13822_vm1, %v13823_v9  ;;  %v1946_v32 = vpop.permute.xlu0 %1945  ;;  %v11559_v40 = vld [vmem:[%s15696_s25 + $0x40] sm:$0x7f] }
 0x2b1   : > { %v2771_v46 = vadd.f32 %v13499_v39, %v14312_v17  ;;  %v13506_v47 = vadd.f32 %v2475_v45, %v1679_v15  ;;  %v2804_v15 = vld [vmem:[%s15696_s25 + $0x20] sm:$0x7f]  ;;  %v2805_v45 = vld [vmem:[%s15696_s25 + $0x28] sm:$0x7f] }
 0x2b2   : > { %v14329_v49 = vpack.c.bf16 %v2789_v38, %v2788_v42  ;;  %v2777_v50 = vadd.f32 %v13505_v43, %v14312_v17  ;;  %v2770_v51 = vadd.f32 %v13500_v44, %v14312_v17  ;;  %v2803_v38 = vld [vmem:[%s15696_s25 + $0x18] sm:$0x7f] }
 0x2b3   : > { %v2787_v53 = vmax.f32 %v2771_v46, 0.0  ;;  %v2776_v54 = vadd.f32 %v13506_v47, %v14312_v17  ;;  %v12334_v55 = vpop.f32.mrb[16].mxu0  ;;  %v2807_v47 = vld [vmem:[%s15696_s25 + $0x38] sm:$0x7f] }
 0x2b4   : > { %v2793_v56 = vmax.f32 %v2777_v50, 0.0  ;;  %v2786_v57 = vmax.f32 %v2770_v51, 0.0  ;;  %v13509_v58 = vadd.f32 %v12334_v55, %v1859_v22  ;;  %v2649_v59 = vpop.f32.mrb[17].mxu0  ;;  %13081 = vmatpush3.bf16.msra.mxu0 %v14329_v49  ;;  %v11560_v50 = vld [vmem:[%s15696_s25 + $0x48] sm:$0x7f] }
 0x2b5   : > { %v2792_v61 = vmax.f32 %v2776_v54, 0.0  ;;  %v13510_v62 = vadd.f32 %v2649_v59, %v1857_v24  ;;  %13085 = vmatprep.subr.bf16.mxu0 %v13821_v8  ;;  %v11565_v51 = vld [vmem:[%s15696_s25 + $0x70] sm:$0x7f]  ;;  %v11579_v55 = vld [vmem:[%s15696_s25 + $0xa0] sm:$0x7f] }
 0x2b6   : > { %v14339_v63 = vpack.c.bf16 %v2787_v53, %v2786_v57  ;;  %v2781_v0 = vadd.f32 %v13509_v58, %v14312_v17  ;;  %v12313_v1 = vpop.f32.mrb[8].mxu1  ;;  %v11575_v53 = vld [vmem:[%s15696_s25 + $0x80] sm:$0x7f]  ;;  %v11577_v54 = vld [vmem:[%s15696_s25 + $0x90] sm:$0x7f] }
 0x2b7   : > { %v14342_v2 = vpack.c.bf16 %v2793_v56, %v2792_v61  ;;  %v2780_v3 = vadd.f32 %v13510_v62, %v14312_v17  ;;  %v13503_v4 = vadd.f32 %v12313_v1, %v1592_v48  ;;  %v2388_v5 = vpop.f32.mrb[9].mxu1  ;;  %12361 = vmatmul.mubr.msk.f32.vlgmr.msra.gmra.mrb[20].mxu0 %vm655_vm0, %v2802_v60  ;;  %v11563_v48 = vld [vmem:[%s15696_s25 + $0x60] sm:$0x7f]  ;;  %v11576_v56 = vld [vmem:[%s15696_s25 + $0x88] sm:$0x7f]  ;;  %v4597_v62 = vld [vmem:[%s15643_s8 + $0x18] sm:$0xff] }
 0x2b8   : > { %v2797_v7 = vmax.f32 %v2781_v0, 0.0  ;;  %v13504_v10 = vadd.f32 %v2388_v5, %v1590_v52  ;;  %13078 = vmatpush3.bf16.msra.mxu1 %v14339_v63  ;;  %12374 = vmatprep.mubr.msk.f32.mxu0 %vm13822_vm1, %v13823_v9  ;;  %v11562_v52 = vld [vmem:[%s15696_s25 + $0x58] sm:$0x7f]  ;;  %v11581_v57 = vld [vmem:[%s15696_s25 + $0xb0] sm:$0x7f]  ;;  %v4595_v61 = vld [vmem:[%s15643_s8 + $0x8] sm:$0xff] }
 0x2b9   : > { %v2796_v13 = vmax.f32 %v2780_v3, 0.0  ;;  %v2775_v14 = vadd.f32 %v13503_v4, %v14312_v17  ;;  %13087 = vmatpush3.bf16.msra.mxu0 %v14342_v2  ;;  %13082 = vmatprep.subr.bf16.mxu1 %v13821_v8  ;;  %v11578_v58 = vld [vmem:[%s15696_s25 + $0x98] sm:$0x7f]  ;;  %v11580_v59 = vld [vmem:[%s15696_s25 + $0xa8] sm:$0x7f]  ;;  %v4594_v0 = vld [vmem:[%s15643_s8] sm:$0xff] }
 0x2ba   : > { %v2774_v16 = vadd.f32 %v13504_v10, %v14312_v17  ;;  %v12327_v18 = vpop.f32.mrb[10].mxu1  ;;  %13091 = vmatprep.subr.bf16.mxu0 %v13821_v8  ;;  %v11582_v60 = vld [vmem:[%s15696_s25 + $0xb8] sm:$0x7f]  ;;  %v4596_v1 = vld [vmem:[%s15643_s8 + $0x10] sm:$0xff]  ;;  %v4599_v3 = vld [vmem:[%s15643_s8 + $0x28] sm:$0xff] }
 0x2bb   : > { %v14360_v19 = vpack.c.bf16 %v2797_v7, %v2796_v13  ;;  %v2791_v20 = vmax.f32 %v2775_v14, 0.0  ;;  %v13507_v21 = vadd.f32 %v12327_v18, %v1770_v6  ;;  %v2562_v22 = vpop.f32.mrb[11].mxu1  ;;  %12354 = vmatmul.mubr.msk.f32.vlgmr.msra.gmra.mrb[14].mxu1 %vm655_vm0, %v2801_v11  ;;  %v4601_v4 = vld [vmem:[%s15643_s8 + $0x38] sm:$0xff]  ;;  %v4598_v6 = vld [vmem:[%s15643_s8 + $0x20] sm:$0xff]  ;;  %v4600_v7 = vld [vmem:[%s15643_s8 + $0x30] sm:$0xff] }
 0x2bc   : > { %v2790_v23 = vmax.f32 %v2774_v16, 0.0  ;;  %v13508_v24 = vadd.f32 %v2562_v22, %v1768_v12  ;;  %12375 = vmatmul.mubr.msk.f32.vlgmr.msra.gmra.mrb[22].mxu0 %vm655_vm0, %v2804_v15  ;;  %12367 = vmatprep.mubr.msk.f32.mxu1 %vm13822_vm1, %v13823_v9  ;;  %v13149_v5 = vpack.c.bf16 %v4601_v4, %v4599_v3  ;;  %v13151_v10 = vpack.c.bf16 %v4600_v7, %v4598_v6  ;;  %v4611_v11 = vld [vmem:[%s15643_s8 + $0x88] sm:$0xff]  ;;  %v4613_v12 = vld [vmem:[%s15643_s8 + $0x98] sm:$0xff]  ;;  %v4602_v18 = vld [vmem:[%s15643_s8 + $0x40] sm:$0xff] }
 0x2bd   : > { %v2779_v25 = vadd.f32 %v13507_v21, %v14312_v17  ;;  %13093 = vmatpush3.bf16.msra.mxu0 %v14360_v19  ;;  %12388 = vmatprep.mubr.msk.f32.mxu0 %vm13822_vm1, %v13823_v9  ;;  %v13161_v13 = vpack.c.bf16 %v4613_v12, %v4611_v11  ;;  %v4603_v14 = vld [vmem:[%s15643_s8 + $0x48] sm:$0xff]  ;;  %v4605_v15 = vld [vmem:[%s15643_s8 + $0x58] sm:$0xff]  ;;  %v4616_v11 = vld [vmem:[%s15643_s8 + $0xb0] sm:$0xff] }
 0x2be   : > { %v14373_v29 = vpack.c.bf16 %v2791_v20, %v2790_v23  ;;  %v2778_v30 = vadd.f32 %v13508_v24, %v14312_v17  ;;  %v12341_v31 = vpop.f32.mrb[12].mxu1  ;;  %13097 = vmatprep.subr.bf16.mxu0 %v13821_v8  ;;  %v13153_v16 = vpack.c.bf16 %v4605_v15, %v4603_v14  ;;  %v4607_v21 = vld [vmem:[%s15643_s8 + $0x68] sm:$0xff]  ;;  %v4609_v22 = vld [vmem:[%s15643_s8 + $0x78] sm:$0xff]  ;;  %v4606_v24 = vld [vmem:[%s15643_s8 + $0x60] sm:$0xff] }
 0x2bf   : > { %v2795_v33 = vmax.f32 %v2779_v25, 0.0  ;;  %v13511_v34 = vadd.f32 %v12341_v31, %v1948_v28  ;;  %v2736_v35 = vpop.f32.mrb[13].mxu1  ;;  %v13157_v23 = vpack.c.bf16 %v4609_v22, %v4607_v21  ;;  %v4608_v25 = vld [vmem:[%s15643_s8 + $0x70] sm:$0xff]  ;;  %v4619_v28 = vld [vmem:[%s15643_s8 + $0xc8] sm:$0xff] }
 0x2c0   : > { %v2794_v36 = vmax.f32 %v2778_v30, 0.0  ;;  %v13512_v37 = vadd.f32 %v2736_v35, %v1946_v32  ;;  %12389 = vmatmul.mubr.msk.f32.vlgmr.msra.gmra.mrb[24].mxu0 %vm655_vm0, %v2806_v26  ;;  %13084 = vmatpush3.bf16.msra.mxu1 %v14373_v29  ;;  %v13159_v26 = vpack.c.bf16 %v4608_v25, %v4606_v24  ;;  %v4627_v12 = vld [vmem:[%s15643_s8 + $0x108] sm:$0xff]  ;;  %v4628_v24 = vld [vmem:[%s15643_s8 + $0x110] sm:$0xff] }
 0x2c1   : > { %v2783_v39 = vadd.f32 %v13511_v34, %v14312_v17  ;;  %13099 = vmatpush3.bf16.msra.mxu0 %v14316_v27  ;;  %12402 = vmatprep.mubr.msk.f32.mxu0 %vm13822_vm1, %v13823_v9  ;;  %v4631_v25 = vld [vmem:[%s15643_s8 + $0x128] sm:$0xff] }
 0x2c2   : > { %v14389_v41 = vpack.c.bf16 %v2795_v33, %v2794_v36  ;;  %v2782_v42 = vadd.f32 %v13512_v37, %v14312_v17  ;;  %13088 = vmatprep.subr.bf16.mxu1 %v13821_v8  ;;  %13103 = vmatprep.subr.bf16.mxu0 %v13821_v8  ;;  %v11561_v17 = vld [vmem:[%s15696_s25 + $0x50] sm:$0x7f] }
 0x2c3   : > { %v2799_v43 = vmax.f32 %v2783_v39, 0.0  ;;  %12368 = vmatmul.mubr.msk.f32.vlgmr.msra.gmra.mrb[16].mxu1 %vm655_vm0, %v2803_v38 }
 0x2c4   : > { %v2798_v44 = vmax.f32 %v2782_v42, 0.0  ;;  %12403 = vmatmul.mubr.msk.f32.vlgmr.msra.gmra.mrb[26].mxu0 %vm655_vm0, %v11559_v40  ;;  %13090 = vmatpush3.bf16.msra.mxu1 %v14389_v41 }
 0x2c5   : > { %13105 = vmatpush3.bf16.msra.mxu0 %v14329_v49  ;;  %12381 = vmatprep.mubr.msk.f32.mxu1 %vm13822_vm1, %v13823_v9 }
 0x2c6   : > { %v14406_v46 = vpack.c.bf16 %v2799_v43, %v2798_v44  ;;  %12416 = vmatprep.mubr.msk.f32.mxu0 %vm13822_vm1, %v13823_v9  ;;  %13094 = vmatprep.subr.bf16.mxu1 %v13821_v8 }
 0x2c7   : > { %12382 = vmatmul.mubr.msk.f32.vlgmr.msra.gmra.mrb[18].mxu1 %vm655_vm0, %v2805_v45  ;;  %13109 = vmatprep.subr.bf16.mxu0 %v13821_v8 }
 0x2c8   : > { %12417 = vmatmul.mubr.msk.f32.vlgmr.msra.gmra.mrb[28].mxu0 %vm655_vm0, %v11561_v17  ;;  %13096 = vmatpush3.bf16.msra.mxu1 %v14406_v46 }
 0x2c9   : > { %13111 = vmatpush3.bf16.msra.mxu0 %v14342_v2  ;;  %12395 = vmatprep.mubr.msk.f32.mxu1 %vm13822_vm1, %v13823_v9 }
 0x2ca   : > { %12430 = vmatprep.mubr.msk.f32.mxu0 %vm13822_vm1, %v13823_v9  ;;  %13100 = vmatprep.subr.bf16.mxu1 %v13821_v8 }
 0x2cb   : > { %12396 = vmatmul.mubr.msk.f32.vlgmr.msra.gmra.mrb[20].mxu1 %vm655_vm0, %v2807_v47  ;;  %13115 = vmatprep.subr.bf16.mxu0 %v13821_v8 }
 0x2cc   : > { %12431 = vmatmul.mubr.msk.f32.vlgmr.msra.gmra.mrb[30].mxu0 %vm655_vm0, %v11563_v48  ;;  %13102 = vmatpush3.bf16.msra.mxu1 %v14339_v63 }
 0x2cd   : > { %13117 = vmatpush3.bf16.msra.mxu0 %v14360_v19  ;;  %12409 = vmatprep.mubr.msk.f32.mxu1 %vm13822_vm1, %v13823_v9 }
 0x2ce   : > { %12444 = vmatprep.mubr.msk.f32.mxu0 %vm13822_vm1, %v13823_v9  ;;  %13106 = vmatprep.subr.bf16.mxu1 %v13821_v8 }
 0x2cf   : > { %12410 = vmatmul.mubr.msk.f32.vlgmr.msra.gmra.mrb[22].mxu1 %vm655_vm0, %v11560_v50  ;;  %13121 = vmatprep.subr.bf16.mxu0 %v13821_v8 }
 0x2d0   : > { %12445 = vmatmul.mubr.msk.f32.vlgmr.msra.gmra.mrb[32].mxu0 %vm655_vm0, %v11565_v51  ;;  %13108 = vmatpush3.bf16.msra.mxu1 %v14373_v29 }
 0x2d1   : > { %13123 = vmatpush3.bf16.msra.mxu0 %v14316_v27  ;;  %12423 = vmatprep.mubr.msk.f32.mxu1 %vm13822_vm1, %v13823_v9  ;;  %v11564_v27 = vld [vmem:[%s15696_s25 + $0x68] sm:$0x7f] }
 0x2d2   : > { %12458 = vmatprep.mubr.msk.f32.mxu0 %vm13822_vm1, %v13823_v9  ;;  %13112 = vmatprep.subr.bf16.mxu1 %v13821_v8 }
 0x2d3   : > { %12424 = vmatmul.mubr.msk.f32.vlgmr.msra.gmra.mrb[24].mxu1 %vm655_vm0, %v11562_v52  ;;  %13127 = vmatprep.subr.bf16.mxu0 %v13821_v8 }
 0x2d4   : > { %12459 = vmatmul.mubr.msk.f32.vlgmr.msra.gmra.mrb[34].mxu0 %vm655_vm0, %v11575_v53  ;;  %13114 = vmatpush3.bf16.msra.mxu1 %v14389_v41 }
 0x2d5   : > { %13129 = vmatpush3.bf16.msra.mxu0 %v14329_v49  ;;  %12437 = vmatprep.mubr.msk.f32.mxu1 %vm13822_vm1, %v13823_v9  ;;  %v11566_v49 = vld [vmem:[%s15696_s25 + $0x78] sm:$0x7f] }
 0x2d6   : > { %12472 = vmatprep.mubr.msk.f32.mxu0 %vm13822_vm1, %v13823_v9  ;;  %13118 = vmatprep.subr.bf16.mxu1 %v13821_v8 }
 0x2d7   : > { %12438 = vmatmul.mubr.msk.f32.vlgmr.msra.gmra.mrb[26].mxu1 %vm655_vm0, %v11564_v27  ;;  %13133 = vmatprep.subr.bf16.mxu0 %v13821_v8 }
 0x2d8   : > { %12473 = vmatmul.mubr.msk.f32.vlgmr.msra.gmra.mrb[36].mxu0 %vm655_vm0, %v11577_v54  ;;  %13120 = vmatpush3.bf16.msra.mxu1 %v14406_v46 }
 0x2d9   : > { %13135 = vmatpush3.bf16.msra.mxu0 %v14342_v2  ;;  %12451 = vmatprep.mubr.msk.f32.mxu1 %vm13822_vm1, %v13823_v9  ;;  %v13147_v2 = vpack.c.bf16 %v4596_v1, %v4594_v0 }
 0x2da   : > { %12486 = vmatprep.mubr.msk.f32.mxu0 %vm13822_vm1, %v13823_v9  ;;  %13124 = vmatprep.subr.bf16.mxu1 %v13821_v8 }
 0x2db   : > { %12452 = vmatmul.mubr.msk.f32.vlgmr.msra.gmra.mrb[28].mxu1 %vm655_vm0, %v11566_v49  ;;  %13139 = vmatprep.subr.bf16.mxu0 %v13821_v8 }
 0x2dc   : > { %12487 = vmatmul.mubr.msk.f32.vlgmr.msra.gmra.mrb[38].mxu0 %vm655_vm0, %v11579_v55  ;;  %13126 = vmatpush3.bf16.msra.mxu1 %v14339_v63  ;;  %v13145_v63 = vpack.c.bf16 %v4597_v62, %v4595_v61  ;;  %v4612_v61 = vld [vmem:[%s15643_s8 + $0x90] sm:$0xff]  ;;  %v4615_v62 = vld [vmem:[%s15643_s8 + $0xa8] sm:$0xff] }
 0x2dd   : > { %13141 = vmatpush3.bf16.msra.mxu0 %v14360_v19  ;;  %12465 = vmatprep.mubr.msk.f32.mxu1 %vm13822_vm1, %v13823_v9  ;;  %v4604_v19 = vld [vmem:[%s15643_s8 + $0x50] sm:$0xff] }
 0x2de   : > { %12500 = vmatprep.mubr.msk.f32.mxu0 %vm13822_vm1, %v13823_v9  ;;  %13130 = vmatprep.subr.bf16.mxu1 %v13821_v8  ;;  %v13155_v20 = vpack.c.bf16 %v4604_v19, %v4602_v18 }
 0x2df   : > { %12466 = vmatmul.mubr.msk.f32.vlgmr.msra.gmra.mrb[30].mxu1 %vm655_vm0, %v11576_v56  ;;  %13146 = vmatprep.subr.bf16.mxu0 %v13145_v63  ;;  %v4617_v63 = vld [vmem:[%s15643_s8 + $0xb8] sm:$0xff] }
 0x2e0   : > { %12501 = vmatmul.mubr.msk.f32.vlgmr.msra.gmra.mrb[40].mxu0 %vm655_vm0, %v11581_v57  ;;  %13132 = vmatpush3.bf16.msra.mxu1 %v14373_v29  ;;  %v4621_v29 = vld [vmem:[%s15643_s8 + $0xd8] sm:$0xff]  ;;  %v13165_v7 = vpack.c.bf16 %v4617_v63, %v4615_v62 }
 0x2e1   : > { %12479 = vmatprep.mubr.msk.f32.mxu1 %vm13822_vm1, %v13823_v9  ;;  %13136 = vmatprep.subr.bf16.mxu1 %v13821_v8  ;;  %v13169_v30 = vpack.c.bf16 %v4621_v29, %v4619_v28  ;;  %v4637_v62 = vld [vmem:[%s15643_s8 + $0x158] sm:$0xff] }
 0x2e2   : > { %4726 = vmatprep.mubr.f32.mxu0 %v13823_v9  ;;  %13148 = vmatpush1.bf16.msra.mxu0 %v13147_v2 }
 0x2e3   : > { %12480 = vmatmul.mubr.msk.f32.vlgmr.msra.gmra.mrb[32].mxu1 %vm655_vm0, %v11578_v58  ;;  %13150 = vmatprep.subr.bf16.mxu0 %v13149_v5 }
 0x2e4   : > { %13138 = vmatpush3.bf16.msra.mxu1 %v14389_v41  ;;  %12493 = vmatprep.mubr.msk.f32.mxu1 %vm13822_vm1, %v13823_v9 }
 0x2e5   : > { %13142 = vmatprep.subr.bf16.mxu1 %v13821_v8 }
 0x2e6   : > { %13152 = vmatpush1.bf16.msra.mxu0 %v13151_v10  ;;  %v4614_v10 = vld [vmem:[%s15643_s8 + $0xa0] sm:$0xff] }
 0x2e7   : > { %12494 = vmatmul.mubr.msk.f32.vlgmr.msra.gmra.mrb[34].mxu1 %vm655_vm0, %v11580_v59  ;;  %13162 = vmatprep.subr.bf16.mxu0 %v13161_v13  ;;  %v4629_v13 = vld [vmem:[%s15643_s8 + $0x118] sm:$0xff]  ;;  %v13167_v19 = vpack.c.bf16 %v4616_v11, %v4614_v10  ;;  %v4636_v10 = vld [vmem:[%s15643_s8 + $0x150] sm:$0xff]  ;;  %v4646_v11 = vld [vmem:[%s15643_s8 + $0x1a0] sm:$0xff] }
 0x2e8   : > { %13144 = vmatpush3.bf16.msra.mxu1 %v14406_v46  ;;  %12507 = vmatprep.mubr.msk.f32.mxu1 %vm13822_vm1, %v13823_v9  ;;  %v13177_v22 = vpack.c.bf16 %v4629_v13, %v4627_v12 }
 0x2e9   : > { %13154 = vmatprep.subr.bf16.mxu1 %v13153_v16 }
 0x2eb   : > { %12508 = vmatmul.mubr.msk.f32.vlgmr.msra.gmra.mrb[36].mxu1 %vm655_vm0, %v11582_v60  ;;  %v4610_v60 = vld [vmem:[%s15643_s8 + $0x80] sm:$0xff] }
 0x2ec   : > { %4800 = vmatprep.mubr.f32.mxu1 %v13823_v9  ;;  %13156 = vmatpush1.bf16.msra.mxu1 %v13155_v20  ;;  %v13163_v4 = vpack.c.bf16 %v4612_v61, %v4610_v60  ;;  %v4644_v60 = vld [vmem:[%s15643_s8 + $0x190] sm:$0xff]  ;;  %v4635_v61 = vld [vmem:[%s15643_s8 + $0x148] sm:$0xff] }
 0x2ed   : > { %13158 = vmatprep.subr.bf16.mxu1 %v13157_v23  ;;  %v4626_v23 = vld [vmem:[%s15643_s8 + $0x100] sm:$0xff] }
 0x2f0   : > { %13160 = vmatpush1.bf16.msra.mxu1 %v13159_v26  ;;  %v4633_v26 = vld [vmem:[%s15643_s8 + $0x138] sm:$0xff] }
 0x2f1   : > { %13170 = vmatprep.subr.bf16.mxu1 %v13169_v30 }
 0x382   : > { %v2877_v31 = vpop.f32.mrb[18].mxu0 }
 0x383   : > { %v12348_v32 = vpop.f32.mrb[19].mxu0 }
 0x384   : > { %v13179_v32 = vpack.c.bf16 %v4628_v24, %v4626_v23  ;;  %v4640_v23 = vld [vmem:[%s15643_s8 + $0x170] sm:$0xff] }
 0x38a   : > { %v3023_v33 = vpop.f32.mrb[20].mxu0 }
 0x38b   : > { %v12362_v34 = vpop.f32.mrb[21].mxu0 }
 0x38c   : > { %v4620_v34 = vld [vmem:[%s15643_s8 + $0xd0] sm:$0xff] }
 0x38e   : > { %v14594_v35 = vpop.f32.mrb[14].mxu1 }
 0x38f   : > { %v14596_v36 = vpop.f32.mrb[22].mxu0  ;;  %v12355_v37 = vpop.f32.mrb[15].mxu1 }
 0x390   : > { %v12376_v38 = vpop.f32.mrb[23].mxu0 }
 0x391   : > { %v13181_v38 = vpack.c.bf16 %v4633_v26, %v4631_v25 }
 0x393   : > { %v14598_v39 = vpop.f32.mrb[24].mxu0 }
 0x394   : > { %v12390_v40 = vpop.f32.mrb[25].mxu0 }
 0x395   : > { %v4632_v40 = vld [vmem:[%s15643_s8 + $0x130] sm:$0xff] }
 0x396   : > { %v14600_v41 = vpop.f32.mrb[16].mxu1 }
 0x397   : > { %v3470_v42 = vpop.f32.mrb[26].mxu0  ;;  %v12369_v43 = vpop.f32.mrb[17].mxu1 }
 0x398   : > { %v4578_v44 = vmax.f32 %v2877_v31, %v3470_v42  ;;  %v12404_v45 = vpop.f32.mrb[27].mxu0  ;;  %v4623_v42 = vld [vmem:[%s15643_s8 + $0xe8] sm:$0xff]  ;;  %v4625_v43 = vld [vmem:[%s15643_s8 + $0xf8] sm:$0xff] }
 0x399   : > { %v4645_v45 = vld [vmem:[%s15643_s8 + $0x198] sm:$0xff] }
 0x39a   : > { %v14602_v17 = vpop.f32.mrb[18].mxu1 }
 0x39b   : > { %v3616_v46 = vpop.f32.mrb[28].mxu0  ;;  %v12383_v47 = vpop.f32.mrb[19].mxu1 }
 0x39c   : > { %v4580_v48 = vmax.f32 %v3023_v33, %v3616_v46  ;;  %v12418_v50 = vpop.f32.mrb[29].mxu0  ;;  %v4618_v33 = vld [vmem:[%s15643_s8 + $0xc0] sm:$0xff] }
 0x39d   : > { %v13171_v47 = vpack.c.bf16 %v4620_v34, %v4618_v33  ;;  %v4655_v33 = vld [vmem:[%s15643_s8 + $0x1e8] sm:$0xff]  ;;  %v4654_v34 = vld [vmem:[%s15643_s8 + $0x1e0] sm:$0xff] }
 0x39e   : > { %v14604_v51 = vpop.f32.mrb[20].mxu1 }
 0x39f   : > { %v3762_v52 = vpop.f32.mrb[30].mxu0  ;;  %v12397_v53 = vpop.f32.mrb[21].mxu1 }
 0x3a0   : > { %v4582_v27 = vmax.f32 %v14596_v36, %v3762_v52  ;;  %v12432_v54 = vpop.f32.mrb[31].mxu0 }
 0x3a1   : > { %v4622_v54 = vld [vmem:[%s15643_s8 + $0xe0] sm:$0xff] }
 0x3a2   : > { %v3543_v49 = vpop.f32.mrb[22].mxu1 }
 0x3a3   : > { %v4579_v55 = vmax.f32 %v14594_v35, %v3543_v49  ;;  %v14608_v56 = vpop.f32.mrb[32].mxu0  ;;  %v12411_v57 = vpop.f32.mrb[23].mxu1  ;;  %v4630_v35 = vld [vmem:[%s15643_s8 + $0x120] sm:$0xff]  ;;  %v4624_v49 = vld [vmem:[%s15643_s8 + $0xf0] sm:$0xff] }
 0x3a4   : > { %v4584_v58 = vmax.f32 %v14598_v39, %v14608_v56  ;;  %v12446_v59 = vpop.f32.mrb[33].mxu0  ;;  %v13183_v53 = vpack.c.bf16 %v4632_v40, %v4630_v35  ;;  %v4642_v57 = vld [vmem:[%s15643_s8 + $0x180] sm:$0xff]  ;;  %v4647_v39 = vld [vmem:[%s15643_s8 + $0x1a8] sm:$0xff]  ;;  %v4649_v56 = vld [vmem:[%s15643_s8 + $0x1b8] sm:$0xff] }
 0x3a5   : > { %v13197_v12 = vpack.c.bf16 %v4649_v56, %v4647_v39  ;;  %v4656_v35 = vld [vmem:[%s15643_s8 + $0x1f0] sm:$0xff]  ;;  %v5258_v39 = vld [vmem:[%s15638_s3 + $0x38] sm:$0x7f] }
 0x3a6   : > { %v14624_v0 = vpop.f32.mrb[24].mxu1 }
 0x3a7   : > { %v4581_v1 = vmax.f32 %v14600_v41, %v14624_v0  ;;  %v4063_v2 = vpop.f32.mrb[34].mxu0  ;;  %v12425_v3 = vpop.f32.mrb[25].mxu1  ;;  %v4648_v41 = vld [vmem:[%s15643_s8 + $0x1b0] sm:$0xff]  ;;  %v4639_v0 = vld [vmem:[%s15643_s8 + $0x168] sm:$0xff] }
 0x3a8   : > { %v4586_v5 = vmax.f32 %v4578_v44, %v4063_v2  ;;  %v12460_v6 = vpop.f32.mrb[35].mxu0  ;;  %v4643_v44 = vld [vmem:[%s15643_s8 + $0x188] sm:$0xff]  ;;  %v13175_v2 = vpack.c.bf16 %v4624_v49, %v4622_v54  ;;  %v5257_v49 = vld [vmem:[%s15638_s3 + $0x30] sm:$0x7f] }
 0x3a9   : > { %v13193_v59 = vpack.c.bf16 %v4645_v45, %v4643_v44  ;;  %v13185_v6 = vpack.c.bf16 %v4637_v62, %v4635_v61  ;;  %v5252_v45 = vld [vmem:[%s15638_s3 + $0x8] sm:$0x7f]  ;;  %v11615_v61 = vld [vmem:[%s15638_s3 + $0x40] sm:$0x7f] }
 0x3aa   : > { %11591 = vmatmul.mubr.msk.f32.vlgmr.msra.gmra.mrb[42].mxu0 %vm4658_vm2, %v4586_v5  ;;  %v14641_v14 = vpop.f32.mrb[26].mxu1  ;;  %v13195_v5 = vpack.c.bf16 %v4644_v60, %v4642_v57  ;;  %v5256_v60 = vld [vmem:[%s15638_s3 + $0x28] sm:$0x7f] }
 0x3ab   : > { %13164 = vmatpush1.bf16.msra.mxu0 %v13163_v4  ;;  %v4583_v15 = vmax.f32 %v14602_v17, %v14641_v14  ;;  %v4209_v16 = vpop.f32.mrb[36].mxu0  ;;  %v12439_v18 = vpop.f32.mrb[27].mxu1  ;;  %4874 = vmatprep.mubr.f32.mxu0 %v13823_v9  ;;  %v4651_v17 = vld [vmem:[%s15643_s8 + $0x1c8] sm:$0xff]  ;;  %v4653_v14 = vld [vmem:[%s15643_s8 + $0x1d8] sm:$0xff] }
 0x3ac   : > { %v4588_v20 = vmax.f32 %v4580_v48, %v4209_v16  ;;  %13166 = vmatprep.subr.bf16.mxu0 %v13165_v7  ;;  %v12474_v21 = vpop.f32.mrb[37].mxu0  ;;  %v4634_v7 = vld [vmem:[%s15643_s8 + $0x140] sm:$0xff]  ;;  %v13201_v26 = vpack.c.bf16 %v4653_v14, %v4651_v17 }
 0x3ad   : > { %v13187_v16 = vpack.c.bf16 %v4636_v10, %v4634_v7  ;;  %v11622_v7 = vld [vmem:[%s15638_s3 + $0x78] sm:$0x7f] }
 0x3ae   : > { %v14658_v28 = vpop.f32.mrb[28].mxu1 }
 0x3af   : > { %13168 = vmatpush1.bf16.msra.mxu0 %v13167_v19  ;;  %v4585_v29 = vmax.f32 %v14604_v51, %v14658_v28  ;;  %v4355_v30 = vpop.f32.mrb[38].mxu0  ;;  %v12453_v31 = vpop.f32.mrb[29].mxu1  ;;  %v4657_v51 = vld [vmem:[%s15643_s8 + $0x1f8] sm:$0xff] }
 0x3b0   : > { %v4590_v36 = vmax.f32 %v4582_v27, %v4355_v30  ;;  %13178 = vmatprep.subr.bf16.mxu0 %v13177_v22  ;;  %v12488_v37 = vpop.f32.mrb[39].mxu0  ;;  %v13173_v27 = vpack.c.bf16 %v4625_v43, %v4623_v42  ;;  %v4638_v22 = vld [vmem:[%s15643_s8 + $0x160] sm:$0xff]  ;;  %v4652_v31 = vld [vmem:[%s15643_s8 + $0x1d0] sm:$0xff] }
 0x3b1   : > { %v13191_v24 = vpack.c.bf16 %v4640_v23, %v4638_v22  ;;  %v4650_v30 = vld [vmem:[%s15643_s8 + $0x1c0] sm:$0xff]  ;;  %v5253_v42 = vld [vmem:[%s15638_s3 + $0x10] sm:$0x7f] }
 0x3b2   : > { %11593 = vmatmul.mubr.msk.f32.vlgmr.msra.gmra.mrb[44].mxu0 %vm4658_vm2, %v4588_v20  ;;  %v4136_v46 = vpop.f32.mrb[30].mxu1  ;;  %v13199_v20 = vpack.c.bf16 %v4648_v41, %v4646_v11  ;;  %v13203_v28 = vpack.c.bf16 %v4652_v31, %v4650_v30  ;;  %v5251_v37 = vld [vmem:[%s15638_s3] sm:$0x7f] }
 0x3b3   : > { %13180 = vmatpush1.bf16.msra.mxu0 %v13179_v32  ;;  %v4587_v48 = vmax.f32 %v4579_v55, %v4136_v46  ;;  %v4501_v50 = vpop.f32.mrb[40].mxu0  ;;  %v12467_v52 = vpop.f32.mrb[31].mxu1  ;;  %5022 = vmatprep.mubr.f32.mxu0 %v13823_v9 }
 0x3b4   : > { %v4592_v55 = vmax.f32 %v4584_v58, %v4501_v50  ;;  %13182 = vmatprep.subr.bf16.mxu0 %v13181_v38  ;;  %v12502_v63 = vpop.f32.mrb[41].mxu0 }
 0x3b5   : > { %11592 = vmatmul.mubr.msk.f32.vlgmr.msra.gmra.mrb[38].mxu1 %vm4658_vm2, %v4587_v48  ;;  %v5255_v48 = vld [vmem:[%s15638_s3 + $0x20] sm:$0x7f]  ;;  %v11617_v63 = vld [vmem:[%s15638_s3 + $0x50] sm:$0x7f] }
 0x3b6   : > { %13172 = vmatpush1.bf16.msra.mxu1 %v13171_v47  ;;  %v4282_v58 = vpop.f32.mrb[32].mxu1  ;;  %4948 = vmatprep.mubr.f32.mxu1 %v13823_v9 }
 0x3b7   : > { %13184 = vmatpush1.bf16.msra.mxu0 %v13183_v53  ;;  %v4589_v3 = vmax.f32 %v4581_v1, %v4282_v58  ;;  %13174 = vmatprep.subr.bf16.mxu1 %v13173_v27  ;;  %v12481_v4 = vpop.f32.mrb[33].mxu1  ;;  %v4641_v1 = vld [vmem:[%s15643_s8 + $0x178] sm:$0xff]  ;;  %v11619_v58 = vld [vmem:[%s15638_s3 + $0x60] sm:$0x7f] }
 0x3b8   : > { %13194 = vmatprep.subr.bf16.mxu0 %v13193_v59  ;;  %v13189_v21 = vpack.c.bf16 %v4641_v1, %v4639_v0  ;;  %v5254_v53 = vld [vmem:[%s15638_s3 + $0x18] sm:$0x7f]  ;;  %v11621_v4 = vld [vmem:[%s15638_s3 + $0x70] sm:$0x7f] }
 0x3ba   : > { %11595 = vmatmul.mubr.msk.f32.vlgmr.msra.gmra.mrb[46].mxu0 %vm4658_vm2, %v4590_v36  ;;  %13176 = vmatpush1.bf16.msra.mxu1 %v13175_v2  ;;  %v4428_v13 = vpop.f32.mrb[34].mxu1  ;;  %v13207_v36 = vpack.c.bf16 %v4656_v35, %v4654_v34  ;;  %v6541_v35 = vld [vmem:[%s15639_s4] sm:$0x7] }
 0x3bb   : > { %13196 = vmatpush1.bf16.msra.mxu0 %v13195_v5  ;;  %v4591_v18 = vmax.f32 %v4583_v15, %v4428_v13  ;;  %13186 = vmatprep.subr.bf16.mxu1 %v13185_v6  ;;  %v12495_v19 = vpop.f32.mrb[35].mxu1  ;;  %v11618_v5 = vld [vmem:[%s15638_s3 + $0x58] sm:$0x7f]  ;;  %v11620_v6 = vld [vmem:[%s15638_s3 + $0x68] sm:$0x7f] }
 0x3bc   : > { %13198 = vmatprep.subr.bf16.mxu0 %v13197_v12  ;;  %5170 = vmatprep.mubr.f32.mxu0 %v13823_v9 }
 0x3bd   : > { %11594 = vmatmul.mubr.msk.f32.vlgmr.msra.gmra.mrb[40].mxu1 %vm4658_vm2, %v4589_v3  ;;  %v11616_v3 = vld [vmem:[%s15638_s3 + $0x48] sm:$0x7f] }
 0x3be   : > { %13188 = vmatpush1.bf16.msra.mxu1 %v13187_v16  ;;  %v4574_v15 = vpop.f32.mrb[36].mxu1  ;;  %5096 = vmatprep.mubr.f32.mxu1 %v13823_v9 }
 0x3bf   : > { %13200 = vmatpush1.bf16.msra.mxu0 %v13199_v20  ;;  %v4593_v25 = vmax.f32 %v4585_v29, %v4574_v15  ;;  %13190 = vmatprep.subr.bf16.mxu1 %v13189_v21  ;;  %v12509_v32 = vpop.f32.mrb[37].mxu1  ;;  %v13205_v29 = vpack.c.bf16 %v4657_v51, %v4655_v33  ;;  %v14927_v15 = vld [vmem:[%s15644_s9] ss:$0 sm:$0xff] }
 0x3c0   : > { %12510 = vmatprep.subr.mxu0 %v13823_v9 }
 0x3c2   : > { %11597 = vmatmul.mubr.msk.f32.vlgmr.msra.gmra.mrb[48].mxu0 %vm4658_vm2, %v4592_v55  ;;  %13192 = vmatpush1.bf16.msra.mxu1 %v13191_v24 }
 0x3c3   : > { %13202 = vmatprep.subr.bf16.mxu1 %v13201_v26  ;;  %12512 = vmatprep.mubr.msk.f32.mxu0 %vm13822_vm1, %v13823_v9 }
 0x3c5   : > { %11596 = vmatmul.mubr.msk.f32.vlgmr.msra.gmra.mrb[42].mxu1 %vm4658_vm2, %v4591_v18 }
 0x3c6   : > { %13204 = vmatpush1.bf16.msra.mxu1 %v13203_v28  ;;  %5244 = vmatprep.mubr.f32.mxu1 %v13823_v9 }
 0x3c7   : > { %13206 = vmatprep.subr.bf16.mxu1 %v13205_v29 }
 0x3ca   : > { %13208 = vmatpush1.bf16.msra.mxu1 %v13207_v36 }
 0x3cb   : > { %12515 = vmatprep.subr.mxu1 %v13823_v9 }
 0x3cd   : > { %11598 = vmatmul.mubr.msk.f32.vlgmr.msra.gmra.mrb[44].mxu1 %vm4658_vm2, %v4593_v25 }
 0x3ce   : > { %12517 = vmatprep.mubr.msk.f32.mxu1 %vm13822_vm1, %v13823_v9 }
 0x47d   : > { %v4728_v38 = vpop.f32.mrb[42].mxu0 }
 0x47e   : > { %5260 = vrot.lane.b32.xlu0 %v4728_v38, %s13819_s29  ;;  %v4730_v40 = vpop.f32.mrb[43].mxu0  ;;  %12511 = vmatpush3.msk.msra.mxu0 %vm5267_vm3, %v4728_v38 }
 0x47f   : > { %12513 = vmatmul.mubr.msk.f32.vlgmr.msra.gmra.mrb[50].mxu0 %vm5263_vm4, %v5251_v37  ;;  %12520 = vmatprep.subr.mxu0 %v13823_v9 }
 0x480   : > { %12522 = vmatprep.mubr.msk.f32.mxu0 %vm13822_vm1, %v13823_v9 }
 0x485   : > { %v4876_v43 = vpop.f32.mrb[44].mxu0 }
 0x486   : > { %5420 = vrot.lane.b32.xlu1 %v4876_v43, %s13819_s29  ;;  %v4878_v44 = vpop.f32.mrb[45].mxu0  ;;  %12521 = vmatpush3.msk.msra.mxu0 %vm5267_vm3, %v4876_v43 }
 0x487   : > { %12523 = vmatmul.mubr.msk.f32.vlgmr.msra.gmra.mrb[52].mxu0 %vm5263_vm4, %v5253_v42  ;;  %12530 = vmatprep.subr.mxu0 %v13823_v9 }
 0x488   : > { %v4802_v46 = vpop.f32.mrb[38].mxu1  ;;  %12532 = vmatprep.mubr.msk.f32.mxu0 %vm13822_vm1, %v13823_v9 }
 0x489   : > { %v4804_v47 = vpop.f32.mrb[39].mxu1  ;;  %12516 = vmatpush3.msk.msra.mxu1 %vm5267_vm3, %v4802_v46 }
 0x48a   : > { %12518 = vmatmul.mubr.msk.f32.vlgmr.msra.gmra.mrb[46].mxu1 %vm5263_vm4, %v5252_v45  ;;  %12525 = vmatprep.subr.mxu1 %v13823_v9 }
 0x48b   : > { %12527 = vmatprep.mubr.msk.f32.mxu1 %vm13822_vm1, %v13823_v9 }
 0x48d   : > { %v5024_v50 = vpop.f32.mrb[46].mxu0 }
 0x48e   : > { %5578 = vrot.lane.b32.xlu0 %v5024_v50, %s13819_s29  ;;  %v5026_v52 = vpop.f32.mrb[47].mxu0  ;;  %12531 = vmatpush3.msk.msra.mxu0 %vm5267_vm3, %v5024_v50 }
 0x48f   : > { %12533 = vmatmul.mubr.msk.f32.vlgmr.msra.gmra.mrb[54].mxu0 %vm5263_vm4, %v5255_v48  ;;  %12540 = vmatprep.subr.mxu0 %v13823_v9  ;;  %v6543_v48 = vld [vmem:[%s15639_s4 + $0x8] sm:$0x7] }
 0x490   : > { %v4950_v27 = vpop.f32.mrb[40].mxu1  ;;  %12542 = vmatprep.mubr.msk.f32.mxu0 %vm13822_vm1, %v13823_v9 }
 0x491   : > { %v4952_v54 = vpop.f32.mrb[41].mxu1  ;;  %12526 = vmatpush3.msk.msra.mxu1 %vm5267_vm3, %v4950_v27 }
 0x492   : > { %5341 = vrot.lane.b32.xlu0 %v4802_v46, %s13819_s29  ;;  %12528 = vmatmul.mubr.msk.f32.vlgmr.msra.gmra.mrb[48].mxu1 %vm5263_vm4, %v5254_v53 }
 0x493   : > { %12535 = vmatprep.subr.mxu1 %v13823_v9  ;;  %12537 = vmatprep.mubr.msk.f32.mxu1 %vm13822_vm1, %v13823_v9 }
 0x495   : > { %v5172_v57 = vpop.f32.mrb[48].mxu0 }
 0x496   : > { %5736 = vrot.lane.b32.xlu1 %v5172_v57, %s13819_s29  ;;  %v5174_v55 = vpop.f32.mrb[49].mxu0  ;;  %12541 = vmatpush3.msk.msra.mxu0 %vm5267_vm3, %v5172_v57 }
 0x497   : > { %12543 = vmatmul.mubr.msk.f32.vlgmr.msra.gmra.mrb[56].mxu0 %vm5263_vm4, %v5257_v49  ;;  %12550 = vmatprep.subr.mxu0 %v13823_v9 }
 0x498   : > { %12551 = vmatpush3.msk.msra.mxu0 %vm5267_vm3, %v4730_v40  ;;  %v5098_v59 = vpop.f32.mrb[42].mxu1  ;;  %12552 = vmatprep.mubr.msk.f32.mxu0 %vm13822_vm1, %v13823_v9 }
 0x499   : > { %v5100_v62 = vpop.f32.mrb[43].mxu1  ;;  %12536 = vmatpush3.msk.msra.mxu1 %vm5267_vm3, %v5098_v59  ;;  %5657 = vrot.lane.b32.xlu0 %v5098_v59, %s13819_s29 }
 0x49a   : > { %5499 = vrot.lane.b32.xlu1 %v4950_v27, %s13819_s29  ;;  %12560 = vmatprep.subr.mxu0 %v13823_v9 }
 0x49b   : > { %12538 = vmatmul.mubr.msk.f32.vlgmr.msra.gmra.mrb[50].mxu1 %vm5263_vm4, %v5256_v60  ;;  %12553 = vmatmul.mubr.msk.f32.vlgmr.msra.gmra.mrb[58].mxu0 %vm5263_vm4, %v11615_v61 }
 0x49c   : > { %12561 = vmatpush3.msk.msra.mxu0 %vm5267_vm3, %v4878_v44  ;;  %12562 = vmatprep.mubr.msk.f32.mxu0 %vm13822_vm1, %v13823_v9 }
 0x49d   : > { %12570 = vmatprep.subr.mxu0 %v13823_v9  ;;  %12545 = vmatprep.subr.mxu1 %v13823_v9 }
 0x49e   : > { %12547 = vmatprep.mubr.msk.f32.mxu1 %vm13822_vm1, %v13823_v9 }
 0x49f   : > { %12563 = vmatmul.mubr.msk.f32.vlgmr.msra.gmra.mrb[60].mxu0 %vm5263_vm4, %v11617_v63 }
 0x4a0   : > { %12571 = vmatpush3.msk.msra.mxu0 %vm5267_vm3, %v5026_v52  ;;  %v5246_v56 = vpop.f32.mrb[44].mxu1  ;;  %12572 = vmatprep.mubr.msk.f32.mxu0 %vm13822_vm1, %v13823_v9 }
 0x4a1   : > { %v5248_v2 = vpop.f32.mrb[45].mxu1  ;;  %12546 = vmatpush3.msk.msra.mxu1 %vm5267_vm3, %v5246_v56  ;;  %5815 = vrot.lane.b32.xlu1 %v5246_v56, %s13819_s29 }
 0x4a2   : > { %12580 = vmatprep.subr.mxu0 %v13823_v9  ;;  %12548 = vmatmul.mubr.msk.f32.vlgmr.msra.gmra.mrb[52].mxu1 %vm5263_vm4, %v5258_v39 }
 0x4a3   : > { %12555 = vmatprep.subr.mxu1 %v13823_v9  ;;  %12573 = vmatmul.mubr.msk.f32.vlgmr.msra.gmra.mrb[62].mxu0 %vm5263_vm4, %v11619_v58 }
 0x4a4   : > { %12581 = vmatpush3.msk.msra.mxu0 %vm5267_vm3, %v5174_v55  ;;  %12556 = vmatpush3.msk.msra.mxu1 %vm5267_vm3, %v4804_v47 }
 0x4a5   : > { %12557 = vmatprep.mubr.msk.f32.mxu1 %vm13822_vm1, %v13823_v9  ;;  %12565 = vmatprep.subr.mxu1 %v13823_v9 }
 0x4a6   : > { %12582 = vmatprep.mubr.msk.f32.mxu0 %vm13822_vm1, %v13823_v9  ;;  %12558 = vmatmul.mubr.msk.f32.vlgmr.msra.gmra.mrb[54].mxu1 %vm5263_vm4, %v11616_v3 }
 0x4a7   : > { %12566 = vmatpush3.msk.msra.mxu1 %vm5267_vm3, %v4952_v54  ;;  %12583 = vmatmul.mubr.msk.f32.vlgmr.msra.gmra.mrb[64].mxu0 %vm5263_vm4, %v11621_v4 }
 0x4a8   : > { %12567 = vmatprep.mubr.msk.f32.mxu1 %vm13822_vm1, %v13823_v9  ;;  %12575 = vmatprep.subr.mxu1 %v13823_v9 }
 0x4a9   : > { %12590 = vmatprep.subr.mxu0 %v13823_v9  ;;  %12592 = vmatprep.mubr.msk.f32.mxu0 %vm13822_vm1, %v13823_v9 }
 0x4aa   : > { %12568 = vmatmul.mubr.msk.f32.vlgmr.msra.gmra.mrb[56].mxu1 %vm5263_vm4, %v11618_v5  ;;  %v6542_v5 = vld [vmem:[%s15639_s4 + $0x4] sm:$0x7] }
 0x4ab   : > { %12576 = vmatpush3.msk.msra.mxu1 %vm5267_vm3, %v5100_v62  ;;  %12577 = vmatprep.mubr.msk.f32.mxu1 %vm13822_vm1, %v13823_v9  ;;  %v6545_v62 = vld [vmem:[%s15639_s4 + $0x10] sm:$0x7] }
 0x4ac   : > { %12585 = vmatprep.subr.mxu1 %v13823_v9 }
 0x4ae   : > { %12578 = vmatmul.mubr.msk.f32.vlgmr.msra.gmra.mrb[58].mxu1 %vm5263_vm4, %v11620_v6 }
 0x4af   : > { %12586 = vmatpush3.msk.msra.mxu1 %vm5267_vm3, %v5248_v2  ;;  %12587 = vmatprep.mubr.msk.f32.mxu1 %vm13822_vm1, %v13823_v9 }
 0x4b0   : > { %12595 = vmatprep.subr.mxu1 %v13823_v9 }
 0x4b2   : > { %12588 = vmatmul.mubr.msk.f32.vlgmr.msra.gmra.mrb[60].mxu1 %vm5263_vm4, %v11622_v7 }
 0x4b3   : > { %12597 = vmatprep.mubr.msk.f32.mxu1 %vm13822_vm1, %v13823_v9 }
 0x4f0   : > { %v5261_v22 = vpop.permute.xlu0 %5260 }
 0x4f8   : > { %v5421_v30 = vpop.permute.xlu1 %5420 }
 0x500   : > { %v5579_v31 = vpop.permute.xlu0 %5578 }
 0x504   : > { %v5342_v44 = vpop.permute.xlu0 %5341 }
 0x508   : > { %v5737_v36 = vpop.permute.xlu1 %5736 }
 0x50b   : > { %v5658_v6 = vpop.permute.xlu0 %5657 }
 0x50c   : > { %v5500_v55 = vpop.permute.xlu1 %5499 }
 0x552   : > { %v5336_v10 = vpop.f32.mrb[50].mxu0 }
 0x553   : > { %v12514_v11 = vpop.f32.mrb[51].mxu0  ;;  %v5337_v23 = vadd.f32 %v5336_v10, %v5261_v22  ;;  %v6547_v10 = vld [vmem:[%s15639_s4 + $0x18] sm:$0x7] }
 0x55a   : > { %v5494_v12 = vpop.f32.mrb[52].mxu0 }
 0x55b   : > { %v12524_v41 = vpop.f32.mrb[53].mxu0  ;;  %v5495_v32 = vadd.f32 %v5494_v12, %v5421_v30 }
 0x55d   : > { %v5415_v0 = vpop.f32.mrb[46].mxu1 }
 0x55e   : > { %v12519_v1 = vpop.f32.mrb[47].mxu1  ;;  %v5416_v50 = vadd.f32 %v5415_v0, %v5342_v44  ;;  %v8360_v44 = vld [vmem:[#allocation5 + $0x8] sm:$0xff] }
 0x562   : > { %v5652_v13 = vpop.f32.mrb[54].mxu0 }
 0x563   : > { %v12534_v16 = vpop.f32.mrb[55].mxu0  ;;  %v5653_v37 = vadd.f32 %v5652_v13, %v5579_v31  ;;  %v11660_v31 = vld [vmem:[%s15639_s4 + $0x30] sm:$0x7] }
 0x564   : > { %v5816_v16 = vpop.permute.xlu1 %5815 }
 0x565   : > { %v5573_v18 = vpop.f32.mrb[48].mxu1 }
 0x566   : > { %v12529_v19 = vpop.f32.mrb[49].mxu1  ;;  %v5574_v63 = vadd.f32 %v5573_v18, %v5500_v55  ;;  %v6544_v18 = vld [vmem:[%s15639_s4 + $0xc] sm:$0x7] }
 0x567   : > { %v11656_v19 = vld [vmem:[%s15639_s4 + $0x20] sm:$0x7] }
 0x56a   : > { %v5810_v20 = vpop.f32.mrb[56].mxu0 }
 0x56b   : > { %v12544_v21 = vpop.f32.mrb[57].mxu0  ;;  %v5811_v52 = vadd.f32 %v5810_v20, %v5737_v36  ;;  %v11684_v36 = vld [vmem:[%s15639_s4 + $0x50] sm:$0x7] }
 0x56e   : > { %v5731_v17 = vpop.f32.mrb[50].mxu1  ;;  %v5974_v14 = vpop.f32.mrb[58].mxu0 }
 0x56f   : > { %v6510_v24 = vadd.f32 %v5974_v14, %v5337_v23  ;;  %v12554_v25 = vpop.f32.mrb[59].mxu0  ;;  %v12539_v26 = vpop.f32.mrb[51].mxu1  ;;  %v5732_v11 = vadd.f32 %v5731_v17, %v5658_v6  ;;  %v8376_v6 = vld [vmem:[#allocation5 + $0x88] sm:$0xff] }
 0x570   : > { %v11658_v25 = vld [vmem:[%s15639_s4 + $0x28] sm:$0x7] }
 0x571   : > { %v6525_v33 = vadd.f32 %v14927_v15, %v6510_v24  ;;  %v6546_v24 = vld [vmem:[%s15639_s4 + $0x14] sm:$0x7] }
 0x572   : > { %v6126_v51 = vpop.f32.mrb[60].mxu0 }
 0x573   : > { %v14930_v28 = vmax.f32 %v6525_v33, 0.0  ;;  %v6512_v29 = vadd.f32 %v6126_v51, %v5495_v32  ;;  %v12564_v34 = vpop.f32.mrb[61].mxu0  ;;  %v11657_v32 = vld [vmem:[%s15639_s4 + $0x24] sm:$0x7]  ;;  %v11662_v33 = vld [vmem:[%s15639_s4 + $0x38] sm:$0x7] }
 0x574   : > { %v11659_v51 = vld [vmem:[%s15639_s4 + $0x2c] sm:$0x7]  ;;  %v11682_v34 = vld [vmem:[%s15639_s4 + $0x48] sm:$0x7] }
 0x575   : > { %v6527_v38 = vadd.f32 %v14927_v15, %v6512_v29  ;;  %12591 = vmatpush3.msk.msra.mxu0 %vm5267_vm3, %v14930_v28  ;;  %v5889_v40 = vpop.f32.mrb[52].mxu1  ;;  %v11680_v29 = vld [vmem:[%s15639_s4 + $0x40] sm:$0x7] }
 0x576   : > { %v6278_v42 = vpop.f32.mrb[62].mxu0  ;;  %12593 = vmatmul.mubr.msk.f32.vlgmr.msra.gmra.mrb[66].mxu0 %vm5263_vm4, %v6541_v35  ;;  %12600 = vmatprep.subr.mxu0 %v13823_v9  ;;  %v12549_v43 = vpop.f32.mrb[53].mxu1  ;;  %v5890_v20 = vadd.f32 %v5889_v40, %v5816_v16  ;;  %v11663_v35 = vld [vmem:[%s15639_s4 + $0x3c] sm:$0x7]  ;;  %v11683_v40 = vld [vmem:[%s15639_s4 + $0x4c] sm:$0x7] }
 0x577   : > { %v14940_v45 = vmax.f32 %v6527_v38, 0.0  ;;  %v6514_v46 = vadd.f32 %v6278_v42, %v5653_v37  ;;  %v12574_v47 = vpop.f32.mrb[63].mxu0  ;;  %12602 = vmatprep.mubr.msk.f32.mxu0 %vm13822_vm1, %v13823_v9  ;;  %v11681_v37 = vld [vmem:[%s15639_s4 + $0x44] sm:$0x7]  ;;  %v11686_v38 = vld [vmem:[%s15639_s4 + $0x58] sm:$0x7] }
 0x578   : > { %v11685_v42 = vld [vmem:[%s15639_s4 + $0x54] sm:$0x7]  ;;  %v11687_v43 = vld [vmem:[%s15639_s4 + $0x5c] sm:$0x7] }
 0x579   : > { %v6529_v53 = vadd.f32 %v14927_v15, %v6514_v46  ;;  %12601 = vmatpush3.msk.msra.mxu0 %vm5267_vm3, %v14940_v45  ;;  %v6050_v27 = vpop.f32.mrb[54].mxu1  ;;  %v8359_v46 = vld [vmem:[#allocation5] sm:$0xff]  ;;  %v8382_v16 = vld [vmem:[#allocation5 + $0xb8] sm:$0xff] }
 0x57a   : > { %v6511_v54 = vadd.f32 %v6050_v27, %v5416_v50  ;;  %v6430_v49 = vpop.f32.mrb[64].mxu0  ;;  %12603 = vmatmul.mubr.msk.f32.vlgmr.msra.gmra.mrb[68].mxu0 %vm5263_vm4, %v6543_v48  ;;  %12610 = vmatprep.subr.mxu0 %v13823_v9  ;;  %v12559_v57 = vpop.f32.mrb[55].mxu1  ;;  %v8362_v48 = vld [vmem:[#allocation5 + $0x18] sm:$0xff]  ;;  %v8361_v50 = vld [vmem:[#allocation5 + $0x10] sm:$0xff] }
 0x57b   : > { %v14952_v59 = vmax.f32 %v6529_v53, 0.0  ;;  %v6516_v60 = vadd.f32 %v6430_v49, %v5811_v52  ;;  %v12584_v61 = vpop.f32.mrb[65].mxu0  ;;  %12612 = vmatprep.mubr.msk.f32.mxu0 %vm13822_vm1, %v13823_v9  ;;  %v8364_v52 = vld [vmem:[#allocation5 + $0x28] sm:$0xff]  ;;  %v13211_v53 = vpack.c.bf16 %v8362_v48, %v8359_v46  ;;  %v8369_v49 = vld [vmem:[#allocation5 + $0x50] sm:$0xff] }
 0x57c   : > { %v6526_v39 = vadd.f32 %v14927_v15, %v6511_v54  ;;  %v13226_v27 = vpack.c.bf16 %v8364_v52, %v8361_v50  ;;  %v8366_v54 = vld [vmem:[#allocation5 + $0x38] sm:$0xff]  ;;  %v8365_v57 = vld [vmem:[#allocation5 + $0x30] sm:$0xff]  ;;  %v8383_v52 = vld [vmem:[#allocation5 + $0xc0] sm:$0xff] }
 0x57d   : > { %v6531_v56 = vadd.f32 %v14927_v15, %v6516_v60  ;;  %12611 = vmatpush3.msk.msra.mxu0 %vm5267_vm3, %v14952_v59  ;;  %v6202_v58 = vpop.f32.mrb[56].mxu1  ;;  %v13213_v55 = vpack.c.bf16 %v8369_v49, %v8366_v54  ;;  %v8367_v60 = vld [vmem:[#allocation5 + $0x40] sm:$0xff]  ;;  %v8370_v61 = vld [vmem:[#allocation5 + $0x58] sm:$0xff]  ;;  %v8385_v49 = vld [vmem:[#allocation5 + $0xd0] sm:$0xff] }
 0x57e   : > { %v14963_v2 = vmax.f32 %v6526_v39, 0.0  ;;  %v6513_v3 = vadd.f32 %v6202_v58, %v5574_v63  ;;  %12613 = vmatmul.mubr.msk.f32.vlgmr.msra.gmra.mrb[70].mxu0 %vm5263_vm4, %v6545_v62  ;;  %12620 = vmatprep.subr.mxu0 %v13823_v9  ;;  %v12569_v4 = vpop.f32.mrb[57].mxu1  ;;  %v13229_v63 = vpack.c.bf16 %v8370_v61, %v8367_v60  ;;  %v8372_v39 = vld [vmem:[#allocation5 + $0x68] sm:$0xff]  ;;  %v8386_v54 = vld [vmem:[#allocation5 + $0xd8] sm:$0xff] }
 0x57f   : > { %v14970_v7 = vmax.f32 %v6531_v56, 0.0  ;;  %12622 = vmatprep.mubr.msk.f32.mxu0 %vm13822_vm1, %v13823_v9  ;;  %v8375_v56 = vld [vmem:[#allocation5 + $0x80] sm:$0xff]  ;;  %v8373_v4 = vld [vmem:[#allocation5 + $0x70] sm:$0xff] }
 0x580   : > { %v6528_v12 = vadd.f32 %v14927_v15, %v6513_v3  ;;  %12596 = vmatpush3.msk.msra.mxu1 %vm5267_vm3, %v14963_v2  ;;  %v13217_v58 = vpack.c.bf16 %v8375_v56, %v8372_v39  ;;  %v8374_v3 = vld [vmem:[#allocation5 + $0x78] sm:$0xff]  ;;  %v13239_v39 = vpack.c.bf16 %v8386_v54, %v8383_v52 }
 0x581   : > { %12621 = vmatpush3.msk.msra.mxu0 %vm5267_vm3, %v14970_v7  ;;  %v6354_v41 = vpop.f32.mrb[58].mxu1  ;;  %12598 = vmatmul.mubr.msk.f32.vlgmr.msra.gmra.mrb[62].mxu1 %vm5263_vm4, %v6542_v5 }
 0x582   : > { %v14983_v0 = vmax.f32 %v6528_v12, 0.0  ;;  %v6515_v1 = vadd.f32 %v6354_v41, %v5732_v11  ;;  %12623 = vmatmul.mubr.msk.f32.vlgmr.msra.gmra.mrb[72].mxu0 %vm5263_vm4, %v6547_v10  ;;  %12630 = vmatprep.subr.mxu0 %v13823_v9  ;;  %v12579_v13 = vpop.f32.mrb[59].mxu1  ;;  %v8378_v10 = vld [vmem:[#allocation5 + $0x98] sm:$0xff]  ;;  %v8381_v11 = vld [vmem:[#allocation5 + $0xb0] sm:$0xff] }
 0x583   : > { %12631 = vmatpush3.msk.msra.mxu0 %vm5267_vm3, %v14930_v28  ;;  %12605 = vmatprep.subr.mxu1 %v13823_v9  ;;  %v13221_v12 = vpack.c.bf16 %v8381_v11, %v8378_v10  ;;  %v8377_v41 = vld [vmem:[#allocation5 + $0x90] sm:$0xff]  ;;  %v8396_v10 = vld [vmem:[#allocation5 + $0x128] sm:$0xff]  ;;  %v8399_v11 = vld [vmem:[#allocation5 + $0x140] sm:$0xff] }
 0x584   : > { %v6530_v21 = vadd.f32 %v14927_v15, %v6515_v1  ;;  %12606 = vmatpush3.msk.msra.mxu1 %vm5267_vm3, %v14983_v0  ;;  %12607 = vmatprep.mubr.msk.f32.mxu1 %vm13822_vm1, %v13823_v9  ;;  %v8379_v1 = vld [vmem:[#allocation5 + $0xa0] sm:$0xff] }
 0x585   : > { %12632 = vmatprep.mubr.msk.f32.mxu0 %vm13822_vm1, %v13823_v9  ;;  %12640 = vmatprep.subr.mxu0 %v13823_v9  ;;  %v6506_v22 = vpop.f32.mrb[60].mxu1 }
 0x586   : > { %v15004_v23 = vmax.f32 %v6530_v21, 0.0  ;;  %v6517_v17 = vadd.f32 %v6506_v22, %v5890_v20  ;;  %12608 = vmatmul.mubr.msk.f32.vlgmr.msra.gmra.mrb[64].mxu1 %vm5263_vm4, %v6544_v18  ;;  %12633 = vmatmul.mubr.msk.f32.vlgmr.msra.gmra.mrb[74].mxu0 %vm5263_vm4, %v11656_v19  ;;  %v12589_v14 = vpop.f32.mrb[61].mxu1  ;;  %v13235_v18 = vpack.c.bf16 %v8382_v16, %v8379_v1  ;;  %v8384_v19 = vld [vmem:[#allocation5 + $0xc8] sm:$0xff]  ;;  %v8387_v20 = vld [vmem:[#allocation5 + $0xe0] sm:$0xff] }
 0x587   : > { %12641 = vmatpush3.msk.msra.mxu0 %vm5267_vm3, %v14940_v45  ;;  %12615 = vmatprep.subr.mxu1 %v13823_v9  ;;  %v13237_v21 = vpack.c.bf16 %v8387_v20, %v8384_v19 }
 0x588   : > { %v6532_v26 = vadd.f32 %v14927_v15, %v6517_v17  ;;  %12616 = vmatpush3.msk.msra.mxu1 %vm5267_vm3, %v15004_v23  ;;  %12617 = vmatprep.mubr.msk.f32.mxu1 %vm13822_vm1, %v13823_v9  ;;  %v6548_v15 = vld [vmem:[%s15639_s4 + $0x1c] sm:$0x7] }
 0x589   : > { %12642 = vmatprep.mubr.msk.f32.mxu0 %vm13822_vm1, %v13823_v9  ;;  %12650 = vmatprep.subr.mxu0 %v13823_v9 }
 0x58a   : > { %v15025_v30 = vmax.f32 %v6532_v26, 0.0  ;;  %12618 = vmatmul.mubr.msk.f32.vlgmr.msra.gmra.mrb[66].mxu1 %vm5263_vm4, %v6546_v24  ;;  %12643 = vmatmul.mubr.msk.f32.vlgmr.msra.gmra.mrb[76].mxu0 %vm5263_vm4, %v11658_v25 }
 0x58b   : > { %12651 = vmatpush3.msk.msra.mxu0 %vm5267_vm3, %v14952_v59  ;;  %12625 = vmatprep.subr.mxu1 %v13823_v9 }
 0x58c   : > { %12626 = vmatpush3.msk.msra.mxu1 %vm5267_vm3, %v15025_v30  ;;  %12627 = vmatprep.mubr.msk.f32.mxu1 %vm13822_vm1, %v13823_v9 }
 0x58d   : > { %12652 = vmatprep.mubr.msk.f32.mxu0 %vm13822_vm1, %v13823_v9  ;;  %12660 = vmatprep.subr.mxu0 %v13823_v9 }
 0x58e   : > { %12628 = vmatmul.mubr.msk.f32.vlgmr.msra.gmra.mrb[68].mxu1 %vm5263_vm4, %v6548_v15  ;;  %12635 = vmatprep.subr.mxu1 %v13823_v9 }
 0x58f   : > { %12653 = vmatmul.mubr.msk.f32.vlgmr.msra.gmra.mrb[78].mxu0 %vm5263_vm4, %v11660_v31  ;;  %12636 = vmatpush3.msk.msra.mxu1 %vm5267_vm3, %v14963_v2 }
 0x590   : > { %12661 = vmatpush3.msk.msra.mxu0 %vm5267_vm3, %v14970_v7  ;;  %12637 = vmatprep.mubr.msk.f32.mxu1 %vm13822_vm1, %v13823_v9 }
 0x591   : > { %12645 = vmatprep.subr.mxu1 %v13823_v9  ;;  %12662 = vmatprep.mubr.msk.f32.mxu0 %vm13822_vm1, %v13823_v9 }
 0x592   : > { %12670 = vmatprep.subr.mxu0 %v13823_v9  ;;  %12638 = vmatmul.mubr.msk.f32.vlgmr.msra.gmra.mrb[70].mxu1 %vm5263_vm4, %v11657_v32 }
 0x593   : > { %12646 = vmatpush3.msk.msra.mxu1 %vm5267_vm3, %v14983_v0  ;;  %12663 = vmatmul.mubr.msk.f32.vlgmr.msra.gmra.mrb[80].mxu0 %vm5263_vm4, %v11662_v33 }
 0x594   : > { %12671 = vmatpush3.msk.msra.mxu0 %vm5267_vm3, %v14930_v28  ;;  %12647 = vmatprep.mubr.msk.f32.mxu1 %vm13822_vm1, %v13823_v9  ;;  %v11661_v28 = vld [vmem:[%s15639_s4 + $0x34] sm:$0x7] }
 0x595   : > { %12655 = vmatprep.subr.mxu1 %v13823_v9  ;;  %12672 = vmatprep.mubr.msk.f32.mxu0 %vm13822_vm1, %v13823_v9 }
 0x596   : > { %12680 = vmatprep.subr.mxu0 %v13823_v9  ;;  %12648 = vmatmul.mubr.msk.f32.vlgmr.msra.gmra.mrb[72].mxu1 %vm5263_vm4, %v11659_v51 }
 0x597   : > { %12656 = vmatpush3.msk.msra.mxu1 %vm5267_vm3, %v15004_v23  ;;  %12673 = vmatmul.mubr.msk.f32.vlgmr.msra.gmra.mrb[82].mxu0 %vm5263_vm4, %v11680_v29 }
 0x598   : > { %12681 = vmatpush3.msk.msra.mxu0 %vm5267_vm3, %v14940_v45  ;;  %12657 = vmatprep.mubr.msk.f32.mxu1 %vm13822_vm1, %v13823_v9  ;;  %v8363_v45 = vld [vmem:[#allocation5 + $0x20] sm:$0xff] }
 0x599   : > { %12665 = vmatprep.subr.mxu1 %v13823_v9  ;;  %12682 = vmatprep.mubr.msk.f32.mxu0 %vm13822_vm1, %v13823_v9  ;;  %v13209_v47 = vpack.c.bf16 %v8363_v45, %v8360_v44 }
 0x59a   : > { %12690 = vmatprep.subr.mxu0 %v13823_v9  ;;  %12658 = vmatmul.mubr.msk.f32.vlgmr.msra.gmra.mrb[74].mxu1 %vm5263_vm4, %v11661_v28 }
 0x59b   : > { %12666 = vmatpush3.msk.msra.mxu1 %vm5267_vm3, %v15025_v30  ;;  %12683 = vmatmul.mubr.msk.f32.vlgmr.msra.gmra.mrb[84].mxu0 %vm5263_vm4, %v11682_v34 }
 0x59c   : > { %12691 = vmatpush3.msk.msra.mxu0 %vm5267_vm3, %v14952_v59  ;;  %12667 = vmatprep.mubr.msk.f32.mxu1 %vm13822_vm1, %v13823_v9  ;;  %v8368_v59 = vld [vmem:[#allocation5 + $0x48] sm:$0xff] }
 0x59d   : > { %12675 = vmatprep.subr.mxu1 %v13823_v9  ;;  %12692 = vmatprep.mubr.msk.f32.mxu0 %vm13822_vm1, %v13823_v9  ;;  %v13215_v62 = vpack.c.bf16 %v8368_v59, %v8365_v57  ;;  %v8388_v57 = vld [vmem:[#allocation5 + $0xe8] sm:$0xff]  ;;  %v8393_v59 = vld [vmem:[#allocation5 + $0x110] sm:$0xff] }
 0x59e   : > { %12700 = vmatprep.subr.mxu0 %v13823_v9  ;;  %12668 = vmatmul.mubr.msk.f32.vlgmr.msra.gmra.mrb[76].mxu1 %vm5263_vm4, %v11663_v35  ;;  %v13254_v56 = vpack.c.bf16 %v8388_v57, %v8385_v49 }
 0x59f   : > { %12676 = vmatpush3.msk.msra.mxu1 %vm5267_vm3, %v14963_v2  ;;  %12693 = vmatmul.mubr.msk.f32.vlgmr.msra.gmra.mrb[86].mxu0 %vm5263_vm4, %v11684_v36  ;;  %v8371_v2 = vld [vmem:[#allocation5 + $0x60] sm:$0xff] }
 0x5a0   : > { %12701 = vmatpush3.msk.msra.mxu0 %vm5267_vm3, %v14970_v7  ;;  %12677 = vmatprep.mubr.msk.f32.mxu1 %vm13822_vm1, %v13823_v9  ;;  %v13219_v5 = vpack.c.bf16 %v8374_v3, %v8371_v2  ;;  %v13232_v7 = vpack.c.bf16 %v8376_v6, %v8373_v4  ;;  %v8391_v6 = vld [vmem:[#allocation5 + $0x100] sm:$0xff] }
 0x5a1   : > { %12685 = vmatprep.subr.mxu1 %v13823_v9  ;;  %12702 = vmatprep.mubr.msk.f32.mxu0 %vm13822_vm1, %v13823_v9 }
 0x5a2   : > { %12678 = vmatmul.mubr.msk.f32.vlgmr.msra.gmra.mrb[78].mxu1 %vm5263_vm4, %v11681_v37  ;;  %13210 = vmatprep.subr.bf16.mxu0 %v13209_v47 }
 0x5a3   : > { %12686 = vmatpush3.msk.msra.mxu1 %vm5267_vm3, %v14983_v0  ;;  %12703 = vmatmul.mubr.msk.f32.vlgmr.msra.gmra.mrb[88].mxu0 %vm5263_vm4, %v11686_v38  ;;  %v8380_v0 = vld [vmem:[#allocation5 + $0xa8] sm:$0xff] }
 0x5a4   : > { %12687 = vmatprep.mubr.msk.f32.mxu1 %vm13822_vm1, %v13823_v9  ;;  %12695 = vmatprep.subr.mxu1 %v13823_v9  ;;  %v13223_v13 = vpack.c.bf16 %v8380_v0, %v8377_v41 }
 0x5a5   : > { %8619 = vmatprep.mubr.f32.mxu0 %v13823_v9  ;;  %13212 = vmatpush1.bf16.msra.mxu0 %v13211_v53 }
 0x5a6   : > { %12688 = vmatmul.mubr.msk.f32.vlgmr.msra.gmra.mrb[80].mxu1 %vm5263_vm4, %v11683_v40  ;;  %13214 = vmatprep.subr.bf16.mxu0 %v13213_v55  ;;  %v8390_v55 = vld [vmem:[#allocation5 + $0xf8] sm:$0xff] }
 0x5a7   : > { %12696 = vmatpush3.msk.msra.mxu1 %vm5267_vm3, %v15004_v23  ;;  %12697 = vmatprep.mubr.msk.f32.mxu1 %vm13822_vm1, %v13823_v9  ;;  %v13241_v4 = vpack.c.bf16 %v8393_v59, %v8390_v55  ;;  %v8407_v55 = vld [vmem:[#allocation5 + $0x180] sm:$0xff] }
 0x5a8   : > { %12705 = vmatprep.subr.mxu1 %v13823_v9 }
 0x5a9   : > { %13216 = vmatpush1.bf16.msra.mxu0 %v13215_v62 }
 0x5aa   : > { %12698 = vmatmul.mubr.msk.f32.vlgmr.msra.gmra.mrb[82].mxu1 %vm5263_vm4, %v11685_v42  ;;  %13218 = vmatprep.subr.bf16.mxu0 %v13217_v58  ;;  %v8389_v58 = vld [vmem:[#allocation5 + $0xf0] sm:$0xff] }
 0x5ab   : > { %12706 = vmatpush3.msk.msra.mxu1 %vm5267_vm3, %v15025_v30  ;;  %12707 = vmatprep.mubr.msk.f32.mxu1 %vm13822_vm1, %v13823_v9 }
 0x5ac   : > { %13225 = vmatprep.subr.bf16.mxu1 %v13821_v8 }
 0x5ad   : > { %13220 = vmatpush1.bf16.msra.mxu0 %v13219_v5  ;;  %v8392_v5 = vld [vmem:[#allocation5 + $0x108] sm:$0xff] }
 0x5ae   : > { %12708 = vmatmul.mubr.msk.f32.vlgmr.msra.gmra.mrb[84].mxu1 %vm5263_vm4, %v11687_v43  ;;  %13222 = vmatprep.subr.bf16.mxu0 %v13221_v12 }
 0x5af   : > { %12726 = vmatprep.mubr.msk.f32.mxu1 %vm13822_vm1, %v13823_v9  ;;  %13227 = vmatpush3.bf16.msra.mxu1 %v13226_v27 }
 0x5b0   : > { %13228 = vmatprep.subr.bf16.mxu1 %v13821_v8 }
 0x5b1   : > { %13224 = vmatpush1.bf16.msra.mxu0 %v13223_v13  ;;  %v13243_v13 = vpack.c.bf16 %v8392_v5, %v8389_v58  ;;  %v8416_v5 = vld [vmem:[#allocation5 + $0x1c8] sm:$0xff] }
 0x5b2   : > { %13238 = vmatprep.subr.bf16.mxu0 %v13237_v21  ;;  %v13245_v21 = vpack.c.bf16 %v8399_v11, %v8396_v10  ;;  %v8420_v10 = vld [vmem:[#allocation5 + $0x1e8] sm:$0xff]  ;;  %v8423_v11 = vld [vmem:[#allocation5 + $0x200] sm:$0xff] }
 0x5b3   : > { %13230 = vmatpush3.bf16.msra.mxu1 %v13229_v63 }
 0x5b4   : > { %13231 = vmatprep.subr.bf16.mxu1 %v13821_v8 }
 0x5b7   : > { %13233 = vmatpush3.bf16.msra.mxu1 %v13232_v7  ;;  %v8394_v7 = vld [vmem:[#allocation5 + $0x118] sm:$0xff] }
 0x5b8   : > { %13234 = vmatprep.subr.bf16.mxu1 %v13821_v8  ;;  %v13257_v16 = vpack.c.bf16 %v8394_v7, %v8391_v6  ;;  %v8415_v6 = vld [vmem:[#allocation5 + $0x1c0] sm:$0xff]  ;;  %v8418_v7 = vld [vmem:[#allocation5 + $0x1d8] sm:$0xff] }
 0x5bb   : > { %13236 = vmatpush3.bf16.msra.mxu1 %v13235_v18  ;;  %v8395_v18 = vld [vmem:[#allocation5 + $0x120] sm:$0xff] }
 0x5bc   : > { %13253 = vmatprep.subr.bf16.mxu1 %v13821_v8 }
 0x649   : > { %v6621_v22 = vpop.f32.mrb[66].mxu0 }
 0x64a   : > { %v12594_v23 = vpop.f32.mrb[67].mxu0 }
 0x64b   : > { %v8397_v23 = vld [vmem:[#allocation5 + $0x130] sm:$0xff] }
 0x64d   : > { %v15171_v17 = vpop.f32.mrb[68].mxu0 }
 0x64e   : > { %v12604_v14 = vpop.f32.mrb[69].mxu0 }
 0x64f   : > { %v8402_v14 = vld [vmem:[#allocation5 + $0x158] sm:$0xff] }
 0x651   : > { %v15173_v24 = vpop.f32.mrb[70].mxu0 }
 0x652   : > { %v12614_v25 = vpop.f32.mrb[71].mxu0 }
 0x654   : > { %v15175_v26 = vpop.f32.mrb[62].mxu1 }
 0x655   : > { %v15177_v30 = vpop.f32.mrb[72].mxu0  ;;  %v12599_v15 = vpop.f32.mrb[63].mxu1 }
 0x656   : > { %v12624_v31 = vpop.f32.mrb[73].mxu0 }
 0x659   : > { %v7235_v32 = vpop.f32.mrb[74].mxu0  ;;  %v15179_v33 = vpop.f32.mrb[64].mxu1 }
 0x65a   : > { %v8343_v51 = vmax.f32 %v6621_v22, %v7235_v32  ;;  %v12634_v29 = vpop.f32.mrb[75].mxu0  ;;  %v12609_v28 = vpop.f32.mrb[65].mxu1  ;;  %v8398_v22 = vld [vmem:[#allocation5 + $0x138] sm:$0xff] }
 0x65b   : > { %v8401_v28 = vld [vmem:[#allocation5 + $0x150] sm:$0xff] }
 0x65d   : > { %v7381_v34 = vpop.f32.mrb[76].mxu0  ;;  %v15181_v35 = vpop.f32.mrb[66].mxu1 }
 0x65e   : > { %v8345_v36 = vmax.f32 %v15171_v17, %v7381_v34  ;;  %v12644_v37 = vpop.f32.mrb[77].mxu0  ;;  %v12619_v38 = vpop.f32.mrb[67].mxu1  ;;  %v8400_v17 = vld [vmem:[#allocation5 + $0x148] sm:$0xff] }
 0x65f   : > { %v13260_v29 = vpack.c.bf16 %v8400_v17, %v8397_v23  ;;  %v8404_v38 = vld [vmem:[#allocation5 + $0x168] sm:$0xff]  ;;  %v8429_v23 = vld [vmem:[#allocation5 + $0x230] sm:$0xff] }
 0x660   : > { %v13251_v49 = vpack.c.bf16 %v8404_v38, %v8401_v28  ;;  %v8432_v28 = vld [vmem:[#allocation5 + $0x248] sm:$0xff] }
 0x661   : > { %v15184_v40 = vpop.f32.mrb[68].mxu1 }
 0x662   : > { %v15186_v42 = vpop.f32.mrb[78].mxu0  ;;  %v12629_v43 = vpop.f32.mrb[69].mxu1 }
 0x663   : > { %v8347_v44 = vmax.f32 %v15173_v24, %v15186_v42  ;;  %v12654_v45 = vpop.f32.mrb[79].mxu0  ;;  %v8405_v24 = vld [vmem:[#allocation5 + $0x170] sm:$0xff]  ;;  %v8403_v42 = vld [vmem:[#allocation5 + $0x160] sm:$0xff]  ;;  %v8406_v43 = vld [vmem:[#allocation5 + $0x178] sm:$0xff] }
 0x664   : > { %v13249_v37 = vpack.c.bf16 %v8405_v24, %v8402_v14  ;;  %v8408_v45 = vld [vmem:[#allocation5 + $0x188] sm:$0xff]  ;;  %v13263_v57 = vpack.c.bf16 %v8406_v43, %v8403_v42  ;;  %v8425_v14 = vld [vmem:[#allocation5 + $0x210] sm:$0xff] }
 0x665   : > { %v15190_v46 = vpop.f32.mrb[70].mxu1  ;;  %v8433_v42 = vld [vmem:[#allocation5 + $0x250] sm:$0xff]  ;;  %v8436_v43 = vld [vmem:[#allocation5 + $0x268] sm:$0xff] }
 0x666   : > { %v8344_v47 = vmax.f32 %v15175_v26, %v15190_v46  ;;  %v15194_v48 = vpop.f32.mrb[80].mxu0  ;;  %v12639_v50 = vpop.f32.mrb[71].mxu1  ;;  %v8414_v26 = vld [vmem:[#allocation5 + $0x1b8] sm:$0xff]  ;;  %v8417_v46 = vld [vmem:[#allocation5 + $0x1d0] sm:$0xff] }
 0x667   : > { %v8349_v53 = vmax.f32 %v15177_v30, %v15194_v48  ;;  %v12664_v27 = vpop.f32.mrb[81].mxu0  ;;  %v8411_v50 = vld [vmem:[#allocation5 + $0x1a0] sm:$0xff] }
 0x669   : > { %v15198_v60 = vpop.f32.mrb[72].mxu1 }
 0x66a   : > { %v8346_v61 = vmax.f32 %v15179_v33, %v15198_v60  ;;  %v7828_v62 = vpop.f32.mrb[82].mxu0  ;;  %v12649_v63 = vpop.f32.mrb[73].mxu1 }
 0x66b   : > { %v8351_v2 = vmax.f32 %v8343_v51, %v7828_v62  ;;  %v12674_v3 = vpop.f32.mrb[83].mxu0  ;;  %v13247_v51 = vpack.c.bf16 %v8398_v22, %v8395_v18  ;;  %v13265_v62 = vpack.c.bf16 %v8411_v50, %v8408_v45  ;;  %v8410_v63 = vld [vmem:[#allocation5 + $0x198] sm:$0xff]  ;;  %v8441_v50 = vld [vmem:[#allocation5 + $0x290] sm:$0xff] }
 0x66c   : > { %v13267_v48 = vpack.c.bf16 %v8410_v63, %v8407_v55  ;;  %v8413_v3 = vld [vmem:[#allocation5 + $0x1b0] sm:$0xff]  ;;  %v8422_v18 = vld [vmem:[#allocation5 + $0x1f8] sm:$0xff]  ;;  %v8447_v63 = vld [vmem:[#allocation5 + $0x2c0] sm:$0xff] }
 0x66d   : > { %11704 = vmatmul.mubr.msk.f32.vlgmr.msra.gmra.mrb[90].mxu0 %vm8551_vm5, %v8351_v2  ;;  %12727 = vmatmul.mubr.msk.f32.vlgmr.msra.gmra.mrb[86].mxu1 %vm8551_vm5, %v8351_v2  ;;  %v15204_v12 = vpop.f32.mrb[74].mxu1  ;;  %v8426_v22 = vld [vmem:[#allocation5 + $0x218] sm:$0xff] }
 0x66e   : > { %13240 = vmatpush1.bf16.msra.mxu0 %v13239_v39  ;;  %13255 = vmatpush3.bf16.msra.mxu1 %v13254_v56  ;;  %v8348_v41 = vmax.f32 %v15181_v35, %v15204_v12  ;;  %v7974_v0 = vpop.f32.mrb[84].mxu0  ;;  %v12659_v1 = vpop.f32.mrb[75].mxu1  ;;  %v8409_v39 = vld [vmem:[#allocation5 + $0x190] sm:$0xff]  ;;  %v8412_v56 = vld [vmem:[#allocation5 + $0x1a8] sm:$0xff]  ;;  %v8438_v45 = vld [vmem:[#allocation5 + $0x278] sm:$0xff] }
 0x66f   : > { %v15208_v19 = vmax.f32 %v8345_v36, %v7974_v0  ;;  %13242 = vmatprep.subr.bf16.mxu0 %v13241_v4  ;;  %13256 = vmatprep.subr.bf16.mxu1 %v13821_v8  ;;  %v12684_v20 = vpop.f32.mrb[85].mxu0  ;;  %v13269_v4 = vpack.c.bf16 %v8417_v46, %v8414_v26  ;;  %v13271_v0 = vpack.c.bf16 %v8416_v5, %v8413_v3  ;;  %v8442_v55 = vld [vmem:[#allocation5 + $0x298] sm:$0xff] }
 0x670   : > { %8763 = vmatprep.mubr.f32.mxu0 %v13823_v9  ;;  %12745 = vmatprep.mubr.msk.f32.mxu1 %vm13822_vm1, %v13823_v9  ;;  %v13285_v1 = vpack.c.bf16 %v8418_v7, %v8415_v6  ;;  %v8421_v20 = vld [vmem:[#allocation5 + $0x1f0] sm:$0xff]  ;;  %v8446_v46 = vld [vmem:[#allocation5 + $0x2b8] sm:$0xff]  ;;  %v8452_v6 = vld [vmem:[#allocation5 + $0x2e8] sm:$0xff] }
 0x671   : > { %v15214_v25 = vpop.f32.mrb[76].mxu1  ;;  %v8451_v7 = vld [vmem:[#allocation5 + $0x2e0] sm:$0xff] }
 0x672   : > { %13244 = vmatpush1.bf16.msra.mxu0 %v13243_v13  ;;  %13258 = vmatpush3.bf16.msra.mxu1 %v13257_v16  ;;  %v8350_v15 = vmax.f32 %v15184_v40, %v15214_v25  ;;  %v8120_v31 = vpop.f32.mrb[86].mxu0  ;;  %v12669_v32 = vpop.f32.mrb[77].mxu1  ;;  %v8419_v13 = vld [vmem:[#allocation5 + $0x1e0] sm:$0xff]  ;;  %v13273_v16 = vpack.c.bf16 %v8423_v11, %v8420_v10  ;;  %v8454_v10 = vld [vmem:[#allocation5 + $0x2f8] sm:$0xff]  ;;  %v8456_v11 = vld [vmem:[#allocation5 + $0x308] sm:$0xff] }
 0x673   : > { %v15218_v34 = vmax.f32 %v8347_v44, %v8120_v31  ;;  %13246 = vmatprep.subr.bf16.mxu0 %v13245_v21  ;;  %13259 = vmatprep.subr.bf16.mxu1 %v13821_v8  ;;  %v12694_v36 = vpop.f32.mrb[87].mxu0  ;;  %v8424_v21 = vld [vmem:[#allocation5 + $0x208] sm:$0xff]  ;;  %v13277_v31 = vpack.c.bf16 %v8429_v23, %v8426_v22  ;;  %v8431_v40 = vld [vmem:[#allocation5 + $0x240] sm:$0xff]  ;;  %v8465_v22 = vld [vmem:[#allocation5 + $0x350] sm:$0xff] }
 0x674   : > { %v13288_v17 = vpack.c.bf16 %v8424_v21, %v8421_v20  ;;  %v8428_v32 = vld [vmem:[#allocation5 + $0x228] sm:$0xff]  ;;  %v8435_v36 = vld [vmem:[#allocation5 + $0x260] sm:$0xff]  ;;  %v8462_v21 = vld [vmem:[#allocation5 + $0x338] sm:$0xff] }
 0x675   : > { %v7901_v52 = vpop.f32.mrb[78].mxu1  ;;  %v13293_v25 = vpack.c.bf16 %v8435_v36, %v8432_v28  ;;  %v8460_v20 = vld [vmem:[#allocation5 + $0x328] sm:$0xff]  ;;  %v8467_v36 = vld [vmem:[#allocation5 + $0x360] sm:$0xff] }
 0x676   : > { %13248 = vmatpush1.bf16.msra.mxu0 %v13247_v51  ;;  %13261 = vmatpush3.bf16.msra.mxu1 %v13260_v29  ;;  %v8352_v27 = vmax.f32 %v8344_v47, %v7901_v52  ;;  %v8266_v54 = vpop.f32.mrb[88].mxu0  ;;  %v12679_v44 = vpop.f32.mrb[79].mxu1  ;;  %v8427_v51 = vld [vmem:[#allocation5 + $0x220] sm:$0xff]  ;;  %v8430_v29 = vld [vmem:[#allocation5 + $0x238] sm:$0xff] }
 0x677   : > { %v15227_v59 = vmax.f32 %v8349_v53, %v8266_v54  ;;  %13250 = vmatprep.subr.bf16.mxu0 %v13249_v37  ;;  %13262 = vmatprep.subr.bf16.mxu1 %v13821_v8  ;;  %v12704_v58 = vpop.f32.mrb[89].mxu0  ;;  %v13282_v53 = vpack.c.bf16 %v8412_v56, %v8409_v39  ;;  %v13279_v37 = vpack.c.bf16 %v8428_v32, %v8425_v14  ;;  %v8437_v54 = vld [vmem:[#allocation5 + $0x270] sm:$0xff]  ;;  %v8464_v14 = vld [vmem:[#allocation5 + $0x348] sm:$0xff] }
 0x678   : > { %v13291_v38 = vpack.c.bf16 %v8430_v29, %v8427_v51  ;;  %v13297_v44 = vpack.c.bf16 %v8441_v50, %v8438_v45  ;;  %v8443_v58 = vld [vmem:[#allocation5 + $0x2a0] sm:$0xff]  ;;  %v8468_v32 = vld [vmem:[#allocation5 + $0x368] sm:$0xff]  ;;  %v8473_v45 = vld [vmem:[#allocation5 + $0x390] sm:$0xff] }
 0x679   : > { %v8047_v47 = vpop.f32.mrb[80].mxu1  ;;  %v8471_v51 = vld [vmem:[#allocation5 + $0x380] sm:$0xff] }
 0x67a   : > { %13252 = vmatpush1.bf16.msra.mxu0 %v13251_v49  ;;  %13264 = vmatpush3.bf16.msra.mxu1 %v13263_v57  ;;  %v15233_v2 = vmax.f32 %v8346_v61, %v8047_v47  ;;  %v12689_v30 = vpop.f32.mrb[81].mxu1  ;;  %v8440_v49 = vld [vmem:[#allocation5 + $0x288] sm:$0xff]  ;;  %v8439_v57 = vld [vmem:[#allocation5 + $0x280] sm:$0xff]  ;;  %v8445_v47 = vld [vmem:[#allocation5 + $0x2b0] sm:$0xff] }
 0x67b   : > { %13266 = vmatprep.subr.bf16.mxu0 %v13265_v62  ;;  %13281 = vmatprep.subr.bf16.mxu1 %v13821_v8  ;;  %v8444_v62 = vld [vmem:[#allocation5 + $0x2a8] sm:$0xff]  ;;  %v13299_v39 = vpack.c.bf16 %v8440_v49, %v8437_v54  ;;  %v13313_v56 = vpack.c.bf16 %v8442_v55, %v8439_v57  ;;  %v8478_v54 = vld [vmem:[#allocation5 + $0x3b8] sm:$0xff]  ;;  %v8483_v49 = vld [vmem:[#allocation5 + $0x3e0] sm:$0xff] }
 0x67c   : > { %v13301_v26 = vpack.c.bf16 %v8447_v63, %v8444_v62  ;;  %v8448_v30 = vld [vmem:[#allocation5 + $0x2c8] sm:$0xff]  ;;  %v8479_v62 = vld [vmem:[#allocation5 + $0x3c0] sm:$0xff] }
 0x67d   : > { %11706 = vmatmul.mubr.msk.f32.vlgmr.msra.gmra.mrb[92].mxu0 %vm8551_vm5, %v8352_v27  ;;  %12746 = vmatmul.mubr.msk.f32.vlgmr.msra.gmra.mrb[88].mxu1 %vm8551_vm5, %v8352_v27  ;;  %v8193_v33 = vpop.f32.mrb[82].mxu1  ;;  %v13310_v27 = vpack.c.bf16 %v8436_v43, %v8433_v42  ;;  %v13316_v3 = vpack.c.bf16 %v8448_v30, %v8445_v47  ;;  %v8477_v42 = vld [vmem:[#allocation5 + $0x3b0] sm:$0xff] }
 0x67e   : > { %13268 = vmatpush1.bf16.msra.mxu0 %v13267_v48  ;;  %13283 = vmatpush3.bf16.msra.mxu1 %v13282_v53  ;;  %v15241_v60 = vmax.f32 %v8348_v41, %v8193_v33  ;;  %v12699_v61 = vpop.f32.mrb[83].mxu1  ;;  %v13275_v41 = vpack.c.bf16 %v8422_v18, %v8419_v13  ;;  %v8450_v48 = vld [vmem:[#allocation5 + $0x2d8] sm:$0xff]  ;;  %v8453_v53 = vld [vmem:[#allocation5 + $0x2f0] sm:$0xff]  ;;  %v8459_v33 = vld [vmem:[#allocation5 + $0x320] sm:$0xff] }
 0x67f   : > { %13270 = vmatprep.subr.bf16.mxu0 %v13269_v4  ;;  %13284 = vmatprep.subr.bf16.mxu1 %v13821_v8  ;;  %v8449_v4 = vld [vmem:[#allocation5 + $0x2d0] sm:$0xff]  ;;  %v13305_v5 = vpack.c.bf16 %v8453_v53, %v8450_v48  ;;  %v13321_v13 = vpack.c.bf16 %v8459_v33, %v8456_v11  ;;  %v8491_v11 = vld [vmem:[#allocation5 + $0x420] sm:$0xff] }
 0x680   : > { %8907 = vmatprep.mubr.f32.mxu0 %v13823_v9  ;;  %12764 = vmatprep.mubr.msk.f32.mxu1 %vm13822_vm1, %v13823_v9  ;;  %v13307_v61 = vpack.c.bf16 %v8452_v6, %v8449_v4  ;;  %v8457_v18 = vld [vmem:[#allocation5 + $0x310] sm:$0xff]  ;;  %v8490_v4 = vld [vmem:[#allocation5 + $0x418] sm:$0xff]  ;;  %v8495_v6 = vld [vmem:[#allocation5 + $0x440] sm:$0xff] }
 0x681   : > { %v8339_v35 = vpop.f32.mrb[84].mxu1  ;;  %v8485_v48 = vld [vmem:[#allocation5 + $0x3f0] sm:$0xff] }
 0x682   : > { %13272 = vmatpush1.bf16.msra.mxu0 %v13271_v0  ;;  %13286 = vmatpush3.bf16.msra.mxu1 %v13285_v1  ;;  %v15250_v12 = vmax.f32 %v8350_v15, %v8339_v35  ;;  %v12709_v24 = vpop.f32.mrb[85].mxu1  ;;  %v8434_v15 = vld [vmem:[#allocation5 + $0x258] sm:$0xff]  ;;  %v13319_v0 = vpack.c.bf16 %v8454_v10, %v8451_v7  ;;  %v8455_v1 = vld [vmem:[#allocation5 + $0x300] sm:$0xff]  ;;  %v13338_v35 = vpack.c.bf16 %v8460_v20, %v8457_v18  ;;  %v8497_v20 = vld [vmem:[#allocation5 + $0x450] sm:$0xff] }
 0x683   : > { %13274 = vmatprep.subr.bf16.mxu0 %v13273_v16  ;;  %13287 = vmatprep.subr.bf16.mxu1 %v13821_v8  ;;  %v13295_v52 = vpack.c.bf16 %v8434_v15, %v8431_v40  ;;  %v8458_v16 = vld [vmem:[#allocation5 + $0x318] sm:$0xff]  ;;  %v8463_v24 = vld [vmem:[#allocation5 + $0x340] sm:$0xff]  ;;  %v8469_v40 = vld [vmem:[#allocation5 + $0x370] sm:$0xff] }
 0x684   : > { %v13323_v23 = vpack.c.bf16 %v8458_v16, %v8455_v1  ;;  %v8474_v15 = vld [vmem:[#allocation5 + $0x398] sm:$0xff]  ;;  %v8496_v1 = vld [vmem:[#allocation5 + $0x448] sm:$0xff]  ;;  %v8501_v16 = vld [vmem:[#allocation5 + $0x470] sm:$0xff] }
 0x685   : > { %v13333_v50 = vpack.c.bf16 %v8477_v42, %v8474_v15  ;;  %v8512_v42 = vld [vmem:[#allocation5 + $0x4c8] sm:$0xff] }
 0x686   : > { %13276 = vmatpush1.bf16.msra.mxu0 %v13275_v41  ;;  %13289 = vmatpush3.bf16.msra.mxu1 %v13288_v17  ;;  %v8461_v41 = vld [vmem:[#allocation5 + $0x330] sm:$0xff]  ;;  %v13325_v17 = vpack.c.bf16 %v8465_v22, %v8462_v21  ;;  %v8500_v22 = vld [vmem:[#allocation5 + $0x468] sm:$0xff] }
 0x687   : > { %13278 = vmatprep.subr.bf16.mxu0 %v13277_v31  ;;  %13290 = vmatprep.subr.bf16.mxu1 %v13821_v8  ;;  %v8466_v31 = vld [vmem:[#allocation5 + $0x358] sm:$0xff]  ;;  %v13327_v29 = vpack.c.bf16 %v8464_v14, %v8461_v41  ;;  %v8504_v41 = vld [vmem:[#allocation5 + $0x488] sm:$0xff]  ;;  %v13363_v14 = vpack.c.bf16 %v8500_v22, %v8497_v20  ;;  %v8543_v20 = vld [vmem:[#allocation5 + $0x5c0] sm:$0xff] }
 0x688   : > { %v13341_v28 = vpack.c.bf16 %v8466_v31, %v8463_v24  ;;  %v8503_v31 = vld [vmem:[#allocation5 + $0x480] sm:$0xff] }
 0x68a   : > { %13280 = vmatpush1.bf16.msra.mxu0 %v13279_v37  ;;  %13292 = vmatpush3.bf16.msra.mxu1 %v13291_v38  ;;  %v13329_v37 = vpack.c.bf16 %v8471_v51, %v8468_v32  ;;  %v8470_v38 = vld [vmem:[#allocation5 + $0x378] sm:$0xff] }
 0x68b   : > { %13294 = vmatprep.subr.bf16.mxu0 %v13293_v25  ;;  %13309 = vmatprep.subr.bf16.mxu1 %v13821_v8  ;;  %v8472_v25 = vld [vmem:[#allocation5 + $0x388] sm:$0xff]  ;;  %v8506_v51 = vld [vmem:[#allocation5 + $0x498] sm:$0xff] }
 0x68c   : > { %v13344_v43 = vpack.c.bf16 %v8472_v25, %v8469_v40  ;;  %v8509_v25 = vld [vmem:[#allocation5 + $0x4b0] sm:$0xff] }
 0x68d   : > { %11708 = vmatmul.mubr.msk.f32.vlgmr.msra.gmra.mrb[94].mxu0 %vm8551_vm5, %v15208_v19  ;;  %12765 = vmatmul.mubr.msk.f32.vlgmr.msra.gmra.mrb[90].mxu1 %vm8551_vm5, %v15208_v19  ;;  %v13303_v19 = vpack.c.bf16 %v8446_v46, %v8443_v58  ;;  %v8484_v58 = vld [vmem:[#allocation5 + $0x3e8] sm:$0xff]  ;;  %v8489_v46 = vld [vmem:[#allocation5 + $0x410] sm:$0xff] }
 0x68e   : > { %13296 = vmatpush1.bf16.msra.mxu0 %v13295_v52  ;;  %13311 = vmatpush3.bf16.msra.mxu1 %v13310_v27  ;;  %v8476_v52 = vld [vmem:[#allocation5 + $0x3a8] sm:$0xff]  ;;  %v8475_v27 = vld [vmem:[#allocation5 + $0x3a0] sm:$0xff] }
 0x68f   : > { %13298 = vmatprep.subr.bf16.mxu0 %v13297_v44  ;;  %13312 = vmatprep.subr.bf16.mxu1 %v13821_v8  ;;  %v8480_v44 = vld [vmem:[#allocation5 + $0x3c8] sm:$0xff]  ;;  %v13335_v57 = vpack.c.bf16 %v8476_v52, %v8473_v45  ;;  %v13347_v55 = vpack.c.bf16 %v8478_v54, %v8475_v27  ;;  %v13383_v52 = vpack.c.bf16 %v8512_v42, %v8509_v25  ;;  %v8515_v54 = vld [vmem:[#allocation5 + $0x4e0] sm:$0xff] }
 0x690   : > { %9051 = vmatprep.mubr.f32.mxu0 %v13823_v9  ;;  %12783 = vmatprep.mubr.msk.f32.mxu1 %vm13822_vm1, %v13823_v9  ;;  %v13349_v63 = vpack.c.bf16 %v8483_v49, %v8480_v44  ;;  %v8516_v45 = vld [vmem:[#allocation5 + $0x4e8] sm:$0xff]  ;;  %v8518_v49 = vld [vmem:[#allocation5 + $0x4f8] sm:$0xff]  ;;  %v9704_v25 = vld [vmem:[%s15640_s5] sm:$0x7] }
 0x692   : > { %13300 = vmatpush1.bf16.msra.mxu0 %v13299_v39  ;;  %13314 = vmatpush3.bf16.msra.mxu1 %v13313_v56  ;;  %v8482_v39 = vld [vmem:[#allocation5 + $0x3d8] sm:$0xff]  ;;  %v8481_v56 = vld [vmem:[#allocation5 + $0x3d0] sm:$0xff] }
 0x693   : > { %13302 = vmatprep.subr.bf16.mxu0 %v13301_v26  ;;  %13315 = vmatprep.subr.bf16.mxu1 %v13821_v8  ;;  %v8486_v26 = vld [vmem:[#allocation5 + $0x3f8] sm:$0xff]  ;;  %v13351_v47 = vpack.c.bf16 %v8482_v39, %v8479_v62  ;;  %v13366_v30 = vpack.c.bf16 %v8484_v58, %v8481_v56  ;;  %v8521_v56 = vld [vmem:[#allocation5 + $0x510] sm:$0xff] }
 0x694   : > { %v13353_v53 = vpack.c.bf16 %v8489_v46, %v8486_v26  ;;  %v8522_v62 = vld [vmem:[#allocation5 + $0x518] sm:$0xff]  ;;  %v8524_v26 = vld [vmem:[#allocation5 + $0x528] sm:$0xff]  ;;  %v8523_v46 = vld [vmem:[#allocation5 + $0x520] sm:$0xff] }
 0x696   : > { %13304 = vmatpush1.bf16.msra.mxu0 %v13303_v19  ;;  %13317 = vmatpush3.bf16.msra.mxu1 %v13316_v3  ;;  %v8488_v19 = vld [vmem:[#allocation5 + $0x408] sm:$0xff]  ;;  %v8487_v3 = vld [vmem:[#allocation5 + $0x400] sm:$0xff] }
 0x697   : > { %13306 = vmatprep.subr.bf16.mxu0 %v13305_v5  ;;  %13318 = vmatprep.subr.bf16.mxu1 %v13821_v8  ;;  %v8492_v5 = vld [vmem:[#allocation5 + $0x428] sm:$0xff]  ;;  %v13355_v7 = vpack.c.bf16 %v8488_v19, %v8485_v48  ;;  %v13369_v10 = vpack.c.bf16 %v8490_v4, %v8487_v3  ;;  %v8531_v48 = vld [vmem:[#allocation5 + $0x560] sm:$0xff] }
 0x698   : > { %v13357_v33 = vpack.c.bf16 %v8495_v6, %v8492_v5  ;;  %v8527_v3 = vld [vmem:[#allocation5 + $0x540] sm:$0xff]  ;;  %v8530_v5 = vld [vmem:[#allocation5 + $0x558] sm:$0xff]  ;;  %v8529_v6 = vld [vmem:[#allocation5 + $0x550] sm:$0xff] }
 0x69a   : > { %13308 = vmatpush1.bf16.msra.mxu0 %v13307_v61  ;;  %13320 = vmatpush3.bf16.msra.mxu1 %v13319_v0  ;;  %v8494_v61 = vld [vmem:[#allocation5 + $0x438] sm:$0xff]  ;;  %v8493_v0 = vld [vmem:[#allocation5 + $0x430] sm:$0xff] }
 0x69b   : > { %13322 = vmatprep.subr.bf16.mxu0 %v13321_v13  ;;  %13337 = vmatprep.subr.bf16.mxu1 %v13821_v8  ;;  %v8498_v13 = vld [vmem:[#allocation5 + $0x458] sm:$0xff]  ;;  %v13372_v18 = vpack.c.bf16 %v8496_v1, %v8493_v0  ;;  %v8533_v0 = vld [vmem:[#allocation5 + $0x570] sm:$0xff] }
 0x69c   : > { %v13361_v21 = vpack.c.bf16 %v8501_v16, %v8498_v13  ;;  %v8536_v13 = vld [vmem:[#allocation5 + $0x588] sm:$0xff]  ;;  %v8535_v16 = vld [vmem:[#allocation5 + $0x580] sm:$0xff] }
 0x69d   : > { %11710 = vmatmul.mubr.msk.f32.vlgmr.msra.gmra.mrb[96].mxu0 %vm8551_vm5, %v15233_v2  ;;  %12784 = vmatmul.mubr.msk.f32.vlgmr.msra.gmra.mrb[92].mxu1 %vm8551_vm5, %v15233_v2  ;;  %v13331_v2 = vpack.c.bf16 %v8470_v38, %v8467_v36  ;;  %v8510_v36 = vld [vmem:[#allocation5 + $0x4b8] sm:$0xff]  ;;  %v13379_v38 = vpack.c.bf16 %v8506_v51, %v8503_v31  ;;  %v8549_v31 = vld [vmem:[#allocation5 + $0x5f0] sm:$0xff] }
 0x69e   : > { %13324 = vmatpush1.bf16.msra.mxu0 %v13323_v23  ;;  %13339 = vmatpush3.bf16.msra.mxu1 %v13338_v35  ;;  %v8499_v23 = vld [vmem:[#allocation5 + $0x460] sm:$0xff]  ;;  %v8502_v35 = vld [vmem:[#allocation5 + $0x478] sm:$0xff]  ;;  %v8545_v51 = vld [vmem:[#allocation5 + $0x5d0] sm:$0xff] }
 0x69f   : > { %13326 = vmatprep.subr.bf16.mxu0 %v13325_v17  ;;  %13340 = vmatprep.subr.bf16.mxu1 %v13821_v8  ;;  %v8507_v17 = vld [vmem:[#allocation5 + $0x4a0] sm:$0xff]  ;;  %v13375_v24 = vpack.c.bf16 %v8502_v35, %v8499_v23 }
 0x6a0   : > { %9195 = vmatprep.mubr.f32.mxu0 %v13823_v9  ;;  %12802 = vmatprep.mubr.msk.f32.mxu1 %vm13822_vm1, %v13823_v9  ;;  %v13377_v32 = vpack.c.bf16 %v8507_v17, %v8504_v41  ;;  %v8539_v23 = vld [vmem:[#allocation5 + $0x5a0] sm:$0xff]  ;;  %v8542_v41 = vld [vmem:[#allocation5 + $0x5b8] sm:$0xff]  ;;  %v8541_v17 = vld [vmem:[#allocation5 + $0x5b0] sm:$0xff] }
 0x6a2   : > { %13328 = vmatpush1.bf16.msra.mxu0 %v13327_v29  ;;  %13342 = vmatpush3.bf16.msra.mxu1 %v13341_v28  ;;  %v8505_v29 = vld [vmem:[#allocation5 + $0x490] sm:$0xff]  ;;  %v8508_v28 = vld [vmem:[#allocation5 + $0x4a8] sm:$0xff] }
 0x6a3   : > { %13330 = vmatprep.subr.bf16.mxu0 %v13329_v37  ;;  %13343 = vmatprep.subr.bf16.mxu1 %v13821_v8  ;;  %v8513_v37 = vld [vmem:[#allocation5 + $0x4d0] sm:$0xff]  ;;  %v13394_v40 = vpack.c.bf16 %v8508_v28, %v8505_v29  ;;  %v8548_v28 = vld [vmem:[#allocation5 + $0x5e8] sm:$0xff] }
 0x6a4   : > { %v13381_v15 = vpack.c.bf16 %v8513_v37, %v8510_v36  ;;  %v8547_v36 = vld [vmem:[#allocation5 + $0x5e0] sm:$0xff]  ;;  %v8550_v37 = vld [vmem:[#allocation5 + $0x5f8] sm:$0xff] }
 0x6a6   : > { %13332 = vmatpush1.bf16.msra.mxu0 %v13331_v2  ;;  %13345 = vmatpush3.bf16.msra.mxu1 %v13344_v43  ;;  %v8511_v2 = vld [vmem:[#allocation5 + $0x4c0] sm:$0xff]  ;;  %v8514_v43 = vld [vmem:[#allocation5 + $0x4d8] sm:$0xff] }
 0x6a7   : > { %13334 = vmatprep.subr.bf16.mxu0 %v13333_v50  ;;  %13346 = vmatprep.subr.bf16.mxu1 %v13821_v8  ;;  %v8519_v50 = vld [vmem:[#allocation5 + $0x500] sm:$0xff]  ;;  %v13397_v27 = vpack.c.bf16 %v8514_v43, %v8511_v2 }
 0x6a8   : > { %v13385_v44 = vpack.c.bf16 %v8519_v50, %v8516_v45 }
 0x6aa   : > { %13336 = vmatpush1.bf16.msra.mxu0 %v13335_v57  ;;  %13348 = vmatpush3.bf16.msra.mxu1 %v13347_v55  ;;  %v8517_v57 = vld [vmem:[#allocation5 + $0x4f0] sm:$0xff]  ;;  %v8520_v55 = vld [vmem:[#allocation5 + $0x508] sm:$0xff] }
 0x6ab   : > { %13350 = vmatprep.subr.bf16.mxu0 %v13349_v63  ;;  %13365 = vmatprep.subr.bf16.mxu1 %v13821_v8  ;;  %v8525_v63 = vld [vmem:[#allocation5 + $0x530] sm:$0xff]  ;;  %v13400_v39 = vpack.c.bf16 %v8520_v55, %v8517_v57 }
 0x6ac   : > { %v13389_v58 = vpack.c.bf16 %v8525_v63, %v8522_v62  ;;  %v9707_v62 = vld [vmem:[%s15640_s5 + $0xc] sm:$0x7] }
 0x6ad   : > { %11712 = vmatmul.mubr.msk.f32.vlgmr.msra.gmra.mrb[98].mxu0 %vm8551_vm5, %v15218_v34  ;;  %12803 = vmatmul.mubr.msk.f32.vlgmr.msra.gmra.mrb[94].mxu1 %vm8551_vm5, %v15218_v34  ;;  %v13359_v34 = vpack.c.bf16 %v8494_v61, %v8491_v11  ;;  %v8537_v11 = vld [vmem:[#allocation5 + $0x590] sm:$0xff] }
 0x6ae   : > { %13352 = vmatpush1.bf16.msra.mxu0 %v13351_v47  ;;  %13367 = vmatpush3.bf16.msra.mxu1 %v13366_v30  ;;  %v8526_v47 = vld [vmem:[#allocation5 + $0x538] sm:$0xff]  ;;  %v8528_v30 = vld [vmem:[#allocation5 + $0x548] sm:$0xff] }
 0x6af   : > { %13354 = vmatprep.subr.bf16.mxu0 %v13353_v53  ;;  %13368 = vmatprep.subr.bf16.mxu1 %v13821_v8  ;;  %v13391_v53 = vpack.c.bf16 %v8524_v26, %v8521_v56  ;;  %v13403_v19 = vpack.c.bf16 %v8526_v47, %v8523_v46  ;;  %v13405_v4 = vpack.c.bf16 %v8531_v48, %v8528_v30  ;;  %v9709_v48 = vld [vmem:[%s15640_s5 + $0x14] sm:$0x7] }
 0x6b0   : > { %9339 = vmatprep.mubr.f32.mxu0 %v13823_v9  ;;  %12821 = vmatprep.mubr.msk.f32.mxu1 %vm13822_vm1, %v13823_v9 }
 0x6b2   : > { %13356 = vmatpush1.bf16.msra.mxu0 %v13355_v7  ;;  %13370 = vmatpush3.bf16.msra.mxu1 %v13369_v10  ;;  %v8532_v7 = vld [vmem:[#allocation5 + $0x568] sm:$0xff]  ;;  %v8534_v10 = vld [vmem:[#allocation5 + $0x578] sm:$0xff] }
 0x6b3   : > { %13358 = vmatprep.subr.bf16.mxu0 %v13357_v33  ;;  %13371 = vmatprep.subr.bf16.mxu1 %v13821_v8  ;;  %v13407_v33 = vpack.c.bf16 %v8530_v5, %v8527_v3  ;;  %v13422_v61 = vpack.c.bf16 %v8532_v7, %v8529_v6  ;;  %v13409_v1 = vpack.c.bf16 %v8537_v11, %v8534_v10  ;;  %v9710_v5 = vld [vmem:[%s15640_s5 + $0x18] sm:$0x7] }
 0x6b6   : > { %13360 = vmatpush1.bf16.msra.mxu0 %v13359_v34  ;;  %13373 = vmatpush3.bf16.msra.mxu1 %v13372_v18  ;;  %v8538_v34 = vld [vmem:[#allocation5 + $0x598] sm:$0xff]  ;;  %v8540_v18 = vld [vmem:[#allocation5 + $0x5a8] sm:$0xff] }
 0x6b7   : > { %13362 = vmatprep.subr.bf16.mxu0 %v13361_v21  ;;  %13374 = vmatprep.subr.bf16.mxu1 %v13821_v8  ;;  %v13411_v21 = vpack.c.bf16 %v8536_v13, %v8533_v0  ;;  %v13425_v22 = vpack.c.bf16 %v8538_v34, %v8535_v16  ;;  %v13413_v35 = vpack.c.bf16 %v8543_v20, %v8540_v18  ;;  %v11740_v0 = vld [vmem:[%s15640_s5 + $0x30] sm:$0x7]  ;;  %v11742_v34 = vld [vmem:[%s15640_s5 + $0x38] sm:$0x7] }
 0x6ba   : > { %13364 = vmatpush1.bf16.msra.mxu0 %v13363_v14  ;;  %13376 = vmatpush3.bf16.msra.mxu1 %v13375_v24  ;;  %v8544_v14 = vld [vmem:[#allocation5 + $0x5c8] sm:$0xff]  ;;  %v8546_v24 = vld [vmem:[#allocation5 + $0x5d8] sm:$0xff] }
 0x6bb   : > { %13378 = vmatprep.subr.bf16.mxu0 %v13377_v32  ;;  %13393 = vmatprep.subr.bf16.mxu1 %v13821_v8  ;;  %v13428_v32 = vpack.c.bf16 %v8544_v14, %v8541_v17  ;;  %v13417_v29 = vpack.c.bf16 %v8549_v31, %v8546_v24  ;;  %v11027_v17 = vld [vmem:[%s15647_s12 + $0x8] sm:$0xff]  ;;  %v11028_v24 = vld [vmem:[%s15647_s12 + $0x10] sm:$0xff] }
 0x6bd   : > { %11714 = vmatmul.mubr.msk.f32.vlgmr.msra.gmra.mrb[100].mxu0 %vm8551_vm5, %v15241_v60  ;;  %12822 = vmatmul.mubr.msk.f32.vlgmr.msra.gmra.mrb[96].mxu1 %vm8551_vm5, %v15241_v60  ;;  %v13387_v60 = vpack.c.bf16 %v8518_v49, %v8515_v54  ;;  %v9706_v54 = vld [vmem:[%s15640_s5 + $0x8] sm:$0x7] }
 0x6be   : > { %13380 = vmatpush1.bf16.msra.mxu0 %v13379_v38  ;;  %13395 = vmatpush3.bf16.msra.mxu1 %v13394_v40  ;;  %v13419_v38 = vpack.c.bf16 %v8548_v28, %v8545_v51  ;;  %v13431_v40 = vpack.c.bf16 %v8550_v37, %v8547_v36  ;;  %v11032_v28 = vld [vmem:[%s15647_s12 + $0x30] sm:$0xff]  ;;  %v11033_v36 = vld [vmem:[%s15647_s12 + $0x38] sm:$0xff] }
 0x6bf   : > { %13382 = vmatprep.subr.bf16.mxu0 %v13381_v15  ;;  %13396 = vmatprep.subr.bf16.mxu1 %v13821_v8 }
 0x6c0   : > { %9483 = vmatprep.mubr.f32.mxu0 %v13823_v9  ;;  %12840 = vmatprep.mubr.msk.f32.mxu1 %vm13822_vm1, %v13823_v9 }
 0x6c2   : > { %13384 = vmatpush1.bf16.msra.mxu0 %v13383_v52  ;;  %13398 = vmatpush3.bf16.msra.mxu1 %v13397_v27 }
 0x6c3   : > { %13386 = vmatprep.subr.bf16.mxu0 %v13385_v44  ;;  %13399 = vmatprep.subr.bf16.mxu1 %v13821_v8 }
 0x6c6   : > { %13388 = vmatpush1.bf16.msra.mxu0 %v13387_v60  ;;  %13401 = vmatpush3.bf16.msra.mxu1 %v13400_v39 }
 0x6c7   : > { %13390 = vmatprep.subr.bf16.mxu0 %v13389_v58  ;;  %13402 = vmatprep.subr.bf16.mxu1 %v13821_v8  ;;  %v9708_v58 = vld [vmem:[%s15640_s5 + $0x10] sm:$0x7] }
 0x6ca   : > { %13392 = vmatpush1.bf16.msra.mxu0 %v13391_v53  ;;  %13404 = vmatpush3.bf16.msra.mxu1 %v13403_v19 }
 0x6cb   : > { %13406 = vmatprep.subr.bf16.mxu0 %v13405_v4  ;;  %13421 = vmatprep.subr.bf16.mxu1 %v13821_v8 }
 0x6cd   : > { %11716 = vmatmul.mubr.msk.f32.vlgmr.msra.gmra.mrb[102].mxu0 %vm8551_vm5, %v15227_v59  ;;  %12841 = vmatmul.mubr.msk.f32.vlgmr.msra.gmra.mrb[98].mxu1 %vm8551_vm5, %v15227_v59  ;;  %v13415_v59 = vpack.c.bf16 %v8542_v41, %v8539_v23  ;;  %v11741_v23 = vld [vmem:[%s15640_s5 + $0x34] sm:$0x7]  ;;  %v11026_v41 = vld [vmem:[%s15647_s12] sm:$0xff] }
 0x6ce   : > { %13408 = vmatpush1.bf16.msra.mxu0 %v13407_v33  ;;  %13423 = vmatpush3.bf16.msra.mxu1 %v13422_v61  ;;  %v11736_v33 = vld [vmem:[%s15640_s5 + $0x20] sm:$0x7]  ;;  %v11738_v61 = vld [vmem:[%s15640_s5 + $0x28] sm:$0x7]  ;;  %v13434_v14 = vpack.c.bf16 %v11027_v17, %v11026_v41 }
 0x6cf   : > { %13410 = vmatprep.subr.bf16.mxu0 %v13409_v1  ;;  %13424 = vmatprep.subr.bf16.mxu1 %v13821_v8  ;;  %v9711_v1 = vld [vmem:[%s15640_s5 + $0x1c] sm:$0x7] }
 0x6d0   : > { %9627 = vmatprep.mubr.f32.mxu0 %v13823_v9  ;;  %12859 = vmatprep.mubr.msk.f32.mxu1 %vm13822_vm1, %v13823_v9 }
 0x6d2   : > { %13412 = vmatpush1.bf16.msra.mxu0 %v13411_v21  ;;  %13426 = vmatpush3.bf16.msra.mxu1 %v13425_v22  ;;  %v11737_v21 = vld [vmem:[%s15640_s5 + $0x24] sm:$0x7]  ;;  %v11739_v22 = vld [vmem:[%s15640_s5 + $0x2c] sm:$0x7] }
 0x6d3   : > { %13414 = vmatprep.subr.bf16.mxu0 %v13413_v35  ;;  %13427 = vmatprep.subr.bf16.mxu1 %v13821_v8  ;;  %v11743_v35 = vld [vmem:[%s15640_s5 + $0x3c] sm:$0x7] }
 0x6d6   : > { %13416 = vmatpush1.bf16.msra.mxu0 %v13415_v59  ;;  %13429 = vmatpush3.bf16.msra.mxu1 %v13428_v32  ;;  %v11030_v59 = vld [vmem:[%s15647_s12 + $0x20] sm:$0xff]  ;;  %v11031_v32 = vld [vmem:[%s15647_s12 + $0x28] sm:$0xff] }
 0x6d7   : > { %13418 = vmatprep.subr.bf16.mxu0 %v13417_v29  ;;  %13430 = vmatprep.subr.bf16.mxu1 %v13821_v8  ;;  %v13440_v51 = vpack.c.bf16 %v11031_v32, %v11030_v59 }
 0x6da   : > { %13420 = vmatpush1.bf16.msra.mxu0 %v13419_v38  ;;  %13432 = vmatpush3.bf16.msra.mxu1 %v13431_v40  ;;  %v13443_v40 = vpack.c.bf16 %v11033_v36, %v11032_v28 }
 0x6db   : > { %12862 = vmatprep.subr.mxu0 %v13823_v9  ;;  %12867 = vmatprep.subr.mxu1 %v13823_v9 }
 0x6dd   : > { %11718 = vmatmul.mubr.msk.f32.vlgmr.msra.gmra.mrb[104].mxu0 %vm8551_vm5, %v15250_v12  ;;  %12860 = vmatmul.mubr.msk.f32.vlgmr.msra.gmra.mrb[100].mxu1 %vm8551_vm5, %v15250_v12  ;;  %v9705_v12 = vld [vmem:[%s15640_s5 + $0x4] sm:$0x7] }
 0x6de   : > { %12864 = vmatprep.mubr.msk.f32.mxu0 %vm13822_vm1, %v13823_v9  ;;  %12869 = vmatprep.mubr.msk.f32.mxu1 %vm13822_vm1, %v13823_v9 }
 0x740   : > { %v8621_v15 = vpop.f32.mrb[90].mxu0  ;;  %v8692_v42 = vpop.f32.mrb[86].mxu1 }
 0x741   : > { %v15322_v2 = vpop.f32.mrb[91].mxu0  ;;  %v12728_v43 = vpop.f32.mrb[87].mxu1  ;;  %12863 = vmatpush3.msk.msra.mxu0 %vm9716_vm6, %v8621_v15  ;;  %v11035_v15 = vld [vmem:[%s15647_s12 + $0x48] sm:$0xff] }
 0x742   : > { %12865 = vmatmul.mubr.msk.f32.vlgmr.msra.gmra.mrb[106].mxu0 %vm9712_vm7, %v9704_v25  ;;  %12872 = vmatprep.subr.mxu0 %v13823_v9  ;;  %v11034_v25 = vld [vmem:[%s15647_s12 + $0x40] sm:$0xff]  ;;  %v11037_v43 = vld [vmem:[%s15647_s12 + $0x58] sm:$0xff] }
 0x743   : > { %12874 = vmatprep.mubr.msk.f32.mxu0 %vm13822_vm1, %v13823_v9 }
 0x750   : > { %v8765_v45 = vpop.f32.mrb[92].mxu0  ;;  %v15332_v50 = vpop.f32.mrb[88].mxu1 }
 0x751   : > { %v15334_v52 = vpop.f32.mrb[93].mxu0  ;;  %v12747_v27 = vpop.f32.mrb[89].mxu1  ;;  %12868 = vmatpush3.msk.msra.mxu1 %vm9716_vm6, %v8765_v45  ;;  %v11038_v45 = vld [vmem:[%s15647_s12 + $0x60] sm:$0xff] }
 0x752   : > { %12870 = vmatmul.mubr.msk.f32.vlgmr.msra.gmra.mrb[102].mxu1 %vm9712_vm7, %v9705_v12  ;;  %12877 = vmatprep.subr.mxu1 %v13823_v9 }
 0x753   : > { %12879 = vmatprep.mubr.msk.f32.mxu1 %vm13822_vm1, %v13823_v9 }
 0x760   : > { %v8909_v44 = vpop.f32.mrb[94].mxu0  ;;  %v8980_v49 = vpop.f32.mrb[90].mxu1 }
 0x761   : > { %v15344_v57 = vpop.f32.mrb[95].mxu0  ;;  %v12766_v55 = vpop.f32.mrb[91].mxu1  ;;  %12873 = vmatpush3.msk.msra.mxu0 %vm9716_vm6, %v8909_v44  ;;  %v11041_v44 = vld [vmem:[%s15647_s12 + $0x78] sm:$0xff] }
 0x762   : > { %12875 = vmatmul.mubr.msk.f32.vlgmr.msra.gmra.mrb[108].mxu0 %vm9712_vm7, %v9706_v54  ;;  %12882 = vmatprep.subr.mxu0 %v13823_v9  ;;  %v11040_v54 = vld [vmem:[%s15647_s12 + $0x70] sm:$0xff] }
 0x763   : > { %12884 = vmatprep.mubr.msk.f32.mxu0 %vm13822_vm1, %v13823_v9 }
 0x770   : > { %v9053_v63 = vpop.f32.mrb[96].mxu0  ;;  %v15354_v60 = vpop.f32.mrb[92].mxu1 }
 0x771   : > { %v15356_v39 = vpop.f32.mrb[97].mxu0  ;;  %v12785_v56 = vpop.f32.mrb[93].mxu1  ;;  %12878 = vmatpush3.msk.msra.mxu1 %vm9716_vm6, %v9053_v63 }
 0x772   : > { %12880 = vmatmul.mubr.msk.f32.vlgmr.msra.gmra.mrb[104].mxu1 %vm9712_vm7, %v9707_v62  ;;  %12887 = vmatprep.subr.mxu1 %v13823_v9 }
 0x773   : > { %12889 = vmatprep.mubr.msk.f32.mxu1 %vm13822_vm1, %v13823_v9 }
 0x780   : > { %v9197_v26 = vpop.f32.mrb[98].mxu0  ;;  %v9268_v46 = vpop.f32.mrb[94].mxu1 }
 0x781   : > { %v15366_v47 = vpop.f32.mrb[99].mxu0  ;;  %v12804_v30 = vpop.f32.mrb[95].mxu1  ;;  %12883 = vmatpush3.msk.msra.mxu0 %vm9716_vm6, %v9197_v26 }
 0x782   : > { %12885 = vmatmul.mubr.msk.f32.vlgmr.msra.gmra.mrb[110].mxu0 %vm9712_vm7, %v9708_v58  ;;  %12892 = vmatprep.subr.mxu0 %v13823_v9 }
 0x783   : > { %12894 = vmatprep.mubr.msk.f32.mxu0 %vm13822_vm1, %v13823_v9 }
 0x790   : > { %v9341_v53 = vpop.f32.mrb[100].mxu0  ;;  %v9412_v19 = vpop.f32.mrb[96].mxu1 }
 0x791   : > { %v15376_v3 = vpop.f32.mrb[101].mxu0  ;;  %v12823_v4 = vpop.f32.mrb[97].mxu1  ;;  %12888 = vmatpush3.msk.msra.mxu1 %vm9716_vm6, %v9341_v53 }
 0x792   : > { %12890 = vmatmul.mubr.msk.f32.vlgmr.msra.gmra.mrb[106].mxu1 %vm9712_vm7, %v9709_v48  ;;  %12897 = vmatprep.subr.mxu1 %v13823_v9 }
 0x793   : > { %12899 = vmatprep.mubr.msk.f32.mxu1 %vm13822_vm1, %v13823_v9 }
 0x7a0   : > { %v9485_v6 = vpop.f32.mrb[102].mxu0  ;;  %v9556_v7 = vpop.f32.mrb[98].mxu1 }
 0x7a1   : > { %v15386_v10 = vpop.f32.mrb[103].mxu0  ;;  %v12842_v11 = vpop.f32.mrb[99].mxu1  ;;  %12893 = vmatpush3.msk.msra.mxu0 %vm9716_vm6, %v9485_v6 }
 0x7a2   : > { %12895 = vmatmul.mubr.msk.f32.vlgmr.msra.gmra.mrb[112].mxu0 %vm9712_vm7, %v9710_v5  ;;  %12902 = vmatprep.subr.mxu0 %v13823_v9 }
 0x7a3   : > { %12903 = vmatpush3.msk.msra.mxu0 %vm9716_vm6, %v8692_v42  ;;  %12904 = vmatprep.mubr.msk.f32.mxu0 %vm13822_vm1, %v13823_v9  ;;  %v13446_v42 = vpack.c.bf16 %v11035_v15, %v11034_v25 }
 0x7a4   : > { %12912 = vmatprep.subr.mxu0 %v13823_v9 }
 0x7a6   : > { %12905 = vmatmul.mubr.msk.f32.vlgmr.msra.gmra.mrb[114].mxu0 %vm9712_vm7, %v11736_v33 }
 0x7a7   : > { %12913 = vmatpush3.msk.msra.mxu0 %vm9716_vm6, %v8980_v49  ;;  %12914 = vmatprep.mubr.msk.f32.mxu0 %vm13822_vm1, %v13823_v9  ;;  %v13455_v49 = vpack.c.bf16 %v11041_v44, %v11040_v54 }
 0x7a8   : > { %12922 = vmatprep.subr.mxu0 %v13823_v9 }
 0x7aa   : > { %12915 = vmatmul.mubr.msk.f32.vlgmr.msra.gmra.mrb[116].mxu0 %vm9712_vm7, %v11738_v61 }
 0x7ab   : > { %12923 = vmatpush3.msk.msra.mxu0 %vm9716_vm6, %v9268_v46  ;;  %12924 = vmatprep.mubr.msk.f32.mxu0 %vm13822_vm1, %v13823_v9 }
 0x7ac   : > { %12932 = vmatprep.subr.mxu0 %v13823_v9 }
 0x7ae   : > { %12925 = vmatmul.mubr.msk.f32.vlgmr.msra.gmra.mrb[118].mxu0 %vm9712_vm7, %v11740_v0 }
 0x7af   : > { %12933 = vmatpush3.msk.msra.mxu0 %vm9716_vm6, %v9556_v7  ;;  %12934 = vmatprep.mubr.msk.f32.mxu0 %vm13822_vm1, %v13823_v9 }
 0x7b0   : > { %v9629_v13 = vpop.f32.mrb[104].mxu0  ;;  %v9700_v16 = vpop.f32.mrb[100].mxu1  ;;  %13433 = vmatprep.subr.bf16.mxu0 %v13821_v8 }
 0x7b1   : > { %v15425_v18 = vpop.f32.mrb[105].mxu0  ;;  %v12861_v20 = vpop.f32.mrb[101].mxu1  ;;  %12898 = vmatpush3.msk.msra.mxu1 %vm9716_vm6, %v9629_v13 }
 0x7b2   : > { %12900 = vmatmul.mubr.msk.f32.vlgmr.msra.gmra.mrb[108].mxu1 %vm9712_vm7, %v9711_v1  ;;  %12907 = vmatprep.subr.mxu1 %v13823_v9 }
 0x7b3   : > { %12935 = vmatmul.mubr.msk.f32.vlgmr.msra.gmra.mrb[120].mxu0 %vm9712_vm7, %v11742_v34  ;;  %12908 = vmatpush3.msk.msra.mxu1 %vm9716_vm6, %v15332_v50  ;;  %v11039_v50 = vld [vmem:[%s15647_s12 + $0x68] sm:$0xff] }
 0x7b4   : > { %12909 = vmatprep.mubr.msk.f32.mxu1 %vm13822_vm1, %v13823_v9  ;;  %12917 = vmatprep.subr.mxu1 %v13823_v9  ;;  %v13452_v27 = vpack.c.bf16 %v11039_v50, %v11038_v45 }
 0x7b5   : > { %12974 = vmatprep.mubr.msk.f32.mxu0 %vm13822_vm1, %v13823_v9  ;;  %13435 = vmatpush3.bf16.msra.mxu0 %v13434_v14 }
 0x7b6   : > { %12910 = vmatmul.mubr.msk.f32.vlgmr.msra.gmra.mrb[110].mxu1 %vm9712_vm7, %v11737_v21  ;;  %13436 = vmatprep.subr.bf16.mxu0 %v13821_v8 }
 0x7b7   : > { %12918 = vmatpush3.msk.msra.mxu1 %vm9716_vm6, %v15354_v60  ;;  %12919 = vmatprep.mubr.msk.f32.mxu1 %vm13822_vm1, %v13823_v9 }
 0x7b8   : > { %12927 = vmatprep.subr.mxu1 %v13823_v9 }
 0x7ba   : > { %12920 = vmatmul.mubr.msk.f32.vlgmr.msra.gmra.mrb[112].mxu1 %vm9712_vm7, %v11739_v22 }
 0x7bb   : > { %12928 = vmatpush3.msk.msra.mxu1 %vm9716_vm6, %v9412_v19  ;;  %12929 = vmatprep.mubr.msk.f32.mxu1 %vm13822_vm1, %v13823_v9 }
 0x7bc   : > { %12937 = vmatprep.subr.mxu1 %v13823_v9 }
 0x7be   : > { %12930 = vmatmul.mubr.msk.f32.vlgmr.msra.gmra.mrb[114].mxu1 %vm9712_vm7, %v11741_v23 }
 0x7bf   : > { %12938 = vmatpush3.msk.msra.mxu1 %vm9716_vm6, %v9700_v16  ;;  %12939 = vmatprep.mubr.msk.f32.mxu1 %vm13822_vm1, %v13823_v9 }
 0x7c2   : > { %12940 = vmatmul.mubr.msk.f32.vlgmr.msra.gmra.mrb[116].mxu1 %vm9712_vm7, %v11743_v35 }
 0x7c3   : > { %11249 = vmatprep.mubr.f32.mxu1 %v13823_v9  ;;  %v11029_v9 = vld [vmem:[%s15647_s12 + $0x18] sm:$0xff] }
 0x7c4   : > { %v13437_v31 = vpack.c.bf16 %v11029_v9, %v11028_v24 }
 0x7c6   : > { %13438 = vmatpush3.bf16.msra.mxu0 %v13437_v31 }
 0x7c7   : > { %13439 = vmatprep.subr.bf16.mxu0 %v13821_v8 }
 0x7ca   : > { %13441 = vmatpush3.bf16.msra.mxu0 %v13440_v51 }
 0x7cb   : > { %13442 = vmatprep.subr.bf16.mxu0 %v13821_v8 }
 0x7ce   : > { %13444 = vmatpush3.bf16.msra.mxu0 %v13443_v40 }
 0x7cf   : > { %13445 = vmatprep.subr.bf16.mxu0 %v13821_v8 }
 0x7d2   : > { %13447 = vmatpush3.bf16.msra.mxu0 %v13446_v42 }
 0x7d3   : > { %13448 = vmatprep.subr.bf16.mxu0 %v13821_v8 }
 0x815   : > { %v9786_v29 = vpop.f32.mrb[106].mxu0 }
 0x816   : > { %v9787_v37 = vadd.f32 %v9786_v29, %v15322_v2  ;;  %v12866_v38 = vpop.f32.mrb[107].mxu0  ;;  %v11036_v2 = vld [vmem:[%s15647_s12 + $0x50] sm:$0xff] }
 0x817   : > { %v13449_v12 = vpack.c.bf16 %v11037_v43, %v11036_v2 }
 0x819   : > { %13450 = vmatpush3.bf16.msra.mxu0 %v13449_v12 }
 0x81a   : > { %13451 = vmatprep.subr.bf16.mxu0 %v13821_v8 }
 0x81d   : > { %13453 = vmatpush3.bf16.msra.mxu0 %v13452_v27 }
 0x81e   : > { %13454 = vmatprep.subr.bf16.mxu0 %v13821_v8 }
 0x821   : > { %13456 = vmatpush3.bf16.msra.mxu0 %v13455_v49 }
 0x825   : > { %v9862_v55 = vpop.f32.mrb[102].mxu1 }
 0x826   : > { %v9863_v62 = vadd.f32 %v9862_v55, %v15334_v52  ;;  %v12871_v63 = vpop.f32.mrb[103].mxu1 }
 0x835   : > { %v9938_v60 = vpop.f32.mrb[108].mxu0 }
 0x836   : > { %v9939_v56 = vadd.f32 %v9938_v60, %v15344_v57  ;;  %v12876_v58 = vpop.f32.mrb[109].mxu0  ;;  %v15532_v57 = vld [vmem:[%s15646_s11] ss:$0 sm:$0xff] }
 0x845   : > { %v10014_v26 = vpop.f32.mrb[104].mxu1 }
 0x846   : > { %v10015_v46 = vadd.f32 %v10014_v26, %v15356_v39  ;;  %v12881_v30 = vpop.f32.mrb[105].mxu1 }
 0x855   : > { %v10090_v48 = vpop.f32.mrb[110].mxu0 }
 0x856   : > { %v10091_v53 = vadd.f32 %v10090_v48, %v15366_v47  ;;  %v12886_v19 = vpop.f32.mrb[111].mxu0 }
 0x865   : > { %v10166_v4 = vpop.f32.mrb[106].mxu1 }
 0x866   : > { %v10167_v5 = vadd.f32 %v10166_v4, %v15376_v3  ;;  %v12891_v8 = vpop.f32.mrb[107].mxu1 }
 0x875   : > { %v10242_v6 = vpop.f32.mrb[112].mxu0 }
 0x876   : > { %v10243_v52 = vadd.f32 %v10242_v6, %v15386_v10  ;;  %v12896_v7 = vpop.f32.mrb[113].mxu0 }
 0x879   : > { %v10403_v11 = vpop.f32.mrb[114].mxu0 }
 0x87a   : > { %v10939_v39 = vadd.f32 %v10403_v11, %v9787_v37  ;;  %v12906_v33 = vpop.f32.mrb[115].mxu0 }
 0x87c   : > { %v10954_v61 = vadd.f32 %v15532_v57, %v10939_v39 }
 0x87d   : > { %v10555_v47 = vpop.f32.mrb[116].mxu0 }
 0x87e   : > { %v10941_v0 = vadd.f32 %v10555_v47, %v9939_v56  ;;  %v12916_v1 = vpop.f32.mrb[117].mxu0  ;;  %v10962_v13 = vmax.f32 %v10954_v61, 0.0 }
 0x880   : > { %v10956_v3 = vadd.f32 %v15532_v57, %v10941_v0  ;;  %v10970_v21 = vsel %vm9716_vm6, %v10962_v13, -inf }
 0x881   : > { %v10707_v16 = vpop.f32.mrb[118].mxu0  ;;  %v10971_v9 = vrot.slane %v10970_v21, 4 }
 0x882   : > { %v10964_v34 = vmax.f32 %v10956_v3, 0.0  ;;  %v10943_v10 = vadd.f32 %v10707_v16, %v10091_v53  ;;  %v12926_v20 = vpop.f32.mrb[119].mxu0 }
 0x883   : > { %v10972_v38 = vmax.f32 %v10970_v21, %v10971_v9 }
 0x884   : > { %v10984_v22 = vsel %vm9716_vm6, %v10964_v34, -inf  ;;  %v10958_v23 = vadd.f32 %v15532_v57, %v10943_v10 }
 0x885   : > { %v10318_v35 = vpop.f32.mrb[108].mxu1  ;;  %v10985_v31 = vrot.slane %v10984_v22, 4  ;;  %v10973_v50 = vrot.slane %v10972_v38, 2 }
 0x886   : > { %v10966_v41 = vmax.f32 %v10958_v23, 0.0  ;;  %v10319_v17 = vadd.f32 %v10318_v35, %v15425_v18  ;;  %v10859_v14 = vpop.f32.mrb[120].mxu0  ;;  %v12901_v24 = vpop.f32.mrb[109].mxu1 }
 0x887   : > { %v10945_v59 = vadd.f32 %v10859_v14, %v10243_v52  ;;  %v12936_v32 = vpop.f32.mrb[121].mxu0  ;;  %v10986_v40 = vmax.f32 %v10984_v22, %v10985_v31  ;;  %v10974_v26 = vmax.f32 %v10972_v38, %v10973_v50 }
 0x888   : > { %v10998_v51 = vsel %vm9716_vm6, %v10966_v41, -inf }
 0x889   : > { %v10960_v29 = vadd.f32 %v15532_v57, %v10945_v59  ;;  %v10479_v28 = vpop.f32.mrb[110].mxu1  ;;  %v10999_v15 = vrot.slane %v10998_v51, 4  ;;  %v10987_v27 = vrot.slane %v10986_v40, 2  ;;  %v10975_v33 = vrot.slane %v10974_v26, 1 }
 0x88a   : > { %v10940_v36 = vadd.f32 %v10479_v28, %v9863_v62  ;;  %v12911_v37 = vpop.f32.mrb[111].mxu1 }
 0x88b   : > { %v10968_v25 = vmax.f32 %v10960_v29, 0.0  ;;  %v11000_v54 = vmax.f32 %v10998_v51, %v10999_v15  ;;  %v10988_v30 = vmax.f32 %v10986_v40, %v10987_v27  ;;  %v10976_v21 = vmax.f32 %v10974_v26, %v10975_v33 }
 0x88c   : > { %v10955_v42 = vadd.f32 %v15532_v57, %v10940_v36 }
 0x88d   : > { %v11012_v18 = vsel %vm9716_vm6, %v10968_v25, -inf  ;;  %v10631_v2 = vpop.f32.mrb[112].mxu1  ;;  %v11001_v53 = vrot.slane %v11000_v54, 2  ;;  %v10989_v61 = vrot.slane %v10988_v30, 1 }
 0x88e   : > { %v10963_v43 = vmax.f32 %v10955_v42, 0.0  ;;  %v10942_v12 = vadd.f32 %v10631_v2, %v10015_v46  ;;  %v12921_v45 = vpop.f32.mrb[113].mxu1  ;;  %v11013_v44 = vrot.slane %v11012_v18, 4 }
 0x88f   : > { %v11002_v0 = vmax.f32 %v11000_v54, %v11001_v53  ;;  %v10990_v41 = vmax.f32 %v10988_v30, %v10989_v61  ;;  %v11761_v54 = vld [vmem:[%s15648_s13] ss:$0 sm:$0xff]  ;;  %v11163_v53 = vld [vmem:[%s15649_s14 + $0x18] sm:$0xff] }
 0x890   : > { %v10977_v49 = vsel %vm9716_vm6, %v10963_v43, -inf  ;;  %v10957_v55 = vadd.f32 %v15532_v57, %v10942_v12  ;;  %v11014_v19 = vmax.f32 %v11012_v18, %v11013_v44 }
 0x891   : > { %v10978_v62 = vrot.slane %v10977_v49, 4  ;;  %v10783_v63 = vpop.f32.mrb[114].mxu1 }
 0x892   : > { %v10965_v60 = vmax.f32 %v10957_v55, 0.0  ;;  %v10944_v56 = vadd.f32 %v10783_v63, %v10167_v5  ;;  %v12931_v58 = vpop.f32.mrb[115].mxu1  ;;  %v11015_v1 = vrot.slane %v11014_v19, 2 }
 0x893   : > { %v10979_v48 = vmax.f32 %v10977_v49, %v10978_v62 }
 0x894   : > { %v10991_v46 = vsel %vm9716_vm6, %v10965_v60, -inf  ;;  %v10959_v4 = vadd.f32 %v15532_v57, %v10944_v56  ;;  %v11016_v14 = vmax.f32 %v11014_v19, %v11015_v1  ;;  %v11160_v19 = vld [vmem:[%s15649_s14] sm:$0xff] }
 0x895   : > { %v10980_v8 = vrot.slane %v10979_v48, 2  ;;  %v10992_v6 = vrot.slane %v10991_v46, 4  ;;  %v10935_v52 = vpop.f32.mrb[116].mxu1 }
 0x896   : > { %v10967_v7 = vmax.f32 %v10959_v4, 0.0  ;;  %v10946_v11 = vadd.f32 %v10935_v52, %v10319_v17  ;;  %v12941_v39 = vpop.f32.mrb[117].mxu1  ;;  %v11003_v17 = vrot.slane %v11002_v0, 1  ;;  %v11017_v37 = vrot.slane %v11016_v14, 1  ;;  %v11162_v4 = vld [vmem:[%s15649_s14 + $0x10] sm:$0xff] }
 0x897   : > { %v10981_v47 = vmax.f32 %v10979_v48, %v10980_v8  ;;  %v10993_v5 = vmax.f32 %v10991_v46, %v10992_v6  ;;  %v11161_v48 = vld [vmem:[%s15649_s14 + $0x8] sm:$0xff]  ;;  %v11167_v6 = vld [vmem:[%s15649_s14 + $0x38] sm:$0xff]  ;;  %v13459_v52 = vpack.c.bf16 %v11162_v4, %v11160_v19  ;;  %v11166_v39 = vld [vmem:[%s15649_s14 + $0x30] sm:$0xff] }
 0x898   : > { %v11005_v13 = vsel %vm9716_vm6, %v10967_v7, -inf  ;;  %v10961_v3 = vadd.f32 %v15532_v57, %v10946_v11  ;;  %v11004_v36 = vmax.f32 %v11002_v0, %v11003_v17  ;;  %v11018_v2 = vmax.f32 %v11016_v14, %v11017_v37  ;;  %v11165_v8 = vld [vmem:[%s15649_s14 + $0x28] sm:$0xff]  ;;  %v11164_v11 = vld [vmem:[%s15649_s14 + $0x20] sm:$0xff] }
 0x899   : > { %v10982_v16 = vrot.slane %v10981_v47, 1  ;;  %v10994_v34 = vrot.slane %v10993_v5, 2  ;;  %v11006_v10 = vrot.slane %v11005_v13, 4  ;;  %v13457_v46 = vpack.c.bf16 %v11163_v53, %v11161_v48  ;;  %v11279_v17 = vld [vmem:[#allocation7 + $0xa8] sm:$0xff] }
 0x89a   : > { %v10969_v20 = vmax.f32 %v10961_v3, 0.0  ;;  %v13461_v7 = vpack.c.bf16 %v11167_v6, %v11165_v8  ;;  %v13463_v33 = vpack.c.bf16 %v11166_v39, %v11164_v11  ;;  %v11258_v3 = vld [vmem:[#allocation7] sm:$0xff]  ;;  %v11283_v37 = vld [vmem:[#allocation7 + $0xc8] sm:$0xff]  ;;  %v11170_v48 = vlaneseq }
 0x89b   : > { %v10983_v22 = vmax.f32 %v10981_v47, %v10982_v16  ;;  %v10995_v23 = vmax.f32 %v10993_v5, %v10994_v34  ;;  %v11007_v35 = vmax.f32 %v11005_v13, %v11006_v10  ;;  %13458 = vmatprep.subr.bf16.mxu1 %v13457_v46  ;;  %v11274_v47 = vld [vmem:[#allocation7 + $0x80] sm:$0xff]  ;;  %v11275_v5 = vld [vmem:[#allocation7 + $0x88] sm:$0xff]  ;;  %v11276_v34 = vld [vmem:[#allocation7 + $0x90] sm:$0xff] }
 0x89c   : > { %v11019_v24 = vsel %vm9716_vm6, %v10969_v20, -inf  ;;  %13460 = vmatpush1.bf16.msra.mxu1 %v13459_v52  ;;  %v13465_v0 = vpack.c.bf16 %v11275_v5, %v11274_v47  ;;  %v11259_v16 = vld [vmem:[#allocation7 + $0x8] sm:$0xff]  ;;  %v11277_v10 = vld [vmem:[#allocation7 + $0x98] sm:$0xff]  ;;  %v11171_v53 = vshrl.u32 %v11170_v48, 7  ;;  %v11168_v46 = vld [vmem:[%s15697_s22] sm:$0x3] }
 0x89d   : > { %v11058_v9 = vsel %vm11057_vm8, %v10983_v22, %v10976_v21  ;;  %v10996_v31 = vrot.slane %v10995_v23, 1  ;;  %v11008_v59 = vrot.slane %v11007_v35, 2  ;;  %v11020_v32 = vrot.slane %v11019_v24, 4  ;;  %13462 = vmatprep.subr.bf16.mxu1 %v13461_v7  ;;  %v11260_v22 = vld [vmem:[#allocation7 + $0x10] sm:$0xff]  ;;  %v11764_v5 = vld [vmem:[%s15699_s21] ss:$0 sm:$0xff] }
 0x89e   : > { %v11060_v57 = vsel %vm11059_vm9, %v10990_v41, %v11058_v9  ;;  %v13467_v20 = vpack.c.bf16 %v11259_v16, %v11258_v3  ;;  %v13469_v21 = vpack.c.bf16 %v11277_v10, %v11276_v34  ;;  %v11278_v41 = vld [vmem:[#allocation7 + $0xa0] sm:$0xff]  ;;  %v11172_v19 = vsub.s32 0, %v11171_v53 }
 0x89f   : > { %v10997_v51 = vmax.f32 %v10995_v23, %v10996_v31  ;;  %v11009_v29 = vmax.f32 %v11007_v35, %v11008_v59  ;;  %v11021_v28 = vmax.f32 %v11019_v24, %v11020_v32  ;;  %v11261_v23 = vld [vmem:[#allocation7 + $0x18] sm:$0xff]  ;;  %v13473_v24 = vpack.c.bf16 %v11279_v17, %v11278_v41  ;;  %v11262_v9 = vld [vmem:[#allocation7 + $0x20] sm:$0xff]  ;;  %v11263_v31 = vld [vmem:[#allocation7 + $0x28] sm:$0xff] }
 0x8a0   : > { %13464 = vmatpush1.bf16.msra.mxu1 %v13463_v33  ;;  %v13471_v14 = vpack.c.bf16 %v11261_v23, %v11260_v22  ;;  %v11280_v59 = vld [vmem:[#allocation7 + $0xb0] sm:$0xff]  ;;  %v11281_v32 = vld [vmem:[#allocation7 + $0xb8] sm:$0xff]  ;;  %v11176_v4 = vsub.s32 1, %v11171_v53  ;;  %v11173_v8 = vrot.slane %v11168_v46, %v11172_v19 }
 0x8a1   : > { %v11010_v38 = vrot.slane %v11009_v29, 1  ;;  %v11022_v40 = vrot.slane %v11021_v28, 2  ;;  %v11062_v25 = vsel %vm11061_vm10, %v10997_v51, %v11060_v57  ;;  %13466 = vmatprep.subr.bf16.mxu1 %v13465_v0  ;;  %v13475_v57 = vpack.c.bf16 %v11263_v31, %v11262_v9 }
 0x8a2   : > { %v11064_v15 = vsel %vm11063_vm11, %v11004_v36, %v11062_v25  ;;  %v13477_v51 = vpack.c.bf16 %v11281_v32, %v11280_v59  ;;  %v11282_v36 = vld [vmem:[#allocation7 + $0xc0] sm:$0xff]  ;;  %v11177_v6 = vrot.slane %v11168_v46, %v11176_v4 }
 0x8a3   : > { %v11011_v42 = vmax.f32 %v11009_v29, %v11010_v38  ;;  %v11023_v18 = vmax.f32 %v11021_v28, %v11022_v40  ;;  %v11264_v29 = vld [vmem:[#allocation7 + $0x30] sm:$0xff]  ;;  %v11265_v28 = vld [vmem:[#allocation7 + $0x38] sm:$0xff]  ;;  %v13481_v40 = vpack.c.bf16 %v11283_v37, %v11282_v36  ;;  %v11266_v25 = vld [vmem:[#allocation7 + $0x40] sm:$0xff] }
 0x8a4   : > { %v13479_v38 = vpack.c.bf16 %v11265_v28, %v11264_v29 }
 0x8a5   : > { %v11024_v43 = vrot.slane %v11023_v18, 1  ;;  %v11066_v12 = vsel %vm11065_vm12, %v11011_v42, %v11064_v15  ;;  %v11267_v15 = vld [vmem:[#allocation7 + $0x48] sm:$0xff]  ;;  %v11284_v42 = vld [vmem:[#allocation7 + $0xd0] sm:$0xff] }
 0x8a6   : > { %v11068_v45 = vsel %vm11067_vm13, %v11018_v2, %v11066_v12  ;;  %v13483_v2 = vpack.c.bf16 %v11267_v15, %v11266_v25  ;;  %v11268_v12 = vld [vmem:[#allocation7 + $0x50] sm:$0xff] }
 0x8a7   : > { %v11025_v50 = vmax.f32 %v11023_v18, %v11024_v43  ;;  %v11285_v18 = vld [vmem:[#allocation7 + $0xd8] sm:$0xff] }
 0x8a8   : > { %v13485_v43 = vpack.c.bf16 %v11285_v18, %v11284_v42 }
 0x8a9   : > { %v11070_v27 = vsel %vm11069_vm14, %v11025_v50, %v11068_v45  ;;  %v11269_v45 = vld [vmem:[#allocation7 + $0x58] sm:$0xff]  ;;  %v11286_v50 = vld [vmem:[#allocation7 + $0xe0] sm:$0xff] }
 0x8aa   : > { %12975 = vmatmul.mubr.f32.vlgmr.msra.gmra.mrb[122].mxu0 %v11070_v27  ;;  %v11287_v27 = vld [vmem:[#allocation7 + $0xe8] sm:$0xff] }
 0x97d   : > { %v11138_v44 = vpop.f32.mrb[122].mxu0 }
 0x97e   : > { %v11139_v49 = vadd.f32 %v11761_v54, %v11138_v44  ;;  %v12976_v55 = vpop.f32.mrb[123].mxu0  ;;  %v13487_v54 = vpack.c.bf16 %v11269_v45, %v11268_v12  ;;  %v13489_v44 = vpack.c.bf16 %v11287_v27, %v11286_v50 }
 0x97f   : > { %v11271_v55 = vld [vmem:[#allocation7 + $0x68] sm:$0xff] }
 0x980   : > { %13648 = vtanh.f32 %v11139_v49  ;;  %v11762_v63 = vmul.f32 -1.442695, %v11139_v49  ;;  %v11270_v49 = vld [vmem:[#allocation7 + $0x60] sm:$0xff] }
 0x982   : > { %13650 = vpow2.f32 %v11762_v63  ;;  %v11288_v63 = vld [vmem:[#allocation7 + $0xf0] sm:$0xff] }
 0x98a   : > { %v13649_v62 = vpop.eup %13648 }
 0x98b   : > { %11150 = vrot.lane.b32.xlu0 %v13649_v62, %s13820_s15  ;;  %v13491_v62 = vpack.c.bf16 %v11271_v55, %v11270_v49  ;;  %s11482_s15 = sshll.u32 %s613_s30, 3 }
 0x98c   : > { %v13651_v60 = vpop.eup %13650  ;;  %s615_s2 = scalar_lea.vmem [#allocation8], %s11482_s15  ;;  %s13744_s15 = sshll.u32 %s13824_s0, 4  ;;  %s13745_s15 = int_to_ptr.vmem [resolvable:$false] %s13744_s15 }
 0x98d   : > { %v11145_v56 = vadd.f32 1.0, %v13651_v60  ;;  %v11289_v60 = vld [vmem:[#allocation7 + $0xf8] sm:$0xff]  ;;  %s11382_s10 = sshll.u32 %s615_s2, 4  ;;  %s13746_s20 = scalar_lea.vmem %s13745_s15, 256  ;;  %s15595_s10 = int_to_ptr.vmem [resolvable:$true] %s11382_s10 }
 0x98e   : > { %s13740_s22 = scalar_lea.vmem %s15595_s10, 128  ;;  %p13747_p4 = scmp.lt.s32.totalorder %s15595_s10, %s13745_s15 }
 0x98f   : > { %13652 = vrcp.f32 %v11145_v56  ;;  %v13493_v56 = vpack.c.bf16 %v11289_v60, %v11288_v63  ;;  %p13741_p12 = scmp.ne.s32.totalorder %s15595_s10, %s13740_s22  ;;  %p13748_p7 = scmp.lt.s32.totalorder %s13746_s20, %s13740_s22 }
 0x991   : > { %p13742_p2 = pnand %p13741_p12, %p15701_p1  ;;  %p13749_p8 = por %p13748_p7, %p13747_p4 }
 0x993   : > { %p13743_p3 = pneg %p13742_p2 }
 0x995   : > { %p13750_p11 = pnand %p13749_p8, %p13743_p3 }
 0x999   : > { %v13653_v58 = vpop.eup %13652 }
 0x9fd   : > { %v11151_v26 = vpop.permute.xlu0 %11150 }
 0x9fe   : > { %v11153_v30 = vmul.f32 %v13653_v58, %v11151_v26  ;;  %v11273_v26 = vld [vmem:[#allocation7 + $0x78] sm:$0xff] }
 0xa00   : > { %13654 = vtanh.f32 %v11153_v30 }
 0xa0a   : > { %v13655_v61 = vpop.eup %13654 }
 0xa0b   : > { %11156 = vrot.lane.b32.xlu1 %v13655_v61, %s13819_s29 }
 0xa7d   : > { %v11157_v1 = vpop.permute.xlu1 %11156 }
 0xa7e   : > { %v11159_v13 = vmul.f32 %v13653_v58, %v11157_v1  ;;  %v11272_v58 = vld [vmem:[#allocation7 + $0x70] sm:$0xff] }
 0xa7f   : > { %v13495_v30 = vpack.c.bf16 %v11273_v26, %v11272_v58 }
 0xa80   : > { %11181 = vrot.lane.b32.xlu0 %v11159_v13, %s13819_s29  ;;  %s15593_s29 = scalar_lea.hbm %s15700_s17, %s11766_s18 }
 0xaf2   : > { %v11182_v35 = vpop.permute.xlu0 %11181 }
 0xaf3   : > { %11763 = vmatmul.mubr.msk.f32.vlgmr.msra.gmra.mrb[118].mxu1 %vm4658_vm2, %v11182_v35 }
 0xaf4   : > { %13468 = vmatpush3.bf16.msra.mxu1 %v13467_v20 }
 0xaf5   : > { %13470 = vmatprep.subr.bf16.mxu1 %v13469_v21 }
 0xaf8   : > { %13472 = vmatpush3.bf16.msra.mxu1 %v13471_v14 }
 0xaf9   : > { %13474 = vmatprep.subr.bf16.mxu1 %v13473_v24 }
 0xafc   : > { %13476 = vmatpush3.bf16.msra.mxu1 %v13475_v57 }
 0xafd   : > { %13478 = vmatprep.subr.bf16.mxu1 %v13477_v51 }
 0xb00   : > { %13480 = vmatpush3.bf16.msra.mxu1 %v13479_v38 }
 0xb01   : > { %13482 = vmatprep.subr.bf16.mxu1 %v13481_v40 }
 0xb04   : > { %13484 = vmatpush3.bf16.msra.mxu1 %v13483_v2 }
 0xb05   : > { %13486 = vmatprep.subr.bf16.mxu1 %v13485_v43 }
 0xb08   : > { %13488 = vmatpush3.bf16.msra.mxu1 %v13487_v54 }
 0xb09   : > { %13490 = vmatprep.subr.bf16.mxu1 %v13489_v44 }
 0xb0c   : > { %13492 = vmatpush3.bf16.msra.mxu1 %v13491_v62 }
 0xb0d   : > { %13494 = vmatprep.subr.bf16.mxu1 %v13493_v56 }
 0xb10   : > { %13496 = vmatpush3.bf16.msra.mxu1 %v13495_v30 }
 0xbc6   : > { %v11251_v52 = vpop.f32.mrb[118].mxu1 }
 0xbc7   : > { %v11252_v7 = vadd.f32 %v11251_v52, %v11173_v8  ;;  %v11253_v11 = vpop.f32.mrb[119].mxu1 }
 0xbc8   : > { %v11254_v39 = vadd.f32 %v11253_v11, %v11177_v6 }
 0xbc9   : > { %v11256_v61 = vmax.f32 %v11252_v7, 0.0 }
 0xbca   : > { %v11257_v33 = vmax.f32 %v11254_v39, 0.0 }
 0xbcc   : > { %11361 = vmatprep.mubr.f32.mxu1 %v11257_v33 }
 0xbcd   : > { %11362 = vmatmul.mubr.f32.vlgmr.msra.gmra.mrb[120].mxu1 %v11256_v61 }
 0xca0   : > { %v12171_v47 = vpop.f32.mrb[120].mxu1 }
 0xca1   : > { %v12172_v0 = vpop.f32.mrb[121].mxu1 }
 0xca2   : > { %v12173_v1 = vadd.f32 %v12172_v0, %v12171_v47 }
 0xca4   : > { %v11364_v13 = vadd.f32 %v12173_v1, %v11764_v5 }
 0xca6   : > { %11367 = vst [vmem:[%s615_s2] sm:$0xff] %v11364_v13 }
 0xca7   : > { %13753 = shalt.err (!%p13750_p11)
}
 0xca8   : > { %s13754_s30 = scalar_lea.hbm %s15593_s29, 128  ;;  %s13758_s18 = scalar_lea.hbm %s15700_s17, 256 }
 0xca9   : > { %p13755_p13 = scmp.ne.s32.totalorder %s15593_s29, %s13754_s30  ;;  %p13759_p6 = scmp.lt.u32.totalorder %s15593_s29, %s15700_s17 }
 0xcaa   : > { %p13760_p9 = scmp.lt.u32.totalorder %s13758_s18, %s13754_s30  ;;  %p13762_p12 = scmp.lt.u32.totalorder %s13754_s30, %s15593_s29 }
 0xcab   : > { %p13756_p5 = pnand %p13755_p13, %p15701_p1 }
 0xcac   : > { %p13761_p10 = por %p13760_p9, %p13759_p6 }
 0xcad   : > { %p13757_p0 = pneg %p13756_p5 }
 0xcae   : > { %p13763_p2 = por %p13762_p12, %p13761_p10 }
 0xcb0   : > { %p13764_p3 = pnand %p13763_p2, %p13757_p0 }
 0xcb2   : > { %13767 = shalt.err (!%p13764_p3)
}
 0xcb3   : > { %13541 = dma.vmem_to_hbm [thread:$0]  (%p15701_p1), %s15595_s10, 128, %s15593_s29, %s11369_s27  }
 0xcb4 PF: > { %s15702_s24 = sld [smem:[#allocation14_spill]]  ;;  %s15703_s22 = sld [smem:[#allocation12_spill]] }
 0xcb5   : > { %s15704_s0 = sld [smem:[#allocation18_spill]] }
 0xcba   : > { %p13563_p4 = scmp.ge.s32.totalorder %s15702_s24, 2  ;;  %s11394_s15 = sand.u32 1, %s15703_s22  }
 0xcbb   : > { %p15705_p7 = scmp.ne.s32.totalorder %s15704_s0, 0  ;;  %s11395_s20 = scalar_lea.sflag [#allocation4], %s11394_s15 }
 0xcbd   : > { %p13554_p8 = pnand %p13563_p4, %p15705_p7 }
 0xcbf   : > { %13793 = dma.done.wait (!%p13554_p8), %s11395_s20, 128  }
 0xcc0   : > { %13795 = vsyncadd (!%p13554_p8), %s11395_s20, 4294967168  ;;  %s15706_s30 = sld [smem:[#allocation15_spill]]  ;;  %s15707_s26 = sld [smem:[#allocation13_spill]] }
 0xcc1   : > { %s15708_s29 = sld [smem:[#allocation16_spill]]  ;;  %s15709_s27 = smov %s13802_s28 }
 0xcc6   : > { %p30_p11 = scmp.ge.s32.totalorder %s15706_s30, 4   ;;  %s15710_s28 = smov %s15707_s26 }
 0xcc8   :  { %32 = sbr.rel (!%p30_p11) target bundleno = 13 (0xd), region = 147 }
 0xccf   :  { %11400 = vsyncpa [#allocation3], 1 }
 0xcd0   :  { %11402 = vsyncpa [#allocation3 + $0x1], 1 }
 0xcd1   :  { %11403 = vsyncpa [#allocation6], 1 }
 0xcd2   :  { %11404 = vsyncpa [#allocation4], 1 }
 0xcd3   :  { %11406 = vsyncpa [#allocation4 + $0x1], 1 }

</bundles_post_ra>
